<compile_context>
chip_gen: v7x
topology: tpu7x:2x2x1
jax: 0.10.0
libtpu: 0.0.40
codegen_flags: <defaults>
</compile_context>

<pallas_src>
import functools
import math

import jax
import jax.numpy as jnp
from jax import lax
from jax.experimental import pallas as pl
from jax.experimental.pallas import tpu as pltpu


# -----------------------------------------------------------------------------
# Plain-JAX glue: pose construction, ray-distance range, ProSTGrid generation.
# -----------------------------------------------------------------------------
def rtvec_to_pose(rtvec):
    """JAX port of tgm.rtvec_to_pose: (B,6)=[rx,ry,rz,tx,ty,tz] -> (B,4,4) pose."""
    rvec = rtvec[:, :3]
    tvec = rtvec[:, 3:]
    theta = jnp.sqrt(jnp.sum(rvec * rvec, axis=-1) + 1e-32)            # (B,)
    k = rvec / theta[:, None]                                          # (B,3)
    kx, ky, kz = k[:, 0], k[:, 1], k[:, 2]
    c, s = jnp.cos(theta), jnp.sin(theta)
    v = 1.0 - c
    r0 = jnp.stack([c + kx * kx * v, kx * ky * v - kz * s, kx * kz * v + ky * s], -1)
    r1 = jnp.stack([ky * kx * v + kz * s, c + ky * ky * v, ky * kz * v - kx * s], -1)
    r2 = jnp.stack([kz * kx * v - ky * s, kz * ky * v + kx * s, c + kz * kz * v], -1)
    rot = jnp.stack([r0, r1, r2], axis=-2)                             # (B,3,3)
    top = jnp.concatenate([rot, tvec[:, :, None]], axis=-1)            # (B,3,4)
    bot = jnp.broadcast_to(jnp.array([0.0, 0.0, 0.0, 1.0], jnp.float32),
                           (rtvec.shape[0], 1, 4))
    return jnp.concatenate([top, bot], axis=1)                         # (B,4,4)


def raydist_range(transform_mat3x4, corner_pt, src):
    # TODO(synk): raydist_range approximated (source at (0,0,src)); original source unavailable.
    corner_mv = jnp.einsum("bij,bkj->bki", transform_mat3x4, corner_pt)   # (B,8,3)
    src_pt = jnp.array([0.0, 0.0, src], jnp.float32)
    d = jnp.sqrt(jnp.sum((corner_mv - src_pt) ** 2, axis=-1))
    return jnp.min(d, axis=1), jnp.max(d, axis=1)


def prost_grid_lane_major(corner_pt, y_shape, dist_min, dist_max, src, det,
                          pix_spacing, dray, tile_p):
    """Cone-beam ray sampling, emitted directly in the kernel's lane-major layout
    (B, 4, N) with tile-local ordering n = tile*tile_p*dray + s*tile_p + p.
    TODO(synk): approximates the custom ProSTGrid CUDA op (source at (0,0,src),
    static dray derived from step_size)."""
    B, _, H, W = y_shape
    P = H * W
    assert P % tile_p == 0, (P, tile_p)
    n_tiles = P // tile_p
    src_pt = jnp.array([0.0, 0.0, src], jnp.float32)
    us = (jnp.arange(W, dtype=jnp.float32) - (W - 1) / 2.0) * pix_spacing
    vs = (jnp.arange(H, dtype=jnp.float32) - (H - 1) / 2.0) * pix_spacing
    vg, ug = jnp.meshgrid(vs, us, indexing="ij")                        # (H,W)
    pix = jnp.stack([ug, vg, jnp.full_like(ug, -det)], axis=0)          # (3,H,W) coord-major
    dirs = pix - src_pt[:, None, None]
    dirs = dirs / jnp.sqrt(jnp.sum(dirs * dirs, axis=0, keepdims=True))
    dirs = dirs.reshape(3, n_tiles, 1, tile_p)                          # pixels on the lane axis
    steps = (jnp.arange(dray, dtype=jnp.float32) + 0.5) / dray          # (dray,)
    t = dist_min[:, None] + steps[None, :] * (dist_max - dist_min)[:, None]   # (B,dray)
    pts = (src_pt[None, :, None, None, None]
           + dirs[None] * t[:, None, None, :, None])                    # (B,3,n_tiles,dray,tile_p)
    cmin = corner_pt[:, :, :3].min(axis=1)                              # (B,3)
    cmax = corner_pt[:, :, :3].max(axis=1)
    pts = (2.0 * (pts - cmin[:, :, None, None, None])
           / (cmax - cmin)[:, :, None, None, None] - 1.0)
    ones = jnp.ones((B, 1) + pts.shape[2:], jnp.float32)
    return jnp.concatenate([pts, ones], axis=1).reshape(B, 4, P * dray)


def lane_major_to_pixel_major(grid_lm, H, W, dray, tile_p):
    """(B,4,N) kernel layout -> (B,H,W,dray,4) pixel-major (for the JAX reference)."""
    B = grid_lm.shape[0]
    P = H * W
    g = grid_lm.reshape(B, 4, P // tile_p, dray, tile_p)
    return jnp.transpose(g, (0, 2, 4, 3, 1)).reshape(B, H, W, dray, 4)


# -----------------------------------------------------------------------------
# Generation-aware tuning helpers.
# -----------------------------------------------------------------------------
def _vmem_limit_bytes():
    """~96 MiB on v5e/v6e (128 MiB physical), ~48 MiB on v7x (64 MiB physical)."""
    try:
        cap = int(pltpu.get_tpu_info().vmem_capacity_bytes)
    except Exception:
        cap = 64 * 1024 * 1024                       # conservative (v7x-sized) fallback
    return max(32 * 1024 * 1024, min(3 * cap // 4, 100 * 1024 * 1024))


def _choose_tile_p(P, B, dray, c, dv, hv, wv, vmem_limit_bytes, max_tile_p=512):
    """Largest 128-multiple pixel tile that fits ~half the scoped VMEM and still
    leaves >=2 independent grid steps for megacore sharding (v7x has 2 TCs)."""
    assert P % 128 == 0, ("detector pixel count must be a multiple of 128", P)
    dh = dv * hv
    cands = [tp for tp in range(128, min(P, max_tile_p) + 1, 128) if P % tp == 0]

    def est(tp):
        tn = tp * dray
        return (dh * tn * 6                 # one-hot f32 intermediate + bf16 copy
                + 2 * c * wv * tn * 4       # MXU result + x-weighted temporaries
                + 2 * 4 * tn * 4            # points block, double-buffered
                + 2 * c * tp * 4            # output block, double-buffered
                + 2 * c * wv * dh * 2)      # bf16 volume block, double-buffered

    fits = [tp for tp in cands if est(tp) <= vmem_limit_bytes // 2] or [128]
    good = [tp for tp in fits if B * (P // tp) >= 2]
    return max(good) if good else max(fits)


# -----------------------------------------------------------------------------
# Pallas kernel: bmm + trilinear interpolation + ray-sum reduction.
# -----------------------------------------------------------------------------
def _prost_project_kernel(tmt_ref, pts_ref, vol_ref, out_ref, *,
                          dv, hv, wv, c, tile_p, tile_n, dray):
    b = pl.program_id(0)
    # transform_mat3x4^T flattened row-major in SMEM: t[r*3 + col] = T^T[r, col].
    t = [tmt_ref[b, j] for j in range(12)]

    pts = pts_ref[0]                                   # (4, tile_n) lane-major points
    px, py, pz, pw = pts[0:1, :], pts[1:2, :], pts[2:3, :], pts[3:4, :]

    # grid.bmm(transform_mat3x4^T): 12 scalar FMAs broadcast over the lane axis.
    cx = px * t[0] + py * t[3] + pz * t[6] + pw * t[9]
    cy = px * t[1] + py * t[4] + pz * t[7] + pw * t[10]
    cz = px * t[2] + py * t[5] + pz * t[8] + pw * t[11]

    # _bilinear_interpolate_no_torch_5D coordinate convention: idx = size*(g*0.5+0.5).
    xc = wv * (cx * 0.5 + 0.5)
    yc = hv * (cy * 0.5 + 0.5)
    zc = dv * (cz * 0.5 + 0.5)
    x0f, y0f, z0f = jnp.floor(xc), jnp.floor(yc), jnp.floor(zc)
    xd, yd, zd = xc - x0f, yc - y0f, zc - z0f
    x0 = jnp.clip(x0f.astype(jnp.int32), 0, wv - 1)
    x1 = jnp.clip(x0f.astype(jnp.int32) + 1, 0, wv - 1)
    y0 = jnp.clip(y0f.astype(jnp.int32), 0, hv - 1)
    y1 = jnp.clip(y0f.astype(jnp.int32) + 1, 0, hv - 1)
    z0 = jnp.clip(z0f.astype(jnp.int32), 0, dv - 1)
    z1 = jnp.clip(z0f.astype(jnp.int32) + 1, 0, dv - 1)

    # ---- Factorized weighted one-hot (review item 1) ----------------------------
    # oz:(D,tile_n) and oy:(H,tile_n) small 2-tap one-hots, combined with a single
    # broadcast-multiply over the (z*H + y) row axis.  Exactly equivalent to the
    # old 4-corner sum, including the clamped-duplicate-corner add case
    # (clamped z0==z1 -> oz row carries (1-zd)+zd = 1, same for y).
    ziota = lax.broadcasted_iota(jnp.int32, (dv, tile_n), 0)
    oz = (jnp.where(ziota == z0, 1.0 - zd, 0.0)
          + jnp.where(ziota == z1, zd, 0.0))                           # (dv, tile_n) f32
    yiota = lax.broadcasted_iota(jnp.int32, (hv, tile_n), 0)
    oy = (jnp.where(yiota == y0, 1.0 - yd, 0.0)
          + jnp.where(yiota == y1, yd, 0.0))                           # (hv, tile_n) f32
    onehot = (oz[:, None, :] * oy[None, :, :]).reshape(dv * hv, tile_n)
    onehot = onehot.astype(jnp.bfloat16)                               # bf16 MXU operand

    # (z,y)-interpolated x-rows for all channels on the MXU, native bf16 x bf16:
    # (C*W, D*H) x (D*H, tile_n) -> f32 (C*W, tile_n).
    vals = jnp.dot(vol_ref[0], onehot, preferred_element_type=jnp.float32)

    # x interpolation: 2-tap lane-dense mask over the W sublane axis + sublane reduce.
    wiota = lax.broadcasted_iota(jnp.int32, (wv, tile_n), 0)
    xw = (jnp.where(wiota == x0, 1.0 - xd, 0.0)
          + jnp.where(wiota == x1, xd, 0.0))                           # (wv, tile_n)
    interp = jnp.sum(vals.reshape(c, wv, tile_n) * xw[None, :, :], axis=1)  # (c, tile_n)

    # torch.sum over the ray dimension: tile-local ordering is s*tile_p + p, so the
    # reduction is dray static 128-aligned lane slices added on the VPU.
    acc = interp[:, 0:tile_p]
    for s in range(1, dray):
        acc = acc + interp[:, s * tile_p:(s + 1) * tile_p]
    out_ref[0] = acc                                                   # (c, tile_p)


def prost_project_pallas(vol_t, grid_lm, tmt, *, c, dv, hv, wv, H, W, dray,
                         tile_p, vmem_limit_bytes):
    """vol_t: (B, C*W, D*H) bf16 lane-dense volume; grid_lm: (B, 4, H*W*dray) lane-major
    points in kernel order; tmt: (B, 12) transform^T scalars. Returns (B, C, H, W)."""
    B = vol_t.shape[0]
    P = H * W
    tile_n = tile_p * dray
    N = P * dray
    assert grid_lm.shape == (B, 4, N), grid_lm.shape
    assert vol_t.shape == (B, c * wv, dv * hv), vol_t.shape

    kernel = functools.partial(_prost_project_kernel, dv=dv, hv=hv, wv=wv,
                               c=c, tile_p=tile_p, tile_n=tile_n, dray=dray)
    out = pl.pallas_call(
        kernel,
        out_shape=jax.ShapeDtypeStruct((B, c, P), jnp.float32),
        grid_spec=pltpu.PrefetchScalarGridSpec(
            num_scalar_prefetch=0,
            grid=(B, P // tile_p),
            in_specs=[
                pl.BlockSpec(memory_space=pltpu.MemorySpace.SMEM),            # transform^T
                pl.BlockSpec((1, 4, tile_n), lambda b, i: (b, 0, i)),         # grid points
                # Volume block index is constant across the pixel-tile axis; at demo
                # size double-buffering it is negligible.  TODO(synk): for 128^3-class
                # volumes single-buffer it (pl.Buffered(1) / manual z-slab DMA), see
                # header TODO -- most binding on v7x's 64 MiB VMEM.
                pl.BlockSpec((1, c * wv, dv * hv), lambda b, i: (b, 0, 0)),   # volume (bf16)
            ],
            out_specs=pl.BlockSpec((1, c, tile_p), lambda b, i: (b, 0, i)),   # lane-dense out
        ),
        compiler_params=pltpu.CompilerParams(
            dimension_semantics=("parallel", "parallel"),
            vmem_limit_bytes=vmem_limit_bytes),
    )(tmt, grid_lm, vol_t)
    return out.reshape(B, c, H, W)


# -----------------------------------------------------------------------------
# Module wrapper (mirrors the PyTorch ProST module).
# -----------------------------------------------------------------------------
class ProST:
    def __init__(self, param):
        self.src = param[0]
        self.det = param[1]
        self.pix_spacing = param[2]
        self.step_size = param[3]
        # TODO(synk): the real ProSTGrid CUDA op derives the per-ray sample count from
        # step_size and the data-dependent dist range; here it must be a static constant.
        self.dray = max(2, int(round(2.0 * math.sqrt(3.0) / self.step_size)))
        self.vmem_limit_bytes = _vmem_limit_bytes()
        self._vol_cache = None      # (source array, prepared bf16 slab, (C,D,H,W))

    # -- volume preparation, hoisted out of the per-call path (review item 6) -----
    def prepare_volume(self, x):
        """NCDHW f32 volume -> lane-dense bf16 (B, C*W, D*H): rows (c, x-col), lanes z*H+y."""
        B, C, DV, HV, WV = x.shape
        vol_t = jnp.transpose(x, (0, 1, 4, 2, 3)).reshape(B, C * WV, DV * HV)
        return vol_t.astype(jnp.bfloat16), (C, DV, HV, WV)

    def _prepared(self, x):
        if self._vol_cache is None or self._vol_cache[0] is not x:
            vol_t, dims = self.prepare_volume(x)
            self._vol_cache = (x, vol_t, dims)
        return self._vol_cache[1], self._vol_cache[2]

    def _geometry(self, y_shape, rtvec, corner_pt, tile_p):
        transform_mat4x4 = rtvec_to_pose(rtvec)
        transform_mat3x4 = transform_mat4x4[:, :3, :]
        dist_min, dist_max = raydist_range(transform_mat3x4, corner_pt, self.src)
        grid_lm = prost_grid_lane_major(corner_pt, y_shape, dist_min, dist_max,
                                        self.src, self.det, self.pix_spacing,
                                        self.dray, tile_p)
        return grid_lm, transform_mat3x4

    def __call__(self, x, y, rtvec, corner_pt):
        B = rtvec.shape[0]
        H, W = y.shape[2], y.shape[3]
        vol_t, (C, DV, HV, WV) = self._prepared(x)
        tile_p = _choose_tile_p(H * W, B, self.dray, C, DV, HV, WV, self.vmem_limit_bytes)
        grid_lm, transform_mat3x4 = self._geometry(y.shape, rtvec, corner_pt, tile_p)
        tmt = jnp.transpose(transform_mat3x4, (0, 2, 1)).reshape(B, 12).astype(jnp.float32)
        out = prost_project_pallas(vol_t, grid_lm, tmt, c=C, dv=DV, hv=HV, wv=WV,
                                   H=H, W=W, dray=self.dray, tile_p=tile_p,
                                   vmem_limit_bytes=self.vmem_limit_bytes)     # (B,C,H,W)
        return out[:, 0] if out.shape[1] == 1 else out   # torch ref returns (B,H,W) for C==1


# -----------------------------------------------------------------------------
# Pure-JAX reference for the kernelized hot path (for validation).
# -----------------------------------------------------------------------------
def _trilinear_ref(vol, grid):
    B, C, D, Hh, Ww = vol.shape
    gx, gy, gz = grid[..., 0], grid[..., 1], grid[..., 2]
    xc, yc, zc = Ww * (gx * 0.5 + 0.5), Hh * (gy * 0.5 + 0.5), D * (gz * 0.5 + 0.5)
    x0f, y0f, z0f = jnp.floor(xc), jnp.floor(yc), jnp.floor(zc)
    xd, yd, zd = xc - x0f, yc - y0f, zc - z0f
    x0 = jnp.clip(x0f.astype(jnp.int32), 0, Ww - 1)
    x1 = jnp.clip(x0f.astype(jnp.int32) + 1, 0, Ww - 1)
    y0 = jnp.clip(y0f.astype(jnp.int32), 0, Hh - 1)
    y1 = jnp.clip(y0f.astype(jnp.int32) + 1, 0, Hh - 1)
    z0 = jnp.clip(z0f.astype(jnp.int32), 0, D - 1)
    z1 = jnp.clip(z0f.astype(jnp.int32) + 1, 0, D - 1)

    def gather(iz, iy, ix):
        return jax.vmap(lambda v, a, b, c: v[:, a, b, c])(vol, iz, iy, ix)  # (B,C,H,W,dray)

    def w(a):
        return a[:, None]

    return (gather(z0, y0, x0) * w((1 - zd) * (1 - yd) * (1 - xd))
            + gather(z0, y0, x1) * w((1 - zd) * (1 - yd) * xd)
            + gather(z0, y1, x0) * w((1 - zd) * yd * (1 - xd))
            + gather(z0, y1, x1) * w((1 - zd) * yd * xd)
            + gather(z1, y0, x0) * w(zd * (1 - yd) * (1 - xd))
            + gather(z1, y0, x1) * w(zd * (1 - yd) * xd)
            + gather(z1, y1, x0) * w(zd * yd * (1 - xd))
            + gather(z1, y1, x1) * w(zd * yd * xd))


def prost_forward_reference(x, grid_pixel_major, transform_mat3x4):
    """x: (B,C,D,H,W); grid_pixel_major: (B,H,W,dray,4) homogeneous; -> (B,C,H,W)."""
    tmt = jnp.transpose(transform_mat3x4, (0, 2, 1))                   # (B,4,3)
    coords = jnp.einsum("bhwsk,bkj->bhwsj", grid_pixel_major, tmt)     # (B,H,W,dray,3)
    x_3d = _trilinear_ref(x, coords)                                   # (B,C,H,W,dray)
    return jnp.sum(x_3d, axis=-1)                                      # (B,C,H,W)


if __name__ == "__main__":
    key = jax.random.PRNGKey(0)
    B, C = 2, 1
    DV = HV = WV = 16            # CT volume (B, C, 16, 16, 16)
    H = W = 16                   # detector image size (P = 256 pixels)
    SRC, DET, PIX_SPACING, STEP_SIZE = 4.0, 2.0, 0.25, 0.5

    kx, kr = jax.random.split(key)
    x = jax.random.normal(kx, (B, C, DV, HV, WV), jnp.float32)
    y = jnp.zeros((B, 1, H, W), jnp.float32)                 # only its shape is used
    rtvec = 0.1 * jax.random.normal(kr, (B, 6), jnp.float32)
    corners = jnp.array([[sx, sy, sz, 1.0]
                         for sz in (-1.0, 1.0) for sy in (-1.0, 1.0) for sx in (-1.0, 1.0)],
                        jnp.float32)
    corner_pt = jnp.broadcast_to(corners, (B, 8, 4))

    model = ProST((SRC, DET, PIX_SPACING, STEP_SIZE))
    out = jax.block_until_ready(model(x, y, rtvec, corner_pt))
    assert out.shape == (B, H, W), out.shape
    # Second call with the same volume: exercises the prepared-volume cache
    # (simulates one more registration iteration).
    out2 = jax.block_until_ready(model(x, y, rtvec, corner_pt))
    assert out2.shape == out.shape

    # Validate the Pallas hot path against the pure-JAX reference (same sample points:
    # un-transpose the kernel's lane-major grid back to pixel-major).
    tile_p = _choose_tile_p(H * W, B, model.dray, C, DV, HV, WV, model.vmem_limit_bytes)
    grid_lm, T34 = model._geometry(y.shape, rtvec, corner_pt, tile_p)
    grid_pm = lane_major_to_pixel_major(grid_lm, H, W, model.dray, tile_p)
    ref = prost_forward_reference(x, grid_pm, T34)[:, 0]
    err = float(jnp.max(jnp.abs(out - ref)))
    scale = float(jnp.max(jnp.abs(ref))) + 1e-6
    # bf16 volume + bf16 interpolation weights (f32 MXU accumulate) vs f32 reference.
    assert err / scale < 2e-2, (err, scale)

    print("KERNEL_OK")
</pallas_src>

<mosaic_0001>
module attributes {stable_mosaic.version = 11 : i64} {
  func.func @_prost_project_kernel(%arg0: i32, %arg1: i32, %arg2: memref<2x12xf32, #tpu.memory_space<smem>>, %arg3: memref<1x4x1792xf32, #tpu.memory_space<vmem>>, %arg4: memref<1x16x256xbf16, #tpu.memory_space<vmem>>, %arg5: memref<1x1x256xf32, #tpu.memory_space<vmem>>) attributes {dimension_semantics = [#tpu.dimension_semantics<parallel>, #tpu.dimension_semantics<parallel>], iteration_bounds = array<i64: 2, 1>, scalar_prefetch = 0 : i64, scratch_operands = 0 : i64, tpu.core_type = #tpu.core_type<tc>, window_params = [{transform_indices = @transform_0, window_bounds = array<i64: 2, 12>}, {transform_indices = @transform_1, window_bounds = array<i64: 1, 4, 1792>}, {transform_indices = @transform_2, window_bounds = array<i64: 1, 16, 256>}, {transform_indices = @transform_3, window_bounds = array<i64: 1, 1, 256>}]} {
    %0 = arith.index_cast %arg0 : i32 to index
    %c0 = arith.constant 0 : index
    %1 = memref.load %arg2[%0, %c0] : memref<2x12xf32, #tpu.memory_space<smem>>
    %2 = arith.index_cast %arg0 : i32 to index
    %c1 = arith.constant 1 : index
    %3 = memref.load %arg2[%2, %c1] : memref<2x12xf32, #tpu.memory_space<smem>>
    %4 = arith.index_cast %arg0 : i32 to index
    %c2 = arith.constant 2 : index
    %5 = memref.load %arg2[%4, %c2] : memref<2x12xf32, #tpu.memory_space<smem>>
    %6 = arith.index_cast %arg0 : i32 to index
    %c3 = arith.constant 3 : index
    %7 = memref.load %arg2[%6, %c3] : memref<2x12xf32, #tpu.memory_space<smem>>
    %8 = arith.index_cast %arg0 : i32 to index
    %c4 = arith.constant 4 : index
    %9 = memref.load %arg2[%8, %c4] : memref<2x12xf32, #tpu.memory_space<smem>>
    %10 = arith.index_cast %arg0 : i32 to index
    %c5 = arith.constant 5 : index
    %11 = memref.load %arg2[%10, %c5] : memref<2x12xf32, #tpu.memory_space<smem>>
    %12 = arith.index_cast %arg0 : i32 to index
    %c6 = arith.constant 6 : index
    %13 = memref.load %arg2[%12, %c6] : memref<2x12xf32, #tpu.memory_space<smem>>
    %14 = arith.index_cast %arg0 : i32 to index
    %c7 = arith.constant 7 : index
    %15 = memref.load %arg2[%14, %c7] : memref<2x12xf32, #tpu.memory_space<smem>>
    %16 = arith.index_cast %arg0 : i32 to index
    %c8 = arith.constant 8 : index
    %17 = memref.load %arg2[%16, %c8] : memref<2x12xf32, #tpu.memory_space<smem>>
    %18 = arith.index_cast %arg0 : i32 to index
    %c9 = arith.constant 9 : index
    %19 = memref.load %arg2[%18, %c9] : memref<2x12xf32, #tpu.memory_space<smem>>
    %20 = arith.index_cast %arg0 : i32 to index
    %c10 = arith.constant 10 : index
    %21 = memref.load %arg2[%20, %c10] : memref<2x12xf32, #tpu.memory_space<smem>>
    %22 = arith.index_cast %arg0 : i32 to index
    %c11 = arith.constant 11 : index
    %23 = memref.load %arg2[%22, %c11] : memref<2x12xf32, #tpu.memory_space<smem>>
    %c0_0 = arith.constant 0 : index
    %c0_1 = arith.constant 0 : index
    %c0_2 = arith.constant 0 : index
    %24 = vector.load %arg3[%c0_0, %c0_1, %c0_2] : memref<1x4x1792xf32, #tpu.memory_space<vmem>>, vector<1x4x1792xf32>
    %25 = vector.shape_cast %24 : vector<1x4x1792xf32> to vector<4x1792xf32>
    %26 = vector.extract_strided_slice %25 {offsets = [0, 0], sizes = [1, 1792], strides = [1, 1]} : vector<4x1792xf32> to vector<1x1792xf32>
    %27 = vector.extract_strided_slice %25 {offsets = [1, 0], sizes = [1, 1792], strides = [1, 1]} : vector<4x1792xf32> to vector<1x1792xf32>
    %28 = vector.extract_strided_slice %25 {offsets = [2, 0], sizes = [1, 1792], strides = [1, 1]} : vector<4x1792xf32> to vector<1x1792xf32>
    %29 = vector.extract_strided_slice %25 {offsets = [3, 0], sizes = [1, 1792], strides = [1, 1]} : vector<4x1792xf32> to vector<1x1792xf32>
    %30 = vector.broadcast %1 : f32 to vector<1x1792xf32>
    %31 = arith.mulf %26, %30 : vector<1x1792xf32>
    %32 = vector.broadcast %7 : f32 to vector<1x1792xf32>
    %33 = arith.mulf %27, %32 : vector<1x1792xf32>
    %34 = arith.addf %31, %33 : vector<1x1792xf32>
    %35 = vector.broadcast %13 : f32 to vector<1x1792xf32>
    %36 = arith.mulf %28, %35 : vector<1x1792xf32>
    %37 = arith.addf %34, %36 : vector<1x1792xf32>
    %38 = vector.broadcast %19 : f32 to vector<1x1792xf32>
    %39 = arith.mulf %29, %38 : vector<1x1792xf32>
    %40 = arith.addf %37, %39 : vector<1x1792xf32>
    %41 = vector.broadcast %3 : f32 to vector<1x1792xf32>
    %42 = arith.mulf %26, %41 : vector<1x1792xf32>
    %43 = vector.broadcast %9 : f32 to vector<1x1792xf32>
    %44 = arith.mulf %27, %43 : vector<1x1792xf32>
    %45 = arith.addf %42, %44 : vector<1x1792xf32>
    %46 = vector.broadcast %15 : f32 to vector<1x1792xf32>
    %47 = arith.mulf %28, %46 : vector<1x1792xf32>
    %48 = arith.addf %45, %47 : vector<1x1792xf32>
    %49 = vector.broadcast %21 : f32 to vector<1x1792xf32>
    %50 = arith.mulf %29, %49 : vector<1x1792xf32>
    %51 = arith.addf %48, %50 : vector<1x1792xf32>
    %52 = vector.broadcast %5 : f32 to vector<1x1792xf32>
    %53 = arith.mulf %26, %52 : vector<1x1792xf32>
    %54 = vector.broadcast %11 : f32 to vector<1x1792xf32>
    %55 = arith.mulf %27, %54 : vector<1x1792xf32>
    %56 = arith.addf %53, %55 : vector<1x1792xf32>
    %57 = vector.broadcast %17 : f32 to vector<1x1792xf32>
    %58 = arith.mulf %28, %57 : vector<1x1792xf32>
    %59 = arith.addf %56, %58 : vector<1x1792xf32>
    %60 = vector.broadcast %23 : f32 to vector<1x1792xf32>
    %61 = arith.mulf %29, %60 : vector<1x1792xf32>
    %62 = arith.addf %59, %61 : vector<1x1792xf32>
    %cst = arith.constant 5.000000e-01 : f32
    %63 = vector.broadcast %cst : f32 to vector<1x1792xf32>
    %64 = arith.mulf %40, %63 : vector<1x1792xf32>
    %cst_3 = arith.constant 5.000000e-01 : f32
    %65 = vector.broadcast %cst_3 : f32 to vector<1x1792xf32>
    %66 = arith.addf %64, %65 : vector<1x1792xf32>
    %cst_4 = arith.constant 1.600000e+01 : f32
    %67 = vector.broadcast %cst_4 : f32 to vector<1x1792xf32>
    %68 = arith.mulf %67, %66 : vector<1x1792xf32>
    %cst_5 = arith.constant 5.000000e-01 : f32
    %69 = vector.broadcast %cst_5 : f32 to vector<1x1792xf32>
    %70 = arith.mulf %51, %69 : vector<1x1792xf32>
    %cst_6 = arith.constant 5.000000e-01 : f32
    %71 = vector.broadcast %cst_6 : f32 to vector<1x1792xf32>
    %72 = arith.addf %70, %71 : vector<1x1792xf32>
    %cst_7 = arith.constant 1.600000e+01 : f32
    %73 = vector.broadcast %cst_7 : f32 to vector<1x1792xf32>
    %74 = arith.mulf %73, %72 : vector<1x1792xf32>
    %cst_8 = arith.constant 5.000000e-01 : f32
    %75 = vector.broadcast %cst_8 : f32 to vector<1x1792xf32>
    %76 = arith.mulf %62, %75 : vector<1x1792xf32>
    %cst_9 = arith.constant 5.000000e-01 : f32
    %77 = vector.broadcast %cst_9 : f32 to vector<1x1792xf32>
    %78 = arith.addf %76, %77 : vector<1x1792xf32>
    %cst_10 = arith.constant 1.600000e+01 : f32
    %79 = vector.broadcast %cst_10 : f32 to vector<1x1792xf32>
    %80 = arith.mulf %79, %78 : vector<1x1792xf32>
    %81 = math.floor %68 : vector<1x1792xf32>
    %82 = math.floor %74 : vector<1x1792xf32>
    %83 = math.floor %80 : vector<1x1792xf32>
    %84 = arith.subf %68, %81 : vector<1x1792xf32>
    %85 = arith.subf %74, %82 : vector<1x1792xf32>
    %86 = arith.subf %80, %83 : vector<1x1792xf32>
    %87 = arith.fptosi %81 : vector<1x1792xf32> to vector<1x1792xi32>
    %c0_i32 = arith.constant 0 : i32
    %c15_i32 = arith.constant 15 : i32
    %88 = vector.broadcast %c0_i32 : i32 to vector<1x1792xi32>
    %89 = arith.maxsi %88, %87 : vector<1x1792xi32>
    %90 = vector.broadcast %c15_i32 : i32 to vector<1x1792xi32>
    %91 = arith.minsi %90, %89 : vector<1x1792xi32>
    %92 = arith.fptosi %81 : vector<1x1792xf32> to vector<1x1792xi32>
    %c1_i32 = arith.constant 1 : i32
    %93 = vector.broadcast %c1_i32 : i32 to vector<1x1792xi32>
    %94 = arith.addi %92, %93 : vector<1x1792xi32>
    %c0_i32_11 = arith.constant 0 : i32
    %c15_i32_12 = arith.constant 15 : i32
    %95 = vector.broadcast %c0_i32_11 : i32 to vector<1x1792xi32>
    %96 = arith.maxsi %95, %94 : vector<1x1792xi32>
    %97 = vector.broadcast %c15_i32_12 : i32 to vector<1x1792xi32>
    %98 = arith.minsi %97, %96 : vector<1x1792xi32>
    %99 = arith.fptosi %82 : vector<1x1792xf32> to vector<1x1792xi32>
    %c0_i32_13 = arith.constant 0 : i32
    %c15_i32_14 = arith.constant 15 : i32
    %100 = vector.broadcast %c0_i32_13 : i32 to vector<1x1792xi32>
    %101 = arith.maxsi %100, %99 : vector<1x1792xi32>
    %102 = vector.broadcast %c15_i32_14 : i32 to vector<1x1792xi32>
    %103 = arith.minsi %102, %101 : vector<1x1792xi32>
    %104 = arith.fptosi %82 : vector<1x1792xf32> to vector<1x1792xi32>
    %c1_i32_15 = arith.constant 1 : i32
    %105 = vector.broadcast %c1_i32_15 : i32 to vector<1x1792xi32>
    %106 = arith.addi %104, %105 : vector<1x1792xi32>
    %c0_i32_16 = arith.constant 0 : i32
    %c15_i32_17 = arith.constant 15 : i32
    %107 = vector.broadcast %c0_i32_16 : i32 to vector<1x1792xi32>
    %108 = arith.maxsi %107, %106 : vector<1x1792xi32>
    %109 = vector.broadcast %c15_i32_17 : i32 to vector<1x1792xi32>
    %110 = arith.minsi %109, %108 : vector<1x1792xi32>
    %111 = arith.fptosi %83 : vector<1x1792xf32> to vector<1x1792xi32>
    %c0_i32_18 = arith.constant 0 : i32
    %c15_i32_19 = arith.constant 15 : i32
    %112 = vector.broadcast %c0_i32_18 : i32 to vector<1x1792xi32>
    %113 = arith.maxsi %112, %111 : vector<1x1792xi32>
    %114 = vector.broadcast %c15_i32_19 : i32 to vector<1x1792xi32>
    %115 = arith.minsi %114, %113 : vector<1x1792xi32>
    %116 = arith.fptosi %83 : vector<1x1792xf32> to vector<1x1792xi32>
    %c1_i32_20 = arith.constant 1 : i32
    %117 = vector.broadcast %c1_i32_20 : i32 to vector<1x1792xi32>
    %118 = arith.addi %116, %117 : vector<1x1792xi32>
    %c0_i32_21 = arith.constant 0 : i32
    %c15_i32_22 = arith.constant 15 : i32
    %119 = vector.broadcast %c0_i32_21 : i32 to vector<1x1792xi32>
    %120 = arith.maxsi %119, %118 : vector<1x1792xi32>
    %121 = vector.broadcast %c15_i32_22 : i32 to vector<1x1792xi32>
    %122 = arith.minsi %121, %120 : vector<1x1792xi32>
    %123 = tpu.iota {dimensions = array<i32: 0>} : vector<16x1792xi32>
    %124 = vector.broadcast %115 : vector<1x1792xi32> to vector<16x1792xi32>
    %125 = arith.cmpi eq, %123, %124 : vector<16x1792xi32>
    %cst_23 = arith.constant 1.000000e+00 : f32
    %126 = vector.broadcast %cst_23 : f32 to vector<1x1792xf32>
    %127 = arith.subf %126, %86 : vector<1x1792xf32>
    %cst_24 = arith.constant 0.000000e+00 : f32
    %128 = vector.shape_cast %127 : vector<1x1792xf32> to vector<1x1792xf32>
    %129 = vector.broadcast %128 : vector<1x1792xf32> to vector<16x1792xf32>
    %130 = vector.broadcast %cst_24 : f32 to vector<16x1792xf32>
    %131 = arith.select %125, %129, %130 : vector<16x1792xi1>, vector<16x1792xf32>
    %132 = vector.broadcast %122 : vector<1x1792xi32> to vector<16x1792xi32>
    %133 = arith.cmpi eq, %123, %132 : vector<16x1792xi32>
    %cst_25 = arith.constant 0.000000e+00 : f32
    %134 = vector.shape_cast %86 : vector<1x1792xf32> to vector<1x1792xf32>
    %135 = vector.broadcast %134 : vector<1x1792xf32> to vector<16x1792xf32>
    %136 = vector.broadcast %cst_25 : f32 to vector<16x1792xf32>
    %137 = arith.select %133, %135, %136 : vector<16x1792xi1>, vector<16x1792xf32>
    %138 = arith.addf %131, %137 : vector<16x1792xf32>
    %139 = tpu.iota {dimensions = array<i32: 0>} : vector<16x1792xi32>
    %140 = vector.broadcast %103 : vector<1x1792xi32> to vector<16x1792xi32>
    %141 = arith.cmpi eq, %139, %140 : vector<16x1792xi32>
    %cst_26 = arith.constant 1.000000e+00 : f32
    %142 = vector.broadcast %cst_26 : f32 to vector<1x1792xf32>
    %143 = arith.subf %142, %85 : vector<1x1792xf32>
    %cst_27 = arith.constant 0.000000e+00 : f32
    %144 = vector.shape_cast %143 : vector<1x1792xf32> to vector<1x1792xf32>
    %145 = vector.broadcast %144 : vector<1x1792xf32> to vector<16x1792xf32>
    %146 = vector.broadcast %cst_27 : f32 to vector<16x1792xf32>
    %147 = arith.select %141, %145, %146 : vector<16x1792xi1>, vector<16x1792xf32>
    %148 = vector.broadcast %110 : vector<1x1792xi32> to vector<16x1792xi32>
    %149 = arith.cmpi eq, %139, %148 : vector<16x1792xi32>
    %cst_28 = arith.constant 0.000000e+00 : f32
    %150 = vector.shape_cast %85 : vector<1x1792xf32> to vector<1x1792xf32>
    %151 = vector.broadcast %150 : vector<1x1792xf32> to vector<16x1792xf32>
    %152 = vector.broadcast %cst_28 : f32 to vector<16x1792xf32>
    %153 = arith.select %149, %151, %152 : vector<16x1792xi1>, vector<16x1792xf32>
    %154 = arith.addf %147, %153 : vector<16x1792xf32>
    %155 = vector.shape_cast %138 : vector<16x1792xf32> to vector<16x1x1792xf32>
    %156 = vector.shape_cast %154 : vector<16x1792xf32> to vector<1x16x1792xf32>
    %157 = vector.broadcast %155 : vector<16x1x1792xf32> to vector<16x16x1792xf32>
    %158 = vector.broadcast %156 : vector<1x16x1792xf32> to vector<16x16x1792xf32>
    %159 = arith.mulf %157, %158 : vector<16x16x1792xf32>
    %160 = vector.shape_cast %159 : vector<16x16x1792xf32> to vector<256x1792xf32>
    %161 = arith.truncf %160 : vector<256x1792xf32> to vector<256x1792xbf16>
    %c0_29 = arith.constant 0 : index
    %c0_30 = arith.constant 0 : index
    %c0_31 = arith.constant 0 : index
    %162 = vector.load %arg4[%c0_29, %c0_30, %c0_31] : memref<1x16x256xbf16, #tpu.memory_space<vmem>>, vector<1x16x256xbf16>
    %163 = vector.shape_cast %162 : vector<1x16x256xbf16> to vector<16x256xbf16>
    %cst_32 = arith.constant dense<0.000000e+00> : vector<16x1792xf32>
    %164 = tpu.matmul %163, %161, %cst_32 {dimension_numbers = #tpu.dot_dimension_numbers<[1], [0], [0], [1], [0, 0, 1, 1], [], []>} : vector<16x256xbf16>, vector<256x1792xbf16>, vector<16x1792xf32> -> vector<16x1792xf32>
    %165 = tpu.iota {dimensions = array<i32: 0>} : vector<16x1792xi32>
    %166 = vector.broadcast %91 : vector<1x1792xi32> to vector<16x1792xi32>
    %167 = arith.cmpi eq, %165, %166 : vector<16x1792xi32>
    %cst_33 = arith.constant 1.000000e+00 : f32
    %168 = vector.broadcast %cst_33 : f32 to vector<1x1792xf32>
    %169 = arith.subf %168, %84 : vector<1x1792xf32>
    %cst_34 = arith.constant 0.000000e+00 : f32
    %170 = vector.shape_cast %169 : vector<1x1792xf32> to vector<1x1792xf32>
    %171 = vector.broadcast %170 : vector<1x1792xf32> to vector<16x1792xf32>
    %172 = vector.broadcast %cst_34 : f32 to vector<16x1792xf32>
    %173 = arith.select %167, %171, %172 : vector<16x1792xi1>, vector<16x1792xf32>
    %174 = vector.broadcast %98 : vector<1x1792xi32> to vector<16x1792xi32>
    %175 = arith.cmpi eq, %165, %174 : vector<16x1792xi32>
    %cst_35 = arith.constant 0.000000e+00 : f32
    %176 = vector.shape_cast %84 : vector<1x1792xf32> to vector<1x1792xf32>
    %177 = vector.broadcast %176 : vector<1x1792xf32> to vector<16x1792xf32>
    %178 = vector.broadcast %cst_35 : f32 to vector<16x1792xf32>
    %179 = arith.select %175, %177, %178 : vector<16x1792xi1>, vector<16x1792xf32>
    %180 = arith.addf %173, %179 : vector<16x1792xf32>
    %181 = vector.shape_cast %164 : vector<16x1792xf32> to vector<1x16x1792xf32>
    %182 = vector.shape_cast %180 : vector<16x1792xf32> to vector<1x16x1792xf32>
    %183 = arith.mulf %181, %182 : vector<1x16x1792xf32>
    %cst_36 = arith.constant dense<0.000000e+00> : vector<1x1792xf32>
    %184 = vector.multi_reduction <add>, %183, %cst_36 [1] : vector<1x16x1792xf32> to vector<1x1792xf32>
    %185 = vector.extract_strided_slice %184 {offsets = [0, 0], sizes = [1, 256], strides = [1, 1]} : vector<1x1792xf32> to vector<1x256xf32>
    %186 = vector.extract_strided_slice %184 {offsets = [0, 256], sizes = [1, 256], strides = [1, 1]} : vector<1x1792xf32> to vector<1x256xf32>
    %187 = arith.addf %185, %186 : vector<1x256xf32>
    %188 = vector.extract_strided_slice %184 {offsets = [0, 512], sizes = [1, 256], strides = [1, 1]} : vector<1x1792xf32> to vector<1x256xf32>
    %189 = arith.addf %187, %188 : vector<1x256xf32>
    %190 = vector.extract_strided_slice %184 {offsets = [0, 768], sizes = [1, 256], strides = [1, 1]} : vector<1x1792xf32> to vector<1x256xf32>
    %191 = arith.addf %189, %190 : vector<1x256xf32>
    %192 = vector.extract_strided_slice %184 {offsets = [0, 1024], sizes = [1, 256], strides = [1, 1]} : vector<1x1792xf32> to vector<1x256xf32>
    %193 = arith.addf %191, %192 : vector<1x256xf32>
    %194 = vector.extract_strided_slice %184 {offsets = [0, 1280], sizes = [1, 256], strides = [1, 1]} : vector<1x1792xf32> to vector<1x256xf32>
    %195 = arith.addf %193, %194 : vector<1x256xf32>
    %196 = vector.extract_strided_slice %184 {offsets = [0, 1536], sizes = [1, 256], strides = [1, 1]} : vector<1x1792xf32> to vector<1x256xf32>
    %197 = arith.addf %195, %196 : vector<1x256xf32>
    %c0_37 = arith.constant 0 : index
    %c0_38 = arith.constant 0 : index
    %c0_39 = arith.constant 0 : index
    %198 = vector.load %arg5[%c0_37, %c0_38, %c0_39] : memref<1x1x256xf32, #tpu.memory_space<vmem>>, vector<1x1x256xf32>
    %199 = vector.shape_cast %198 : vector<1x1x256xf32> to vector<1x256xf32>
    %200 = vector.shape_cast %197 : vector<1x256xf32> to vector<1x1x256xf32>
    tpu.vector_store %arg5[%c0_37, %c0_38, %c0_39], %200 {strides = array<i32>} : memref<1x1x256xf32, #tpu.memory_space<vmem>>, vector<1x1x256xf32>,
    return
  }
  func.func @transform_0(%arg0: i32, %arg1: i32) -> (i32, i32) {
    %c0_i32 = arith.constant 0 : i32
    %c0_i32_0 = arith.constant 0 : i32
    %c0_i32_1 = arith.constant 0 : i32
    return %c0_i32, %c0_i32_0 : i32, i32
  }
  func.func @transform_1(%arg0: i32, %arg1: i32) -> (i32, i32, i32) {
    %c0_i32 = arith.constant 0 : i32
    %c0_i32_0 = arith.constant 0 : i32
    return %arg0, %c0_i32, %arg1 : i32, i32, i32
  }
  func.func @transform_2(%arg0: i32, %arg1: i32) -> (i32, i32, i32) {
    %c0_i32 = arith.constant 0 : i32
    %c0_i32_0 = arith.constant 0 : i32
    %c0_i32_1 = arith.constant 0 : i32
    return %arg0, %c0_i32, %c0_i32_0 : i32, i32, i32
  }
  func.func @transform_3(%arg0: i32, %arg1: i32) -> (i32, i32, i32) {
    %c0_i32 = arith.constant 0 : i32
    %c0_i32_0 = arith.constant 0 : i32
    return %arg0, %c0_i32, %arg1 : i32, i32, i32
  }
}

</mosaic_0001>

<bundles_post_ra>
// kernel: tpu_custom_call.1
= control target key start
LH: loop header
LB: loop body
LE: loop exit
PB: predicated region body
PF: predicated region fallthrough
CT: control target
= control target key end

     0   :  { %8 = vsyncpa [#allocation5], 0  ;;  %s9405_s0 = inlined_call_operand.hbm [shape: f32[2,12], index: 0, kind: input, shape index: {}]   ;;  %s9406_s1 = inlined_call_operand.hbm [shape: f32[2,4,1792], index: 1, kind: input, shape index: {}]   ;;  %s9407_s2 = inlined_call_operand.hbm [shape: bf16[2,16,256], index: 2, kind: input, shape index: {}]   ;;  %s9408_s3 = inlined_call_operand.hbm [shape: f32[2,1,256], index: 3, kind: output, shape index: {}]  }
   0x1   :  { %9 = vsyncpa [#allocation3], 0 }
   0x2   :  { %11 = vsyncpa [#allocation3 + $0x1], 0 }
   0x3   :  { %12 = vsyncpa [#allocation8], 0 }
   0x4   :  { %14 = vsyncpa [#allocation8 + $0x1], 0 }
   0x5   :  { %15 = vsyncpa [#allocation4], 0 }
   0x6   :  { %17 = vsyncpa [#allocation4 + $0x1], 0  ;;  %s6285_s12 = smov 0   ;;  %s6287_s13 = smov 0  }
   0x7   :  { %s6289_s14 = smov 0   ;;  %s6291_s15 = smov 0  }
   0x8   :  { %s6293_s16 = smov 0   ;;  %s6295_s17 = smov 0  }
   0x9 LB: > { %s5868_s18 = sadd.s32 4294967295, %s6256_s17   ;;  %s5869_s19 = sadd.s32 4294967294, %s6256_s17   ;;  %s6256_s17 = sphi %s6295_s17, %s23_s17   ;;  %s6252_s16 = sphi %s6293_s16, %s9631_s16   ;;  %s6248_s15 = sphi %s6291_s15, %s9630_s15   ;;  %s6244_s14 = sphi %s6289_s14, %s9629_s14   ;;  %s6240_s13 = sphi %s6287_s13, %s9628_s13   ;;  %s6236_s12 = sphi %s6285_s12, %s9627_s12  }
   0xa   : > { %s65_s20 = sadd.s32 1, %s6244_s14  ;;  %p72_p0 = scmp.ne.s32.totalorder %s6244_s14, %s6240_s13 }
   0xb   : > { %p78_p1 = scmp.ne.s32.totalorder %s6240_s13, %s6236_s12  ;;  %p6322_p2 = scmp.eq.s32.totalorder %s5868_s18, 0 }
   0xc   : > { %p130_p3 = scmp.eq.s32.totalorder %s5868_s18, 1  ;;  %p136_p4 = scmp.eq.s32.totalorder %s5869_s19, 1 }
   0xd   : > { %s9487_s21 = scalar_select %p6322_p2, 1, 0 }
   0xe   : > { %p6328_p5 = por %p6322_p2, %p78_p1  ;;  %p5870_p6 = scmp.ge.s32.totalorder %s6256_s17, 1 }
   0xf   : > { %p6336_p7 = por %p130_p3, %p72_p0  ;;  %p6340_p8 = por %p136_p4, %p78_p1 }
  0x10   : > { %s9488_s22 = scalar_select %p6328_p5, 1, 0 }
  0x11   : > { %s9489_s23 = scalar_select %p6336_p7, 1, 0 }
  0x12   : > { %s9490_s24 = scalar_select %p6340_p8, 1, 0 }
  0x13   : > { %p143_p9 = scmp.lt.s32.totalorder %s6256_s17, 3  ;;  %p73_p12 = scmp.eq.s32.totalorder %s6256_s17, 0 }
  0x14   : > { %s35_s26 = sadd.s32 1, %s6252_s16  ;;  %p6025_p4 = scmp.lt.s32.totalorder %s6256_s17, 2 }
  0x15   : > { %p6346_p11 = pnand %p5870_p6, %p143_p9  ;;  %p37_p5 = scmp.ge.s32.totalorder %s35_s26, 2 }
  0x16   : > { %p6357_p3 = por %p73_p12, %p72_p0  ;;  %s6367_s28 = sand.u32 1, %s6244_s14  }
  0x17   : > { %p6009_p13 = pneg %p6346_p11  ;;  %s9633_s26 = smov (%p37_p5, %s35_s26), 0 }
  0x18   : > { %s6093_s4 = scalar_lea.hbm %s9405_s0, 32 }
  0x19   : > { %p6010_p1 = pnand %p6009_p13, %p6322_p2  ;;  %p6094_p6 = scmp.ne.s32.totalorder %s9405_s0, %s6093_s4 }
  0x1a   : > { %p6100_p13 = scmp.lt.u32.totalorder %s6093_s4, %s9405_s0 }
  0x1b   : > { %p6095_p9 = pneg %p6010_p1 }
  0x1d   : > { %p6096_p0 = pnand %p6095_p9, %p6094_p6 }
  0x1f   : > { %p6097_p12 = pneg %p6096_p0 }
  0x21   : > { %p6102_p10 = pnand %p6100_p13, %p6097_p12 }
  0x23   : > { %6105 = shalt.err (!%p6102_p10)
}
  0x24   : > { %s6258_s9 = smov [#allocation2]   ;;  %s60_s18 = ssub.s32 %s6252_s16, %s9633_s26 }
  0x25   : > { %6012 = dma.hbm_to_smem (!%p6010_p1), %s9405_s0, 32, %s6258_s9, [#allocation5]  }
  0x26   : > { %p63_p5 = scmp.eq.s32.totalorder %s60_s18, 0  ;;  %s5954_s19 = smul.u32 56, %s6367_s28 }
  0x27   : > { %s5955_s29 = smul.u32 896, %s6252_s16  ;;  %p6389_p10 = pnand %p6025_p4, %p6357_p3 }
  0x28   : > { %s6396_s4 = scalar_select %p63_p5, %s6244_s14, %s65_s20  }
  0x29   : > { %s6401_s7 = scalar_lea.hbm %s9406_s1, %s5955_s29  ;;  %s169_s27 = scalar_lea.vmem [#allocation6], %s5954_s19 }
  0x2a   : > { %s179_s8 = sshll.u32 %s169_s27, 4  ;;  %s166_s9 = scalar_lea.sflag [#allocation3], %s6367_s28  ;;  %s6403_s8 = int_to_ptr.vmem [resolvable:$true] %s179_s8 }
  0x2b   : > { %s6106_s10 = scalar_lea.hbm %s6401_s7, 896  ;;  %p6108_p1 = pneg %p6389_p10 }
  0x2c   : > { %p6107_p3 = scmp.ne.s32.totalorder %s6401_s7, %s6106_s10  ;;  %s6111_s18 = scalar_lea.hbm %s9406_s1, 1792 }
  0x2d   : > { %p6112_p9 = scmp.lt.u32.totalorder %s6401_s7, %s9406_s1  ;;  %p6113_p0 = scmp.lt.u32.totalorder %s6111_s18, %s6106_s10 }
  0x2e   : > { %p6109_p4 = pnand %p6108_p1, %p6107_p3  ;;  %p6115_p13 = scmp.lt.u32.totalorder %s6106_s10, %s6401_s7 }
  0x2f   : > { %p6114_p12 = por %p6113_p0, %p6112_p9 }
  0x30   : > { %p6110_p6 = pneg %p6109_p4 }
  0x31   : > { %p6116_p5 = por %p6115_p13, %p6114_p12 }
  0x33   : > { %p6117_p8 = pnand %p6116_p5, %p6110_p6 }
  0x35   : > { %6120 = shalt.err (!%p6117_p8)
}
  0x36   : > { %s6121_s19 = scalar_lea.vmem %s6403_s8, 896  ;;  %s6259_s6 = smov [#allocation6]  }
  0x37   : > { %p6122_p3 = scmp.ne.s32.totalorder %s6403_s8, %s6121_s19  ;;  %s6126_s27 = sshll.u32 %s6259_s6, 4  ;;  %s6127_s27 = int_to_ptr.vmem [resolvable:$false] %s6126_s27 }
  0x38   : > { %s6128_s20 = scalar_lea.vmem %s6127_s27, 1792  ;;  %p6129_p2 = scmp.lt.s32.totalorder %s6403_s8, %s6127_s27 }
  0x39   : > { %p6124_p4 = pnand %p6122_p3, %p6108_p1  ;;  %p6130_p9 = scmp.lt.s32.totalorder %s6128_s20, %s6121_s19 }
  0x3b   : > { %p6125_p7 = pneg %p6124_p4  ;;  %p6131_p0 = por %p6130_p9, %p6129_p2 }
  0x3d   : > { %p6132_p12 = pnand %p6131_p0, %p6125_p7 }
  0x3f   : > { %6135 = shalt.err (!%p6132_p12)
}
  0x40   : > { %6016 = dma.hbm_to_vmem [thread:$0]  (!%p6389_p10), %s6401_s7, 896, %s6403_s8, %s166_s9  }
  0x41   : > { %s5874_s10 = sshll.u32 %s6367_s28, 4  ;;  %s5952_s11 = sshll.u32 %s6252_s16, 8 }
  0x42   : > { %s6436_s5 = scalar_lea.hbm %s9407_s2, %s5952_s11  ;;  %s190_s19 = scalar_lea.vmem [#allocation7], %s5874_s10 }
  0x43   : > { %s197_s6 = sshll.u32 %s190_s19, 4  ;;  %s187_s27 = scalar_lea.sflag [#allocation8], %s6367_s28  ;;  %s6438_s6 = int_to_ptr.vmem [resolvable:$true] %s197_s6 }
  0x44   : > { %s6136_s20 = scalar_lea.hbm %s6436_s5, 256  ;;  %s6141_s9 = scalar_lea.hbm %s9407_s2, 512 }
  0x45   : > { %p6137_p2 = scmp.ne.s32.totalorder %s6436_s5, %s6136_s20  ;;  %p6142_p6 = scmp.lt.u32.totalorder %s6436_s5, %s9407_s2 }
  0x46   : > { %p6143_p13 = scmp.lt.u32.totalorder %s6141_s9, %s6136_s20  ;;  %p6145_p3 = scmp.lt.u32.totalorder %s6136_s20, %s6436_s5 }
  0x47   : > { %p6139_p7 = pnand %p6137_p2, %p6108_p1 }
  0x48   : > { %p6144_p5 = por %p6143_p13, %p6142_p6 }
  0x49   : > { %p6140_p8 = pneg %p6139_p7 }
  0x4a   : > { %p6146_p4 = por %p6145_p3, %p6144_p5 }
  0x4c   : > { %p6147_p9 = pnand %p6146_p4, %p6140_p8 }
  0x4e   : > { %6150 = shalt.err (!%p6147_p9)
}
  0x4f   : > { %s6151_s10 = scalar_lea.vmem %s6438_s6, 256  ;;  %s6260_s29 = smov [#allocation7]  }
  0x50   : > { %p6152_p0 = scmp.ne.s32.totalorder %s6438_s6, %s6151_s10  ;;  %s6156_s19 = sshll.u32 %s6260_s29, 4  ;;  %s6157_s19 = int_to_ptr.vmem [resolvable:$false] %s6156_s19 }
  0x51   : > { %s6158_s7 = scalar_lea.vmem %s6157_s19, 512  ;;  %p6159_p7 = scmp.lt.s32.totalorder %s6438_s6, %s6157_s19 }
  0x52   : > { %p6154_p12 = pnand %p6152_p0, %p6108_p1  ;;  %p6160_p6 = scmp.lt.s32.totalorder %s6158_s7, %s6151_s10 }
  0x54   : > { %p6155_p2 = pneg %p6154_p12  ;;  %p6161_p13 = por %p6160_p6, %p6159_p7 }
  0x56   : > { %p6162_p5 = pnand %p6161_p13, %p6155_p2 }
  0x58   : > { %6165 = shalt.err (!%p6162_p5)
}
  0x59   : > { %s6261_s20 = smov 128   ;;  %s6262_s8 = smov 8  }
  0x5a   : > { %6019 = dma.hbm_to_vmem [thread:$0]  (!%p6389_p10), %s6436_s5, 256, %s6438_s6, %s187_s27, %s6261_s20, %s6261_s20, %s6262_s8  }
  0x5b   : > { %209 = sbr.rel (%p6346_p11) target bundleno = 901 (0x385), region = 32 }
  0x62   : > { %p9494_p1 = scmp.ne.s32.totalorder %s9487_s21, 0 }
  0x64   : > { %6219 = dma.done.wait (%p9494_p1), [#allocation5], 32  }
  0x65   : > { %6221 = vsyncadd (%p9494_p1), [#allocation5], 4294967264  ;;  %s6473_s9 = sand.u32 1, %s6240_s13   ;;  %p9495_p10 = scmp.ne.s32.totalorder %s9488_s22, 0 }
  0x66   : > { %s5956_s11 = smul.u32 56, %s6473_s9  ;;  %s216_s18 = scalar_lea.sflag [#allocation3], %s6473_s9 }
  0x68   : > { %s6477_s30 = scalar_lea.vmem [#allocation6], %s5956_s11 }
  0x69   : > { %6223 = dma.done.wait (%p9495_p10), %s216_s18, 896  }
  0x6a   : > { %6225 = vsyncadd (%p9495_p10), %s216_s18, 4294966400  ;;  %s5879_s21 = sshll.u32 %s6473_s9, 4  ;;  %s225_s25 = scalar_lea.sflag [#allocation8], %s6473_s9 }
  0x6b   : > { %s6485_s28 = scalar_lea.vmem [#allocation7], %s5879_s21 }
  0x6c   : > { %6227 = dma.done.wait (%p9495_p10), %s225_s25, 256  }
  0x6d   : > { %6229 = vsyncadd (%p9495_p10), %s225_s25, 4294967040 }
  0x6e   : > { %233 = sfence }
  0x6f   : > { %s6492_s5 = sshll.u32 %s6248_s15, 7  ;;  %v9413_v0 = vlaneseq  ;;  %v6263_v1 = vmov 1966171168   ;;  %v6507_v5 = vld [vmem:[%s6477_s30] sm:$0xff]  ;;  %v6510_v6 = vld [vmem:[%s6477_s30 + $0x8] sm:$0xff]  ;;  %v6522_v10 = vld [vmem:[%s6477_s30 + $0x10] sm:$0xff] }
  0x70   : > { %s261_s6 = sadd.s32 1, %s6492_s5  ;;  %s263_s27 = sadd.s32 2, %s6492_s5  ;;  %v2330_v2 = vunpack.c.l.s4 %v6263_v1  ;;  %v6525_v11 = vld [vmem:[%s6477_s30 + $0x18] sm:$0xff] }
  0x71   : > { %s262_s22 = sld [smem:[#allocation2 + %s261_s6]]  ;;  %s267_s29 = sadd.s32 4, %s6492_s5  ;;  %v6499_v3 = vshrl.u32 %v9413_v0, 7 }
  0x72   : > { %s264_s10 = sld [smem:[#allocation2 + %s263_s27]]  ;;  %s269_s19 = sadd.s32 5, %s6492_s5  ;;  %v2331_v4 = vunpack.c.0.s8 %v2330_v2 }
  0x73   : > { %s268_s7 = sld [smem:[#allocation2 + %s267_s29]]  ;;  %s273_s8 = sadd.s32 7, %s6492_s5  ;;  %v6513_v7 = vadd.s32 8, %v6499_v3  ;;  %v6516_v8 = vsub.s32 0, %v6499_v3  ;;  %v6519_v9 = vsub.s32 4, %v6499_v3  ;;  %v6535_v15 = vsub.s32 1, %v6499_v3 }
  0x74   : > { %s6501_s20 = sld [smem:[#allocation2 + %s269_s19]]  ;;  %s275_s11 = sadd.s32 8, %s6492_s5  ;;  %v6532_v14 = vsub.s32 %v2331_v4, %v6499_v3 }
  0x75   : > { %s274_s18 = sld [smem:[#allocation2 + %s273_s8]]  ;;  %s279_s25 = sadd.s32 10, %s6492_s5  ;;  %9496 = vst [vmem:[#allocation14_spill] sm:$0xff] %v6519_v9 }
  0x76   : > { %s276_s21 = sld [smem:[#allocation2 + %s275_s11]]  ;;  %9499 = vst [vmem:[#allocation17_spill] sm:$0xff] %v6532_v14  ;;  %s281_s27 = sadd.s32 11, %s6492_s5 }
  0x77   : > { %v6527_v12 = vstv %s262_s22  ;;  %s6537_s6 = sld [smem:[#allocation2 + %s279_s25]]  ;;  %s271_s29 = sadd.s32 6, %s6492_s5 }
  0x78   : > { %9497 = vst [vmem:[#allocation15_spill] sm:$0xff] %v6527_v12  ;;  %v6529_v13 = vstv %s264_s10  ;;  %v428_v16 = vmul.f32 %v6527_v12, %v6507_v5  ;;  %v429_v17 = vmul.f32 %v6527_v12, %v6510_v6  ;;  %v430_v18 = vmul.f32 %v6527_v12, %v6522_v10  ;;  %s6581_s22 = sld [smem:[#allocation2 + %s281_s27]]  ;;  %s265_s10 = sadd.s32 3, %s6492_s5 }
  0x79   : > { %9498 = vst [vmem:[#allocation16_spill] sm:$0xff] %v6529_v13  ;;  %v431_v19 = vmul.f32 %v6527_v12, %v6525_v11  ;;  %v6547_v20 = vstv %s268_s7  ;;  %v565_v21 = vmul.f32 %v6529_v13, %v6507_v5  ;;  %v566_v22 = vmul.f32 %v6529_v13, %v6510_v6  ;;  %s277_s19 = sadd.s32 9, %s6492_s5  ;;  %s8824_s7 = sld [smem:[#allocation2 + %s6492_s5]] }
  0x7a   : > { %9500 = vst [vmem:[#allocation18_spill] sm:$0xff] %v6547_v20  ;;  %v567_v23 = vmul.f32 %v6529_v13, %v6522_v10  ;;  %v436_v24 = vmul.f32 %v6547_v20, %v6507_v5  ;;  %v437_v25 = vmul.f32 %v6547_v20, %v6510_v6  ;;  %v438_v26 = vmul.f32 %v6547_v20, %v6522_v10  ;;  %s272_s8 = sld [smem:[#allocation2 + %s271_s29]]  ;;  %p9624_p8 = scmp.ne.s32.totalorder %s9489_s23, 0 }
  0x7b   : > { %v439_v27 = vmul.f32 %v6547_v20, %v6525_v11  ;;  %v6563_v28 = vstv %s274_s18  ;;  %v568_v29 = vmul.f32 %v6529_v13, %v6525_v11  ;;  %v6568_v30 = vstv %s6501_s20  ;;  %s266_s20 = sld [smem:[#allocation2 + %s265_s10]] }
  0x7c   : > { %9501 = vst [vmem:[#allocation19_spill] sm:$0xff] %v6563_v28  ;;  %9502 = vst [vmem:[#allocation20_spill] sm:$0xff] %v6568_v30  ;;  %v6570_v31 = vstv %s276_s21  ;;  %v5903_v32 = vrot.slane %v436_v24, 9  ;;  %v5904_v33 = vrot.slane %v437_v25, 9  ;;  %v5905_v34 = vrot.slane %v438_v26, 9  ;;  %s278_s11 = sld [smem:[#allocation2 + %s277_s19]] }
  0x7d   : > { %9503 = vst [vmem:[#allocation21_spill] sm:$0xff] %v6570_v31  ;;  %v5906_v35 = vrot.slane %v439_v27, 9  ;;  %v479_v36 = vmul.f32 %v6563_v28, %v6507_v5  ;;  %v480_v37 = vmul.f32 %v6563_v28, %v6510_v6  ;;  %v481_v38 = vmul.f32 %v6563_v28, %v6522_v10 }
  0x7e   : > { %v482_v39 = vmul.f32 %v6563_v28, %v6525_v11  ;;  %v471_v40 = vadd.f32 %v5903_v32, %v428_v16  ;;  %v472_v41 = vadd.f32 %v5904_v33, %v429_v17  ;;  %v473_v42 = vadd.f32 %v5905_v34, %v430_v18 }
  0x7f   : > { %v474_v43 = vadd.f32 %v5906_v35, %v431_v19  ;;  %v5910_v44 = vrot.slane %v479_v36, 10  ;;  %v5911_v45 = vrot.slane %v480_v37, 10  ;;  %v5912_v46 = vrot.slane %v481_v38, 10 }
  0x80   : > { %v5913_v47 = vrot.slane %v482_v39, 10  ;;  %v6584_v48 = vstv %s6537_s6  ;;  %v573_v49 = vmul.f32 %v6568_v30, %v6507_v5  ;;  %v574_v50 = vmul.f32 %v6568_v30, %v6510_v6 }
  0x81   : > { %9504 = vst [vmem:[#allocation22_spill] sm:$0xff] %v6584_v48  ;;  %v575_v51 = vmul.f32 %v6568_v30, %v6522_v10  ;;  %v514_v52 = vadd.f32 %v5910_v44, %v471_v40  ;;  %v515_v53 = vadd.f32 %v5911_v45, %v472_v41  ;;  %v516_v54 = vadd.f32 %v5912_v46, %v473_v42 }
  0x82   : > { %v517_v55 = vadd.f32 %v5913_v47, %v474_v43  ;;  %v522_v56 = vmul.f32 %v6584_v48, %v6507_v5  ;;  %v523_v57 = vmul.f32 %v6584_v48, %v6510_v6  ;;  %v524_v58 = vmul.f32 %v6584_v48, %v6522_v10 }
  0x83   : > { %v525_v59 = vmul.f32 %v6584_v48, %v6525_v11  ;;  %v576_v60 = vmul.f32 %v6568_v30, %v6525_v11  ;;  %v5924_v61 = vrot.slane %v573_v49, 9  ;;  %v5925_v62 = vrot.slane %v574_v50, 9 }
  0x84   : > { %v5926_v63 = vrot.slane %v575_v51, 9  ;;  %v5917_v1 = vrot.slane %v522_v56, 11  ;;  %v5918_v2 = vrot.slane %v523_v57, 11  ;;  %v5919_v4 = vrot.slane %v524_v58, 11 }
  0x85   : > { %v5920_v16 = vrot.slane %v525_v59, 11  ;;  %v5927_v17 = vrot.slane %v576_v60, 9  ;;  %v608_v18 = vadd.f32 %v5924_v61, %v565_v21  ;;  %v609_v19 = vadd.f32 %v5925_v62, %v566_v22 }
  0x86   : > { %v610_v24 = vadd.f32 %v5926_v63, %v567_v23  ;;  %v557_v25 = vadd.f32 %v5917_v1, %v514_v52  ;;  %v558_v26 = vadd.f32 %v5918_v2, %v515_v53  ;;  %v559_v27 = vadd.f32 %v5919_v4, %v516_v54 }
  0x87   : > { %v560_v32 = vadd.f32 %v5920_v16, %v517_v55  ;;  %v611_v33 = vadd.f32 %v5927_v17, %v568_v29  ;;  %v616_v34 = vmul.f32 %v6570_v31, %v6507_v5  ;;  %v617_v35 = vmul.f32 %v6570_v31, %v6510_v6 }
  0x88   : > { %v618_v36 = vmul.f32 %v6570_v31, %v6522_v10  ;;  %v619_v37 = vmul.f32 %v6570_v31, %v6525_v11  ;;  %v6611_v21 = vstv %s6581_s22  ;;  %v722_v22 = vmul.f32 0.5, %v557_v25  ;;  %s6264_s22 = smov [#allocation9]  }
  0x89   : > { %9505 = vst [vmem:[#allocation23_spill] sm:$0xff] %v6611_v21  ;;  %v723_v23 = vmul.f32 0.5, %v558_v26  ;;  %v5931_v38 = vrot.slane %v616_v34, 10  ;;  %v5932_v39 = vrot.slane %v617_v35, 10  ;;  %v659_v29 = vmul.f32 %v6611_v21, %v6507_v5  ;;  %s6170_s10 = sshll.u32 %s6264_s22, 4  ;;  %s6171_s10 = int_to_ptr.vmem [resolvable:$false] %s6170_s10 }
  0x8a   : > { %v5933_v40 = vrot.slane %v618_v36, 10  ;;  %v5934_v41 = vrot.slane %v619_v37, 10  ;;  %v660_v42 = vmul.f32 %v6611_v21, %v6510_v6  ;;  %v661_v43 = vmul.f32 %v6611_v21, %v6522_v10  ;;  %s6172_s29 = scalar_lea.vmem %s6171_s10, 64 }
  0x8b   : > { %v662_v44 = vmul.f32 %v6611_v21, %v6525_v11  ;;  %v651_v45 = vadd.f32 %v5931_v38, %v608_v18  ;;  %v652_v46 = vadd.f32 %v5932_v39, %v609_v19  ;;  %v5938_v49 = vrot.slane %v659_v29, 11 }
  0x8c   : > { %v653_v47 = vadd.f32 %v5933_v40, %v610_v24  ;;  %v654_v50 = vadd.f32 %v5934_v41, %v611_v33  ;;  %v5939_v51 = vrot.slane %v660_v42, 11  ;;  %v5940_v52 = vrot.slane %v661_v43, 11 }
  0x8d   : > { %v5941_v53 = vrot.slane %v662_v44, 11  ;;  %v694_v54 = vadd.f32 %v5938_v49, %v651_v45  ;;  %v724_v5 = vmul.f32 0.5, %v559_v27  ;;  %v725_v55 = vmul.f32 0.5, %v560_v32 }
  0x8e   : > { %v729_v56 = vadd.f32 0.5, %v722_v22  ;;  %v695_v57 = vadd.f32 %v5939_v51, %v652_v46  ;;  %v696_v6 = vadd.f32 %v5940_v52, %v653_v47  ;;  %v730_v59 = vadd.f32 0.5, %v723_v23 }
  0x8f   : > { %v697_v58 = vadd.f32 %v5941_v53, %v654_v50  ;;  %v731_v10 = vadd.f32 0.5, %v724_v5  ;;  %v732_v60 = vadd.f32 0.5, %v725_v55  ;;  %v743_v11 = vmul.f32 0.5, %v694_v54 }
  0x90   : > { %v736_v61 = vmul.f32 16.0, %v729_v56  ;;  %v6621_v62 = vmul.f32 16.0, %v730_v59  ;;  %v744_v63 = vmul.f32 0.5, %v695_v57  ;;  %v745_v1 = vmul.f32 0.5, %v696_v6 }
  0x91   : > { %v746_v2 = vmul.f32 0.5, %v697_v58  ;;  %v738_v4 = vmul.f32 16.0, %v731_v10  ;;  %v6623_v16 = vmul.f32 16.0, %v732_v60  ;;  %v750_v17 = vadd.f32 0.5, %v743_v11 }
  0x92   : > { %v771_v18 = vfloor.f32 %v736_v61  ;;  %v751_v19 = vadd.f32 0.5, %v744_v63  ;;  %v752_v24 = vadd.f32 0.5, %v745_v1  ;;  %v9415_v26 = vfloor.f32 %v6621_v62 }
  0x93   : > { %v753_v25 = vadd.f32 0.5, %v746_v2  ;;  %v757_v27 = vmul.f32 16.0, %v750_v17  ;;  %v773_v32 = vfloor.f32 %v738_v4  ;;  %v6627_v33 = vsub.s32 3, %v6499_v3 }
  0x94   : > { %v6630_v34 = vsub.s32 2, %v6499_v3  ;;  %v758_v35 = vmul.f32 16.0, %v751_v19  ;;  %v759_v36 = vmul.f32 16.0, %v752_v24  ;;  %v5971_v22 = vtrunc.f32 %v771_v18 }
  0x95   : > { %v760_v37 = vmul.f32 16.0, %v753_v25  ;;  %v9414_v23 = vfloor.f32 %v6623_v16  ;;  %v778_v38 = vfloor.f32 %v757_v27  ;;  %v6633_v39 = vsub.f32 %v736_v61, %v771_v18 }
  0x96   : > { %v5973_v40 = vtrunc.f32 %v9415_v26  ;;  %v779_v29 = vfloor.f32 %v758_v35  ;;  %v780_v41 = vfloor.f32 %v759_v36  ;;  %v6637_v42 = vsub.f32 %v738_v4, %v773_v32 }
  0x97   : > { %v5972_v43 = vcvt.f32.s32 %v5971_v22  ;;  %v781_v44 = vfloor.f32 %v760_v37  ;;  %v6642_v45 = vsub.f32 %v6623_v16, %v9414_v23  ;;  %v6644_v46 = vsub.f32 %v757_v27, %v778_v38 }
  0x98   : > { %9506 = vst [vmem:[#allocation24_spill] sm:$0xff] %v6637_v42  ;;  %v5975_v47 = vtrunc.f32 %v773_v32  ;;  %v6646_v49 = vsub.f32 %v758_v35, %v779_v29  ;;  %v6648_v50 = vsub.f32 %v759_v36, %v780_v41  ;;  %v6650_v51 = vcvt.f32.s32 %v5973_v40 }
  0x99   : > { %9507 = vst [vmem:[#allocation25_spill] sm:$0xff] %v6642_v45  ;;  %vm883_vm0 = vcmp.gt.s32.totalorder %v5972_v43, 0  ;;  %v6652_v52 = vsub.f32 %v760_v37, %v781_v44  ;;  %v911_v5 = vadd.s32 1, %v5972_v43  ;;  %v5985_v55 = vtrunc.f32 %v778_v38 }
  0x9a   : > { %v6654_v53 = vcvt.f32.s32 %v5975_v47  ;;  %v884_v54 = vsel %vm883_vm0, %v5972_v43, 0  ;;  %v5987_v56 = vtrunc.f32 %v779_v29  ;;  %v5989_v57 = vtrunc.f32 %v780_v41 }
  0x9b   : > { %vm897_vm1 = vcmp.lt.s32.totalorder %v884_v54, 15  ;;  %vm918_vm2 = vcmp.gt.s32.totalorder %v911_v5, 0  ;;  %v5991_v58 = vtrunc.f32 %v781_v44  ;;  %v1159_v59 = vsub.f32 1.0, %v6644_v46 }
  0x9c   : > { %v6656_v6 = vsel %vm897_vm1, %v884_v54, 15  ;;  %v919_v10 = vsel %vm918_vm2, %v911_v5, 0  ;;  %v5986_v60 = vcvt.f32.s32 %v5985_v55  ;;  %v5988_v61 = vcvt.f32.s32 %v5987_v56 }
  0x9d   : > { %v5990_v11 = vcvt.f32.s32 %v5989_v57  ;;  %vm932_vm3 = vcmp.lt.s32.totalorder %v919_v10, 15  ;;  %v5992_v63 = vcvt.f32.s32 %v5991_v58  ;;  %v1160_v1 = vsub.f32 1.0, %v6646_v49 }
  0x9e   : > { %v1161_v2 = vsub.f32 1.0, %v6648_v50  ;;  %v6661_v4 = vsel %vm932_vm3, %v919_v10, 15  ;;  %vm953_vm4 = vcmp.gt.s32.totalorder %v5986_v60, 0  ;;  %vm955_vm5 = vcmp.gt.s32.totalorder %v5988_v61, 0 }
  0x9f   : > { %vm957_vm6 = vcmp.gt.s32.totalorder %v5990_v11, 0  ;;  %v954_v17 = vsel %vm953_vm4, %v5986_v60, 0  ;;  %v956_v18 = vsel %vm955_vm5, %v5988_v61, 0  ;;  %vm959_vm7 = vcmp.gt.s32.totalorder %v5992_v63, 0 }
  0xa0   : > { %v958_v19 = vsel %vm957_vm6, %v5990_v11, 0  ;;  %v960_v24 = vsel %vm959_vm7, %v5992_v63, 0  ;;  %vm967_vm8 = vcmp.lt.s32.totalorder %v954_v17, 15  ;;  %vm969_vm9 = vcmp.lt.s32.totalorder %v956_v18, 15 }
  0xa1   : > { %vm971_vm10 = vcmp.lt.s32.totalorder %v958_v19, 15  ;;  %v968_v25 = vsel %vm967_vm8, %v954_v17, 15  ;;  %v970_v27 = vsel %vm969_vm9, %v956_v18, 15  ;;  %vm973_vm11 = vcmp.lt.s32.totalorder %v960_v24, 15 }
  0xa2   : > { %v972_v32 = vsel %vm971_vm10, %v958_v19, 15  ;;  %v974_v35 = vsel %vm973_vm11, %v960_v24, 15  ;;  %v981_v36 = vadd.s32 1, %v5986_v60  ;;  %v982_v37 = vadd.s32 1, %v5988_v61 }
  0xa3   : > { %v983_v22 = vadd.s32 1, %v5990_v11  ;;  %v984_v38 = vadd.s32 1, %v5992_v63  ;;  %v1022_v40 = vrot.slane %v968_v25, %v6516_v8  ;;  %v1026_v29 = vrot.slane %v968_v25, %v6519_v9 }
  0xa4   : > { %v1030_v41 = vrot.slane %v970_v27, %v6516_v8  ;;  %vm988_vm12 = vcmp.gt.s32.totalorder %v981_v36, 0  ;;  %vm990_vm13 = vcmp.gt.s32.totalorder %v982_v37, 0  ;;  %v1034_v43 = vrot.slane %v970_v27, %v6519_v9 }
  0xa5   : > { %vm992_vm14 = vcmp.gt.s32.totalorder %v983_v22, 0  ;;  %v989_v44 = vsel %vm988_vm12, %v981_v36, 0  ;;  %v991_v47 = vsel %vm990_vm13, %v982_v37, 0  ;;  %vm994_vm15 = vcmp.gt.s32.totalorder %v984_v38, 0 }
  0xa6   : > { %v993_v54 = vsel %vm992_vm14, %v983_v22, 0  ;;  %v995_v5 = vsel %vm994_vm15, %v984_v38, 0  ;;  %vm1002_vm0 = vcmp.lt.s32.totalorder %v989_v44, 15  ;;  %vm1004_vm1 = vcmp.lt.s32.totalorder %v991_v47, 15 }
  0xa7   : > { %vm1006_vm2 = vcmp.lt.s32.totalorder %v993_v54, 15  ;;  %v1003_v55 = vsel %vm1002_vm0, %v989_v44, 15  ;;  %v1005_v56 = vsel %vm1004_vm1, %v991_v47, 15  ;;  %vm1008_vm3 = vcmp.lt.s32.totalorder %v995_v5, 15 }
  0xa8   : > { %v1007_v57 = vsel %vm1006_vm2, %v993_v54, 15  ;;  %v1009_v58 = vsel %vm1008_vm3, %v995_v5, 15  ;;  %v1038_v10 = vrot.slane %v972_v32, %v6516_v8  ;;  %v1042_v60 = vrot.slane %v972_v32, %v6519_v9 }
  0xa9   : > { %v1046_v61 = vrot.slane %v974_v35, %v6516_v8  ;;  %v1050_v11 = vrot.slane %v974_v35, %v6519_v9  ;;  %v6672_v63 = vrot.slane %v1022_v40, %v6516_v8  ;;  %v6675_v17 = vrot.slane %v1026_v29, %v6516_v8 }
  0xaa   : > { %v6678_v18 = vrot.slane %v1030_v41, %v6516_v8  ;;  %v6681_v19 = vrot.slane %v1034_v43, %v6516_v8  ;;  %v6684_v24 = vrot.slane %v1038_v10, %v6516_v8  ;;  %v6687_v25 = vrot.slane %v1042_v60, %v6516_v8 }
  0xab   : > { %v6690_v27 = vrot.slane %v1046_v61, %v6516_v8  ;;  %v6693_v32 = vrot.slane %v1050_v11, %v6516_v8  ;;  %vm1131_vm4 = vcmp.eq.s32.totalorder %v6499_v3, %v6672_v63  ;;  %vm1132_vm5 = vcmp.eq.s32.totalorder %v6499_v3, %v6675_v17 }
  0xac   : > { %vm1133_vm6 = vcmp.eq.s32.totalorder %v6499_v3, %v6678_v18  ;;  %vm1134_vm7 = vcmp.eq.s32.totalorder %v6499_v3, %v6681_v19  ;;  %vm1135_vm8 = vcmp.eq.s32.totalorder %v6499_v3, %v6684_v24  ;;  %vm1136_vm9 = vcmp.eq.s32.totalorder %v6499_v3, %v6687_v25 }
  0xad   : > { %9508 = vst [vmem:[#allocation26_spill] sm:$0xff] %v6693_v32  ;;  %vm1137_vm10 = vcmp.eq.s32.totalorder %v6499_v3, %v6690_v27  ;;  %vm1138_vm11 = vcmp.eq.s32.totalorder %v6499_v3, %v6693_v32  ;;  %v1162_v35 = vsub.f32 1.0, %v6652_v52  ;;  %v1176_v36 = vrot.slane %v1159_v59, %v6516_v8 }
  0xae   : > { %v1180_v37 = vrot.slane %v1159_v59, %v6519_v9  ;;  %v1184_v22 = vrot.slane %v1160_v1, %v6516_v8  ;;  %v1188_v38 = vrot.slane %v1160_v1, %v6519_v9  ;;  %v1192_v40 = vrot.slane %v1161_v2, %v6516_v8 }
  0xaf   : > { %v1196_v29 = vrot.slane %v1161_v2, %v6519_v9  ;;  %v1200_v41 = vrot.slane %v1162_v35, %v6516_v8  ;;  %v1204_v59 = vrot.slane %v1162_v35, %v6519_v9  ;;  %v6733_v43 = vrot.slane %v1176_v36, %v6516_v8 }
  0xb0   : > { %v6736_v44 = vrot.slane %v1180_v37, %v6516_v8  ;;  %v6739_v1 = vrot.slane %v1184_v22, %v6516_v8  ;;  %v6742_v47 = vrot.slane %v1188_v38, %v6516_v8  ;;  %v6745_v54 = vrot.slane %v1192_v40, %v6516_v8 }
  0xb1   : > { %v6748_v2 = vrot.slane %v1196_v29, %v6516_v8  ;;  %v6751_v5 = vrot.slane %v1200_v41, %v6516_v8  ;;  %v6754_v10 = vrot.slane %v1204_v59, %v6516_v8  ;;  %v1299_v60 = vsel %vm1131_vm4, %v6733_v43, 0.0 }
  0xb2   : > { %v1300_v61 = vsel %vm1132_vm5, %v6736_v44, 0.0  ;;  %v1301_v11 = vsel %vm1133_vm6, %v6739_v1, 0.0  ;;  %v1302_v35 = vsel %vm1134_vm7, %v6742_v47, 0.0  ;;  %v1303_v36 = vsel %vm1135_vm8, %v6745_v54, 0.0 }
  0xb3   : > { %9509 = vst [vmem:[#allocation27_spill] sm:$0xff] %v6754_v10  ;;  %v1304_v37 = vsel %vm1136_vm9, %v6748_v2, 0.0  ;;  %v1305_v22 = vsel %vm1137_vm10, %v6751_v5, 0.0  ;;  %v1306_v38 = vsel %vm1138_vm11, %v6754_v10, 0.0  ;;  %v1330_v40 = vrot.slane %v1003_v55, %v6516_v8 }
  0xb4   : > { %v1334_v29 = vrot.slane %v1003_v55, %v6519_v9  ;;  %v1338_v41 = vrot.slane %v1005_v56, %v6516_v8  ;;  %v1342_v59 = vrot.slane %v1005_v56, %v6519_v9  ;;  %v1346_v0 = vrot.slane %v1007_v57, %v6516_v8 }
  0xb5   : > { %v1350_v23 = vrot.slane %v1007_v57, %v6519_v9  ;;  %v1354_v26 = vrot.slane %v1009_v58, %v6516_v8  ;;  %v1358_v21 = vrot.slane %v1009_v58, %v6519_v9  ;;  %v6797_v31 = vrot.slane %v1330_v40, %v6516_v8 }
  0xb6   : > { %v6800_v30 = vrot.slane %v1334_v29, %v6516_v8  ;;  %v6803_v55 = vrot.slane %v1338_v41, %v6516_v8  ;;  %v6806_v13 = vrot.slane %v1342_v59, %v6516_v8  ;;  %v6809_v56 = vrot.slane %v1346_v0, %v6516_v8 }
  0xb7   : > { %9510 = vst [vmem:[#allocation28_spill] sm:$0xff] %v6797_v31  ;;  %v6812_v57 = vrot.slane %v1350_v23, %v6516_v8  ;;  %v6815_v58 = vrot.slane %v1354_v26, %v6516_v8  ;;  %v6818_v40 = vrot.slane %v1358_v21, %v6516_v8  ;;  %vm1439_vm12 = vcmp.eq.s32.totalorder %v6499_v3, %v6797_v31 }
  0xb8   : > { %9511 = vst [vmem:[#allocation29_spill] sm:$0xff] %v6800_v30  ;;  %9512 = vst [vmem:[#allocation30_spill] sm:$0xff] %v6803_v55  ;;  %vm1440_vm13 = vcmp.eq.s32.totalorder %v6499_v3, %v6800_v30  ;;  %vm1441_vm14 = vcmp.eq.s32.totalorder %v6499_v3, %v6803_v55  ;;  %vm1442_vm15 = vcmp.eq.s32.totalorder %v6499_v3, %v6806_v13  ;;  %vm885_vm8 = vcmp.gt.s32.totalorder %v6650_v51, 0 }
  0xb9   : > { %9513 = vst [vmem:[#allocation31_spill] sm:$0xff] %v6806_v13  ;;  %9514 = vst [vmem:[#allocation32_spill] sm:$0xff] %v6809_v56  ;;  %vm1443_vm0 = vcmp.eq.s32.totalorder %v6499_v3, %v6809_v56  ;;  %vm1444_vm1 = vcmp.eq.s32.totalorder %v6499_v3, %v6812_v57  ;;  %vm1445_vm2 = vcmp.eq.s32.totalorder %v6499_v3, %v6815_v58 }
  0xba   : > { %9515 = vst [vmem:[#allocation33_spill] sm:$0xff] %v6812_v57  ;;  %9516 = vst [vmem:[#allocation34_spill] sm:$0xff] %v6815_v58  ;;  %vm1446_vm3 = vcmp.eq.s32.totalorder %v6499_v3, %v6818_v40  ;;  %v1477_v0 = vrot.slane %v6644_v46, %v6516_v8  ;;  %v1481_v21 = vrot.slane %v6644_v46, %v6519_v9 }
  0xbb   : > { %9517 = vst [vmem:[#allocation35_spill] sm:$0xff] %v6818_v40  ;;  %v1485_v26 = vrot.slane %v6646_v49, %v6516_v8  ;;  %v1489_v23 = vrot.slane %v6646_v49, %v6519_v9  ;;  %v1493_v29 = vrot.slane %v6648_v50, %v6516_v8  ;;  %v1497_v41 = vrot.slane %v6648_v50, %v6519_v9 }
  0xbc   : > { %v1501_v59 = vrot.slane %v6652_v52, %v6516_v8  ;;  %v1505_v48 = vrot.slane %v6652_v52, %v6519_v9  ;;  %v6853_v46 = vrot.slane %v1477_v0, %v6516_v8  ;;  %v6856_v28 = vrot.slane %v1481_v21, %v6516_v8 }
  0xbd   : > { %v6859_v49 = vrot.slane %v1485_v26, %v6516_v8  ;;  %v6862_v20 = vrot.slane %v1489_v23, %v6516_v8  ;;  %v6865_v50 = vrot.slane %v1493_v29, %v6516_v8  ;;  %v6868_v12 = vrot.slane %v1497_v41, %v6516_v8 }
  0xbe   : > { %9518 = vst [vmem:[#allocation36_spill] sm:$0xff] %v6853_v46  ;;  %9519 = vst [vmem:[#allocation37_spill] sm:$0xff] %v6856_v28  ;;  %v6871_v52 = vrot.slane %v1501_v59, %v6516_v8  ;;  %v6874_v0 = vrot.slane %v1505_v48, %v6516_v8  ;;  %v1600_v21 = vsel %vm1439_vm12, %v6853_v46, 0.0  ;;  %v1601_v26 = vsel %vm1440_vm13, %v6856_v28, 0.0  ;;  %v6080_v59 = vld [vmem:[%s6485_s28 + $0x4] ss:$8 sps:$4 sm:$0xff]  }
  0xbf   : > { %9520 = vst [vmem:[#allocation38_spill] sm:$0xff] %v6859_v49  ;;  %9521 = vst [vmem:[#allocation39_spill] sm:$0xff] %v6862_v20  ;;  %v1602_v23 = vsel %vm1441_vm14, %v6859_v49, 0.0  ;;  %v1603_v48 = vsel %vm1442_vm15, %v6862_v20, 0.0  ;;  %v1604_v29 = vsel %vm1443_vm0, %v6865_v50, 0.0  ;;  %v1605_v41 = vsel %vm1444_vm1, %v6868_v12, 0.0  ;;  %4665 = vmatprep.mubr.bf16.mxu0 %v6080_v59  ;;  %4708 = vmatprep.mubr.bf16.mxu1 %v6080_v59 }
  0xc0   : > { %9522 = vst [vmem:[#allocation40_spill] sm:$0xff] %v6865_v50  ;;  %9523 = vst [vmem:[#allocation41_spill] sm:$0xff] %v6868_v12  ;;  %v1606_v45 = vsel %vm1445_vm2, %v6871_v52, 0.0  ;;  %v1607_v42 = vsel %vm1446_vm3, %v6874_v0, 0.0  ;;  %v6909_v20 = vadd.f32 %v1600_v21, %v1299_v60  ;;  %v6911_v49 = vadd.f32 %v1601_v26, %v1300_v61 }
  0xc1   : > { %9524 = vst [vmem:[#allocation42_spill] sm:$0xff] %v6871_v52  ;;  %9525 = vst [vmem:[#allocation43_spill] sm:$0xff] %v6874_v0  ;;  %v6913_v50 = vadd.f32 %v1602_v23, %v1301_v11  ;;  %v6915_v28 = vadd.f32 %v1603_v48, %v1302_v35  ;;  %v6917_v12 = vadd.f32 %v1604_v29, %v1303_v36  ;;  %v1796_v60 = vsub.f32 1.0, %v6633_v39 }
  0xc2   : > { %v6919_v57 = vadd.f32 %v1605_v41, %v1304_v37  ;;  %v6921_v58 = vadd.f32 %v1606_v45, %v1305_v22  ;;  %v6923_v52 = vadd.f32 %v1607_v42, %v1306_v38  ;;  %v1663_v0 = vrot.slane %v6656_v6, %v6519_v9 }
  0xc3   : > { %v1971_v61 = vrot.slane %v6661_v4, %v6519_v9  ;;  %v2118_v11 = vrot.slane %v6633_v39, %v6519_v9  ;;  %v2321_v35 = vcombine.low %v6909_v20, %v6911_v49  ;;  %v2323_v45 = vcombine.low %v6913_v50, %v6915_v28 }
  0xc4   : > { %v1719_v42 = vrot.slane %v1663_v0, %v6516_v8  ;;  %v1817_v36 = vrot.slane %v1796_v60, %v6519_v9  ;;  %v2325_v37 = vcombine.low %v6917_v12, %v6919_v57  ;;  %v2327_v22 = vcombine.low %v6921_v58, %v6923_v52 }
  0xc5   : > { %v2027_v38 = vrot.slane %v1971_v61, %v6516_v8  ;;  %v2188_v21 = vrot.slane %v2118_v11, %v6516_v8  ;;  %v6945_v26 = vrot.slane %v2321_v35, %v6532_v14  ;;  %v6948_v23 = vrot.slane %v2323_v45, %v6532_v14 }
  0xc6   : > { %vm1769_vm4 = vcmp.eq.s32.totalorder %v6499_v3, %v1719_v42  ;;  %vm1783_vm5 = vcmp.eq.s32.totalorder %v6513_v7, %v1719_v42  ;;  %v1887_v0 = vrot.slane %v1817_v36, %v6516_v8  ;;  %v6954_v48 = vrot.slane %v2325_v37, %v6532_v14 }
  0xc7   : > { %vm2077_vm6 = vcmp.eq.s32.totalorder %v6499_v3, %v2027_v38  ;;  %vm2091_vm7 = vcmp.eq.s32.totalorder %v6513_v7, %v2027_v38  ;;  %v6959_v29 = vrot.slane %v2327_v22, %v6532_v14  ;;  %v2385_v41 = vcombine.low %v6945_v26, %v6948_v23 }
  0xc8   : > { %v1937_v59 = vsel %vm1769_vm4, %v1887_v0, 0.0  ;;  %v1951_v61 = vsel %vm1783_vm5, %v1887_v0, 0.0  ;;  %v2238_v11 = vsel %vm2077_vm6, %v2188_v21, 0.0  ;;  %v2252_v35 = vsel %vm2091_vm7, %v2188_v21, 0.0 }
  0xc9   : > { %v6963_v45 = vadd.f32 %v2238_v11, %v1937_v59  ;;  %v6965_v42 = vadd.f32 %v2252_v35, %v1951_v61  ;;  %v2389_v36 = vcombine.low %v6954_v48, %v6959_v29  ;;  %v6970_v37 = vrot.slane %v2385_v41, %v6532_v14 }
  0xca   : > { %v9526_v22 = vfloor.f32 %v6621_v62  ;;  %v912_v0 = vadd.s32 1, %v6650_v51  ;;  %v1659_v21 = vrot.slane %v6656_v6, %v6516_v8  ;;  %v886_v61 = vsel %vm885_vm8, %v6650_v51, 0 }
  0xcb   : > { %v6982_v59 = vrot.slane %v2389_v36, %v6532_v14  ;;  %v1813_v41 = vrot.slane %v1796_v60, %v6516_v8  ;;  %v1967_v11 = vrot.slane %v6661_v4, %v6516_v8  ;;  %vm899_vm9 = vcmp.lt.s32.totalorder %v886_v61, 15 }
  0xcc   : > { %v6975_v38 = vsub.f32 %v6621_v62, %v9526_v22  ;;  %vm920_vm10 = vcmp.gt.s32.totalorder %v912_v0, 0  ;;  %v900_v36 = vsel %vm899_vm9, %v886_v61, 15  ;;  %v1715_v51 = vrot.slane %v1659_v21, %v6516_v8 }
  0xcd   : > { %v6993_v6 = vcombine.low %v6970_v37, %v6982_v59  ;;  %v921_v22 = vsel %vm920_vm10, %v912_v0, 0  ;;  %v1671_v60 = vrot.slane %v900_v36, %v6519_v9  ;;  %v1883_v10 = vrot.slane %v1813_v41, %v6516_v8 }
  0xce   : > { %v1797_v62 = vsub.f32 1.0, %v6975_v38  ;;  %v2126_v35 = vrot.slane %v6975_v38, %v6519_v9  ;;  %vm934_vm11 = vcmp.lt.s32.totalorder %v921_v22, 15  ;;  %vm1768_vm12 = vcmp.eq.s32.totalorder %v6499_v3, %v1715_v51 }
  0xcf   : > { %9527 = vst [vmem:[#allocation44_spill] sm:$0xff] %v6993_v6  ;;  %v2836_v56 = vrot.slane %v6993_v6, %v6535_v15  ;;  %v935_v13 = vsel %vm934_vm11, %v921_v22, 15  ;;  %v2844_v55 = vrot.slane %v6993_v6, %v6627_v33  ;;  %v1727_v0 = vrot.slane %v1671_v60, %v6516_v8 }
  0xd0   : > { %v1825_v4 = vrot.slane %v1797_v62, %v6519_v9  ;;  %v2196_v40 = vrot.slane %v2126_v35, %v6516_v8  ;;  %v1979_v61 = vrot.slane %v935_v13, %v6519_v9  ;;  %vm1782_vm13 = vcmp.eq.s32.totalorder %v6513_v7, %v1715_v51 }
  0xd1   : > { %v3950_v30 = vmul.f32 %v2836_v56, %v6963_v45  ;;  %v3964_v35 = vmul.f32 %v2836_v56, %v6965_v42  ;;  %v2023_v22 = vrot.slane %v1967_v11, %v6516_v8  ;;  %vm1771_vm14 = vcmp.eq.s32.totalorder %v6499_v3, %v1727_v0 }
  0xd2   : > { %v1895_v21 = vrot.slane %v1825_v4, %v6516_v8  ;;  %vm1785_vm15 = vcmp.eq.s32.totalorder %v6513_v7, %v1727_v0  ;;  %v2035_v60 = vrot.slane %v1979_v61, %v6516_v8  ;;  %v2114_v4 = vrot.slane %v6633_v39, %v6516_v8 }
  0xd3   : > { %v4398_v9 = vpack.c.bf16 %v3964_v35, %v3950_v30  ;;  %v1936_v31 = vsel %vm1768_vm12, %v1883_v10, 0.0  ;;  %v1950_v56 = vsel %vm1782_vm13, %v1883_v10, 0.0  ;;  %vm2076_vm2 = vcmp.eq.s32.totalorder %v6499_v3, %v2023_v22 }
  0xd4   : > { %v1939_v46 = vsel %vm1771_vm14, %v1895_v21, 0.0  ;;  %v1953_v32 = vsel %vm1785_vm15, %v1895_v21, 0.0  ;;  %vm2079_vm0 = vcmp.eq.s32.totalorder %v6499_v3, %v2035_v60  ;;  %vm2093_vm1 = vcmp.eq.s32.totalorder %v6513_v7, %v2035_v60 }
  0xd5   : > { %4633 = vmatprep.subr.bf16.mxu0 %v4398_v9  ;;  %v2240_v41 = vsel %vm2079_vm0, %v2196_v40, 0.0  ;;  %v2254_v11 = vsel %vm2093_vm1, %v2196_v40, 0.0  ;;  %vm2090_vm3 = vcmp.eq.s32.totalorder %v6513_v7, %v2023_v22  ;;  %v2184_v39 = vrot.slane %v2114_v4, %v6516_v8 }
  0xd6   : > { %v7024_v30 = vadd.f32 %v2240_v41, %v1939_v46  ;;  %v7026_v0 = vadd.f32 %v2254_v11, %v1953_v32  ;;  %v2832_v51 = vrot.slane %v6993_v6, %v6516_v8  ;;  %v1667_v21 = vrot.slane %v900_v36, %v6516_v8 }
  0xd7   : > { %v2237_v61 = vsel %vm2076_vm2, %v2184_v39, 0.0  ;;  %v2251_v10 = vsel %vm2090_vm3, %v2184_v39, 0.0  ;;  %v1821_v35 = vrot.slane %v1797_v62, %v6516_v8  ;;  %v1975_v9 = vrot.slane %v935_v13, %v6516_v8 }
  0xd8   : > { %v3952_v40 = vmul.f32 %v2844_v55, %v7024_v30  ;;  %v3966_v22 = vmul.f32 %v2844_v55, %v7026_v0  ;;  %v7035_v60 = vadd.f32 %v2237_v61, %v1936_v31  ;;  %v7037_v46 = vadd.f32 %v2251_v10, %v1950_v56 }
  0xd9   : > { %v1723_v32 = vrot.slane %v1667_v21, %v6516_v8  ;;  %v1891_v4 = vrot.slane %v1821_v35, %v6516_v8  ;;  %v2031_v36 = vrot.slane %v1975_v9, %v6516_v8  ;;  %v2122_v41 = vrot.slane %v6975_v38, %v6516_v8 }
  0xda   : > { %v4400_v62 = vpack.c.bf16 %v3966_v22, %v3952_v40  ;;  %v3949_v13 = vmul.f32 %v2832_v51, %v7035_v60  ;;  %v3963_v11 = vmul.f32 %v2832_v51, %v7037_v46  ;;  %v2840_v31 = vrot.slane %v6993_v6, %v6630_v34 }
  0xdb   : > { %vm1770_vm4 = vcmp.eq.s32.totalorder %v6499_v3, %v1723_v32  ;;  %vm1784_vm5 = vcmp.eq.s32.totalorder %v6513_v7, %v1723_v32  ;;  %vm2078_vm6 = vcmp.eq.s32.totalorder %v6499_v3, %v2031_v36  ;;  %vm2092_vm7 = vcmp.eq.s32.totalorder %v6513_v7, %v2031_v36 }
  0xdc   : > { %4676 = vmatprep.subr.bf16.mxu1 %v4400_v62  ;;  %v4397_v55 = vpack.c.bf16 %v3963_v11, %v3949_v13  ;;  %v1938_v56 = vsel %vm1770_vm4, %v1891_v4, 0.0  ;;  %v1952_v38 = vsel %vm1784_vm5, %v1891_v4, 0.0  ;;  %v2192_v39 = vrot.slane %v2122_v41, %v6516_v8 }
  0xdd   : > { %v2386_v51 = vcombine.high %v6945_v26, %v6948_v23  ;;  %v2390_v21 = vcombine.high %v6954_v48, %v6959_v29  ;;  %v7059_v61 = vcombine.high %v6970_v37, %v6982_v59  ;;  %vm887_vm8 = vcmp.gt.s32.totalorder %v6654_v53, 0 }
  0xde   : > { %4634 = vmatpush1.bf16.msra.mxu0 %v4397_v55  ;;  %v2239_v35 = vsel %vm2078_vm6, %v2192_v39, 0.0  ;;  %v2253_v9 = vsel %vm2092_vm7, %v2192_v39, 0.0  ;;  %vm1145_vm10 = vcmp.eq.s32.totalorder %v6513_v7, %v6672_v63  ;;  %vm1146_vm11 = vcmp.eq.s32.totalorder %v6513_v7, %v6675_v17 }
  0xdf   : > { %9528 = vst [vmem:[#allocation45_spill] sm:$0xff] %v7059_v61  ;;  %v7067_v26 = vadd.f32 %v2239_v35, %v1938_v56  ;;  %v7069_v23 = vadd.f32 %v2253_v9, %v1952_v38  ;;  %v2413_v48 = vrot.slane %v2386_v51, %v6532_v14  ;;  %v2441_v29 = vrot.slane %v2390_v21, %v6532_v14 }
  0xe0   : > { %v2948_v37 = vrot.slane %v7059_v61, %v6535_v15  ;;  %v2956_v59 = vrot.slane %v7059_v61, %v6627_v33  ;;  %v2944_v32 = vrot.slane %v7059_v61, %v6516_v8  ;;  %v2952_v4 = vrot.slane %v7059_v61, %v6630_v34 }
  0xe1   : > { %v3951_v36 = vmul.f32 %v2840_v31, %v7067_v26  ;;  %v3965_v41 = vmul.f32 %v2840_v31, %v7069_v23  ;;  %v7083_v62 = vcombine.low %v2413_v48, %v2441_v29  ;;  %v7085_v13 = vcombine.high %v2413_v48, %v2441_v29 }
  0xe2   : > { %v4006_v11 = vmul.f32 %v2948_v37, %v6963_v45  ;;  %v4020_v55 = vmul.f32 %v2948_v37, %v6965_v42  ;;  %v4008_v56 = vmul.f32 %v2956_v59, %v7024_v30  ;;  %v4022_v38 = vmul.f32 %v2956_v59, %v7026_v0 }
  0xe3   : > { %9529 = vst [vmem:[#allocation46_spill] sm:$0xff] %v7083_v62  ;;  %v4399_v39 = vpack.c.bf16 %v3965_v41, %v3951_v36  ;;  %v2892_v51 = vrot.slane %v7083_v62, %v6535_v15  ;;  %v2900_v21 = vrot.slane %v7083_v62, %v6627_v33  ;;  %v2888_v31 = vrot.slane %v7083_v62, %v6516_v8 }
  0xe4   : > { %v2896_v35 = vrot.slane %v7083_v62, %v6630_v34  ;;  %v4426_v9 = vpack.c.bf16 %v4020_v55, %v4006_v11  ;;  %v4428_v48 = vpack.c.bf16 %v4022_v38, %v4008_v56  ;;  %v4005_v29 = vmul.f32 %v2944_v32, %v7035_v60 }
  0xe5   : > { %4677 = vmatpush1.bf16.msra.mxu1 %v4399_v39  ;;  %v3978_v37 = vmul.f32 %v2892_v51, %v6963_v45  ;;  %v3992_v59 = vmul.f32 %v2892_v51, %v6965_v42  ;;  %v3980_v36 = vmul.f32 %v2900_v21, %v7024_v30  ;;  %v3994_v41 = vmul.f32 %v2900_v21, %v7026_v0 }
  0xe6   : > { %v3977_v22 = vmul.f32 %v2888_v31, %v7035_v60  ;;  %v3991_v40 = vmul.f32 %v2888_v31, %v7037_v46  ;;  %v3979_v10 = vmul.f32 %v2896_v35, %v7067_v26  ;;  %v3993_v11 = vmul.f32 %v2896_v35, %v7069_v23 }
  0xe7   : > { %v4412_v55 = vpack.c.bf16 %v3992_v59, %v3978_v37  ;;  %v4414_v56 = vpack.c.bf16 %v3994_v41, %v3980_v36  ;;  %v4019_v38 = vmul.f32 %v2944_v32, %v7037_v46  ;;  %v4007_v39 = vmul.f32 %v2952_v4, %v7067_v26 }
  0xe8   : > { %v4411_v61 = vpack.c.bf16 %v3991_v40, %v3977_v22  ;;  %v4413_v51 = vpack.c.bf16 %v3993_v11, %v3979_v10  ;;  %v4021_v62 = vmul.f32 %v2952_v4, %v7069_v23  ;;  %v3004_v21 = vrot.slane %v7085_v13, %v6535_v15 }
  0xe9   : > { %4635 = vmatprep.subr.bf16.mxu0 %v4412_v55  ;;  %4678 = vmatprep.subr.bf16.mxu1 %v4414_v56  ;;  %v4425_v31 = vpack.c.bf16 %v4019_v38, %v4005_v29  ;;  %v3012_v6 = vrot.slane %v7085_v13, %v6627_v33  ;;  %v3000_v35 = vrot.slane %v7085_v13, %v6516_v8  ;;  %v9530_v32 = vfloor.f32 %v6623_v16 }
  0xea   : > { %4636 = vmatpush1.bf16.msra.mxu0 %v4411_v61  ;;  %4679 = vmatpush1.bf16.msra.mxu1 %v4413_v51  ;;  %v4427_v10 = vpack.c.bf16 %v4021_v62, %v4007_v39  ;;  %v4034_v22 = vmul.f32 %v3004_v21, %v6963_v45  ;;  %v4048_v4 = vmul.f32 %v3004_v21, %v6965_v42  ;;  %v888_v36 = vsel %vm887_vm8, %v6654_v53, 0 }
  0xeb   : > { %v5977_v40 = vtrunc.f32 %v9530_v32  ;;  %4637 = vmatprep.subr.bf16.mxu0 %v4426_v9  ;;  %4680 = vmatprep.subr.bf16.mxu1 %v4428_v48  ;;  %v4036_v29 = vmul.f32 %v3012_v6, %v7024_v30  ;;  %v4050_v37 = vmul.f32 %v3012_v6, %v7026_v0  ;;  %v4033_v59 = vmul.f32 %v3000_v35, %v7035_v60 }
  0xec   : > { %v4440_v41 = vpack.c.bf16 %v4048_v4, %v4034_v22  ;;  %v4047_v16 = vmul.f32 %v3000_v35, %v7037_v46  ;;  %v3008_v61 = vrot.slane %v7085_v13, %v6630_v34  ;;  %v2328_v62 = vcombine.high %v6921_v58, %v6923_v52 }
  0xed   : > { %v4442_v11 = vpack.c.bf16 %v4050_v37, %v4036_v29  ;;  %v9531_v9 = vcombine.high %v6909_v20, %v6911_v49  ;;  %v9532_v6 = vcombine.high %v6913_v50, %v6915_v28  ;;  %v9533_v56 = vcombine.high %v6917_v12, %v6919_v57 }
  0xee   : > { %v7143_v39 = vcvt.f32.s32 %v5977_v40  ;;  %4638 = vmatpush1.bf16.msra.mxu0 %v4425_v31  ;;  %4681 = vmatpush1.bf16.msra.mxu1 %v4427_v10  ;;  %v4439_v58 = vpack.c.bf16 %v4047_v16, %v4033_v59  ;;  %v4035_v52 = vmul.f32 %v3008_v61, %v7067_v26  ;;  %v4049_v20 = vmul.f32 %v3008_v61, %v7069_v23 }
  0xef   : > { %v2342_v48 = vrot.slane %v9531_v9, %v6532_v14  ;;  %v2356_v55 = vrot.slane %v9532_v6, %v6532_v14  ;;  %v2370_v38 = vrot.slane %v9533_v56, %v6532_v14  ;;  %4639 = vmatprep.subr.bf16.mxu0 %v4440_v41  ;;  %4682 = vmatprep.subr.bf16.mxu1 %v4442_v11  ;;  %vm901_vm9 = vcmp.lt.s32.totalorder %v888_v36, 15  ;;  %v9535_v6 = vld [vmem:[#allocation26_spill] sm:$0xff] }
  0xf0   : > { %v2384_v49 = vrot.slane %v2328_v62, %v6532_v14  ;;  %v4441_v51 = vpack.c.bf16 %v4049_v20, %v4035_v52  ;;  %vm1147_vm12 = vcmp.eq.s32.totalorder %v6513_v7, %v6678_v18  ;;  %vm1148_vm13 = vcmp.eq.s32.totalorder %v6513_v7, %v6681_v19 }
  0xf1   : > { %v2387_v28 = vcombine.low %v2342_v48, %v2356_v55  ;;  %v2388_v50 = vcombine.high %v2342_v48, %v2356_v55  ;;  %vm1149_vm14 = vcmp.eq.s32.totalorder %v6513_v7, %v6684_v24  ;;  %v7160_v35 = vsel %vm901_vm9, %v888_v36, 15 }
  0xf2   : > { %v2391_v12 = vcombine.low %v2370_v38, %v2384_v49  ;;  %v2392_v21 = vcombine.high %v2370_v38, %v2384_v49  ;;  %4640 = vmatpush1.bf16.msra.mxu0 %v4439_v58  ;;  %4683 = vmatpush1.bf16.msra.mxu1 %v4441_v51  ;;  %v7163_v32 = vadd.s32 1, %v6654_v53  ;;  %vm1150_vm15 = vcmp.eq.s32.totalorder %v6513_v7, %v6687_v25 }
  0xf3   : > { %v2406_v57 = vrot.slane %v2387_v28, %v6532_v14  ;;  %v2420_v31 = vrot.slane %v2388_v50, %v6532_v14  ;;  %vm1151_vm0 = vcmp.eq.s32.totalorder %v6513_v7, %v6690_v27  ;;  %v7175_v19 = vsel %vm1145_vm10, %v6733_v43, 0.0 }
  0xf4   : > { %v2434_v40 = vrot.slane %v2391_v12, %v6532_v14  ;;  %v2448_v10 = vrot.slane %v2392_v21, %v6532_v14  ;;  %v7181_v53 = vsel %vm1146_vm11, %v6736_v44, 0.0  ;;  %v7187_v24 = vsel %vm1147_vm12, %v6739_v1, 0.0  ;;  %v9534_v1 = vld [vmem:[#allocation28_spill] sm:$0xff] }
  0xf5   : > { %v7190_v25 = vsel %vm1148_vm13, %v6742_v47, 0.0  ;;  %v7199_v22 = vsel %vm1149_vm14, %v6745_v54, 0.0  ;;  %v7204_v44 = vsel %vm1150_vm15, %v6748_v2, 0.0  ;;  %v7207_v18 = vsel %vm1151_vm0, %v6751_v5, 0.0 }
  0xf6   : > { %v7192_v27 = vcombine.low %v2406_v57, %v2434_v40  ;;  %v7194_v63 = vcombine.low %v2420_v31, %v2448_v10  ;;  %v7196_v43 = vcombine.high %v2406_v57, %v2434_v40  ;;  %v7201_v17 = vcombine.high %v2420_v31, %v2448_v10  ;;  %v9536_v57 = vld [vmem:[#allocation36_spill] sm:$0xff] }
  0xf7   : > { %vm1453_vm1 = vcmp.eq.s32.totalorder %v6513_v7, %v9534_v1  ;;  %vm1152_vm2 = vcmp.eq.s32.totalorder %v6513_v7, %v9535_v6  ;;  %vm922_vm3 = vcmp.gt.s32.totalorder %v7163_v32, 0  ;;  %vm889_vm12 = vcmp.gt.s32.totalorder %v7143_v39, 0 }
  0xf8   : > { %v3060_v47 = vrot.slane %v7192_v27, %v6535_v15  ;;  %v3068_v4 = vrot.slane %v7192_v27, %v6627_v33  ;;  %v3056_v54 = vrot.slane %v7192_v27, %v6516_v8  ;;  %v3064_v29 = vrot.slane %v7192_v27, %v6630_v34 }
  0xf9   : > { %v3116_v2 = vrot.slane %v7194_v63, %v6535_v15  ;;  %v3124_v5 = vrot.slane %v7194_v63, %v6627_v33  ;;  %v3112_v37 = vrot.slane %v7194_v63, %v6516_v8  ;;  %v3120_v59 = vrot.slane %v7194_v63, %v6630_v34 }
  0xfa   : > { %v4062_v36 = vmul.f32 %v3060_v47, %v6963_v45  ;;  %v4076_v41 = vmul.f32 %v3060_v47, %v6965_v42  ;;  %v4064_v16 = vmul.f32 %v3068_v4, %v7024_v30  ;;  %v4078_v61 = vmul.f32 %v3068_v4, %v7026_v0 }
  0xfb   : > { %v4061_v62 = vmul.f32 %v3056_v54, %v7035_v60  ;;  %v4075_v11 = vmul.f32 %v3056_v54, %v7037_v46  ;;  %v4063_v9 = vmul.f32 %v3064_v29, %v7067_v26  ;;  %v4077_v48 = vmul.f32 %v3064_v29, %v7069_v23 }
  0xfc   : > { %v4454_v55 = vpack.c.bf16 %v4076_v41, %v4062_v36  ;;  %v4456_v56 = vpack.c.bf16 %v4078_v61, %v4064_v16  ;;  %v4090_v38 = vmul.f32 %v3116_v2, %v6963_v45  ;;  %v4104_v58 = vmul.f32 %v3116_v2, %v6965_v42 }
  0xfd   : > { %v4453_v52 = vpack.c.bf16 %v4075_v11, %v4061_v62  ;;  %v4455_v20 = vpack.c.bf16 %v4077_v48, %v4063_v9  ;;  %v4092_v49 = vmul.f32 %v3124_v5, %v7024_v30  ;;  %v4106_v28 = vmul.f32 %v3124_v5, %v7026_v0 }
  0xfe   : > { %4641 = vmatprep.subr.bf16.mxu0 %v4454_v55  ;;  %4684 = vmatprep.subr.bf16.mxu1 %v4456_v56  ;;  %v4468_v50 = vpack.c.bf16 %v4104_v58, %v4090_v38  ;;  %v4089_v51 = vmul.f32 %v3112_v37, %v7035_v60  ;;  %v4103_v12 = vmul.f32 %v3112_v37, %v7037_v46  ;;  %v7247_v21 = vsel %vm1453_vm1, %v9536_v57, 0.0 }
  0xff   : > { %4642 = vmatpush1.bf16.msra.mxu0 %v4453_v52  ;;  %4685 = vmatpush1.bf16.msra.mxu1 %v4455_v20  ;;  %v4470_v31 = vpack.c.bf16 %v4106_v28, %v4092_v49  ;;  %v4091_v40 = vmul.f32 %v3120_v59, %v7067_v26  ;;  %v4105_v10 = vmul.f32 %v3120_v59, %v7069_v23  ;;  %v7274_v9 = vsel %vm922_vm3, %v7163_v32, 0 }
 0x100   : > { %4643 = vmatprep.subr.bf16.mxu0 %v4468_v50  ;;  %v4467_v47 = vpack.c.bf16 %v4103_v12, %v4089_v51  ;;  %v3172_v4 = vrot.slane %v7196_v43, %v6535_v15  ;;  %v3180_v54 = vrot.slane %v7196_v43, %v6627_v33  ;;  %v3168_v1 = vrot.slane %v7196_v43, %v6516_v8  ;;  %v9537_v51 = vld [vmem:[#allocation27_spill] sm:$0xff] }
 0x101   : > { %4686 = vmatprep.subr.bf16.mxu1 %v4470_v31  ;;  %v4469_v29 = vpack.c.bf16 %v4105_v10, %v4091_v40  ;;  %v3176_v2 = vrot.slane %v7196_v43, %v6630_v34  ;;  %v3228_v5 = vrot.slane %v7201_v17, %v6535_v15  ;;  %v3236_v37 = vrot.slane %v7201_v17, %v6627_v33  ;;  %v9538_v40 = vld [vmem:[#allocation29_spill] sm:$0xff]  ;;  %v9539_v10 = vld [vmem:[#allocation30_spill] sm:$0xff] }
 0x102   : > { %v4118_v59 = vmul.f32 %v3172_v4, %v6963_v45  ;;  %v4132_v36 = vmul.f32 %v3172_v4, %v6965_v42  ;;  %v4120_v41 = vmul.f32 %v3180_v54, %v7024_v30  ;;  %v4134_v16 = vmul.f32 %v3180_v54, %v7026_v0 }
 0x103   : > { %4644 = vmatpush1.bf16.msra.mxu0 %v4467_v47  ;;  %4687 = vmatpush1.bf16.msra.mxu1 %v4469_v29  ;;  %v4117_v61 = vmul.f32 %v3168_v1, %v7035_v60  ;;  %v4131_v62 = vmul.f32 %v3168_v1, %v7037_v46  ;;  %v4119_v11 = vmul.f32 %v3176_v2, %v7067_v26  ;;  %v1320_v12 = vsel %vm1152_vm2, %v9537_v51, 0.0  ;;  %v9540_v1 = vld [vmem:[#allocation31_spill] sm:$0xff]  ;;  %v9541_v29 = vld [vmem:[#allocation32_spill] sm:$0xff] }
 0x104   : > { %v4482_v48 = vpack.c.bf16 %v4132_v36, %v4118_v59  ;;  %v4484_v55 = vpack.c.bf16 %v4134_v16, %v4120_v41  ;;  %v4133_v56 = vmul.f32 %v3176_v2, %v7069_v23  ;;  %v4146_v38 = vmul.f32 %v3228_v5, %v6963_v45  ;;  %v9542_v2 = vld [vmem:[#allocation33_spill] sm:$0xff]  ;;  %v9544_v41 = vld [vmem:[#allocation34_spill] sm:$0xff]  ;;  %v9545_v16 = vld [vmem:[#allocation35_spill] sm:$0xff] }
 0x105   : > { %v4481_v58 = vpack.c.bf16 %v4131_v62, %v4117_v61  ;;  %v4160_v52 = vmul.f32 %v3228_v5, %v6965_v42  ;;  %v4148_v20 = vmul.f32 %v3236_v37, %v7024_v30  ;;  %v4162_v49 = vmul.f32 %v3236_v37, %v7026_v0  ;;  %v9543_v5 = vld [vmem:[#allocation37_spill] sm:$0xff]  ;;  %v9546_v61 = vld [vmem:[#allocation38_spill] sm:$0xff] }
 0x106   : > { %4645 = vmatprep.subr.bf16.mxu0 %v4482_v48  ;;  %4688 = vmatprep.subr.bf16.mxu1 %v4484_v55  ;;  %v4483_v28 = vpack.c.bf16 %v4133_v56, %v4119_v11  ;;  %v3224_v32 = vrot.slane %v7201_v17, %v6516_v8  ;;  %v3232_v50 = vrot.slane %v7201_v17, %v6630_v34  ;;  %vm936_vm6 = vcmp.lt.s32.totalorder %v7274_v9, 15  ;;  %v9547_v11 = vld [vmem:[#allocation39_spill] sm:$0xff]  ;;  %v9548_v55 = vld [vmem:[#allocation40_spill] sm:$0xff] }
 0x107   : > { %4646 = vmatpush1.bf16.msra.mxu0 %v4481_v58  ;;  %v4496_v57 = vpack.c.bf16 %v4160_v52, %v4146_v38  ;;  %v4498_v31 = vpack.c.bf16 %v4162_v49, %v4148_v20  ;;  %vm1454_vm4 = vcmp.eq.s32.totalorder %v6513_v7, %v9538_v40  ;;  %vm1455_vm5 = vcmp.eq.s32.totalorder %v6513_v7, %v9539_v10  ;;  %v9549_v38 = vld [vmem:[#allocation41_spill] sm:$0xff]  ;;  %v9550_v52 = vld [vmem:[#allocation42_spill] sm:$0xff]  ;;  %v9551_v49 = vld [vmem:[#allocation43_spill] sm:$0xff] }
 0x108   : > { %4689 = vmatpush1.bf16.msra.mxu1 %v4483_v28  ;;  %v4145_v47 = vmul.f32 %v3224_v32, %v7035_v60  ;;  %v4159_v4 = vmul.f32 %v3224_v32, %v7037_v46  ;;  %v4147_v54 = vmul.f32 %v3232_v50, %v7067_v26  ;;  %v4161_v6 = vmul.f32 %v3232_v50, %v7069_v23 }
 0x109   : > { %4647 = vmatprep.subr.bf16.mxu0 %v4496_v57  ;;  %4690 = vmatprep.subr.bf16.mxu1 %v4498_v31  ;;  %vm1456_vm7 = vcmp.eq.s32.totalorder %v6513_v7, %v9540_v1  ;;  %vm1457_vm8 = vcmp.eq.s32.totalorder %v6513_v7, %v9541_v29  ;;  %vm1458_vm9 = vcmp.eq.s32.totalorder %v6513_v7, %v9542_v2  ;;  %v1615_v37 = vsel %vm1454_vm4, %v9543_v5, 0.0 }
 0x10a   : > { %v4495_v59 = vpack.c.bf16 %v4159_v4, %v4145_v47  ;;  %v4497_v36 = vpack.c.bf16 %v4161_v6, %v4147_v54  ;;  %vm1459_vm10 = vcmp.eq.s32.totalorder %v6513_v7, %v9544_v41  ;;  %vm1460_vm11 = vcmp.eq.s32.totalorder %v6513_v7, %v9545_v16 }
 0x10b   : > { %v1616_v62 = vsel %vm1455_vm5, %v9546_v61, 0.0  ;;  %v1617_v48 = vsel %vm1456_vm7, %v9547_v11, 0.0  ;;  %v1618_v56 = vsel %vm1457_vm8, %v9548_v55, 0.0  ;;  %v1619_v58 = vsel %vm1458_vm9, %v9549_v38, 0.0 }
 0x10c   : > { %4648 = vmatpush1.bf16.msra.mxu0 %v4495_v59  ;;  %4691 = vmatpush1.bf16.msra.mxu1 %v4497_v36  ;;  %v1620_v20 = vsel %vm1459_vm10, %v9550_v52, 0.0  ;;  %v1621_v28 = vsel %vm1460_vm11, %v9551_v49, 0.0  ;;  %v1642_v32 = vadd.f32 %v7247_v21, %v7175_v19  ;;  %v1643_v50 = vadd.f32 %v1615_v37, %v7181_v53 }
 0x10d   : > { %v1644_v51 = vadd.f32 %v1616_v62, %v7187_v24  ;;  %v1645_v57 = vadd.f32 %v1617_v48, %v7190_v25  ;;  %v1646_v31 = vadd.f32 %v1618_v56, %v7199_v22  ;;  %v1647_v40 = vadd.f32 %v1619_v58, %v7204_v44 }
 0x10e   : > { %v1648_v10 = vadd.f32 %v1620_v20, %v7207_v18  ;;  %v1649_v47 = vadd.f32 %v1621_v28, %v1320_v12  ;;  %v2575_v4 = vcombine.low %v1642_v32, %v1643_v50  ;;  %v2576_v54 = vcombine.high %v1642_v32, %v1643_v50  ;;  %v9552_v32 = vld [vmem:[#allocation14_spill] sm:$0xff] }
 0x10f   : > { %v2577_v6 = vcombine.low %v1644_v51, %v1645_v57  ;;  %v2579_v1 = vcombine.low %v1646_v31, %v1647_v40  ;;  %v2578_v29 = vcombine.high %v1644_v51, %v1645_v57  ;;  %v2580_v2 = vcombine.high %v1646_v31, %v1647_v40  ;;  %v9553_v51 = vld [vmem:[#allocation24_spill] sm:$0xff] }
 0x110   : > { %v2581_v19 = vcombine.low %v1648_v10, %v1649_v47  ;;  %v2589_v53 = vrot.slane %v2575_v4, %v6532_v14  ;;  %v2582_v21 = vcombine.high %v1648_v10, %v1649_v47  ;;  %v2596_v24 = vrot.slane %v2576_v54, %v6532_v14 }
 0x111   : > { %v2603_v25 = vrot.slane %v2577_v6, %v6532_v14  ;;  %v2617_v22 = vrot.slane %v2579_v1, %v6532_v14  ;;  %v2610_v44 = vrot.slane %v2578_v29, %v6532_v14  ;;  %v2624_v18 = vrot.slane %v2580_v2, %v6532_v14 }
 0x112   : > { %v2631_v12 = vrot.slane %v2581_v19, %v6532_v14  ;;  %v2638_v5 = vrot.slane %v2582_v21, %v6532_v14  ;;  %v7337_v37 = vsel %vm936_vm6, %v7274_v9, 15  ;;  %v1675_v59 = vrot.slane %v7160_v35, %v6516_v8 }
 0x113   : > { %v2639_v36 = vcombine.low %v2589_v53, %v2603_v25  ;;  %v2640_v41 = vcombine.high %v2589_v53, %v2603_v25  ;;  %v2641_v16 = vcombine.low %v2596_v24, %v2610_v44  ;;  %v2642_v61 = vcombine.high %v2596_v24, %v2610_v44 }
 0x114   : > { %v2643_v62 = vcombine.low %v2617_v22, %v2631_v12  ;;  %v2644_v11 = vcombine.high %v2617_v22, %v2631_v12  ;;  %v2645_v48 = vcombine.low %v2624_v18, %v2638_v5  ;;  %v2646_v55 = vcombine.high %v2624_v18, %v2638_v5 }
 0x115   : > { %v2653_v56 = vrot.slane %v2639_v36, %v6532_v14  ;;  %v2667_v38 = vrot.slane %v2640_v41, %v6532_v14  ;;  %v2660_v58 = vrot.slane %v2641_v16, %v6532_v14  ;;  %v2674_v9 = vrot.slane %v2642_v61, %v6532_v14 }
 0x116   : > { %v2681_v52 = vrot.slane %v2643_v62, %v6532_v14  ;;  %v2695_v20 = vrot.slane %v2644_v11, %v6532_v14  ;;  %v2688_v49 = vrot.slane %v2645_v48, %v6532_v14  ;;  %v2702_v28 = vrot.slane %v2646_v55, %v6532_v14 }
 0x117   : > { %v1679_v50 = vrot.slane %v7160_v35, %v9552_v32  ;;  %v1798_v57 = vsub.f32 1.0, %v9553_v51  ;;  %v1983_v31 = vrot.slane %v7337_v37, %v6516_v8  ;;  %v1987_v40 = vrot.slane %v7337_v37, %v9552_v32 }
 0x118   : > { %v7356_v10 = vcombine.low %v2653_v56, %v2681_v52  ;;  %v7358_v47 = vcombine.low %v2667_v38, %v2695_v20  ;;  %v7360_v4 = vcombine.high %v2653_v56, %v2681_v52  ;;  %v7362_v54 = vcombine.high %v2667_v38, %v2695_v20 }
 0x119   : > { %v7364_v6 = vcombine.low %v2660_v58, %v2688_v49  ;;  %v7366_v1 = vcombine.low %v2674_v9, %v2702_v28  ;;  %v7368_v29 = vcombine.high %v2660_v58, %v2688_v49  ;;  %v7370_v2 = vcombine.high %v2674_v9, %v2702_v28 }
 0x11a   : > { %v3284_v19 = vrot.slane %v7356_v10, %v6535_v15  ;;  %v3292_v53 = vrot.slane %v7356_v10, %v6627_v33  ;;  %v3280_v21 = vrot.slane %v7356_v10, %v6516_v8  ;;  %v3288_v24 = vrot.slane %v7356_v10, %v6630_v34 }
 0x11b   : > { %v3340_v25 = vrot.slane %v7358_v47, %v6535_v15  ;;  %v3348_v22 = vrot.slane %v7358_v47, %v6627_v33  ;;  %v3336_v44 = vrot.slane %v7358_v47, %v6516_v8  ;;  %v3344_v18 = vrot.slane %v7358_v47, %v6630_v34 }
 0x11c   : > { %v4174_v12 = vmul.f32 %v3284_v19, %v6963_v45  ;;  %v4188_v5 = vmul.f32 %v3284_v19, %v6965_v42  ;;  %v4176_v36 = vmul.f32 %v3292_v53, %v7024_v30  ;;  %v4190_v41 = vmul.f32 %v3292_v53, %v7026_v0 }
 0x11d   : > { %v4173_v16 = vmul.f32 %v3280_v21, %v7035_v60  ;;  %v4187_v61 = vmul.f32 %v3280_v21, %v7037_v46  ;;  %v4175_v62 = vmul.f32 %v3288_v24, %v7067_v26  ;;  %v4189_v11 = vmul.f32 %v3288_v24, %v7069_v23 }
 0x11e   : > { %v4510_v48 = vpack.c.bf16 %v4188_v5, %v4174_v12  ;;  %v4512_v55 = vpack.c.bf16 %v4190_v41, %v4176_v36  ;;  %v4202_v56 = vmul.f32 %v3340_v25, %v6963_v45  ;;  %v4216_v38 = vmul.f32 %v3340_v25, %v6965_v42 }
 0x11f   : > { %v4509_v58 = vpack.c.bf16 %v4187_v61, %v4173_v16  ;;  %v4511_v9 = vpack.c.bf16 %v4189_v11, %v4175_v62  ;;  %v4204_v52 = vmul.f32 %v3348_v22, %v7024_v30  ;;  %v4218_v20 = vmul.f32 %v3348_v22, %v7026_v0 }
 0x120   : > { %4649 = vmatprep.subr.bf16.mxu0 %v4510_v48  ;;  %4692 = vmatprep.subr.bf16.mxu1 %v4512_v55  ;;  %v4524_v49 = vpack.c.bf16 %v4216_v38, %v4202_v56  ;;  %v4201_v28 = vmul.f32 %v3336_v44, %v7035_v60  ;;  %v4215_v19 = vmul.f32 %v3336_v44, %v7037_v46  ;;  %v7403_v53 = vsub.s32 5, %v6499_v3 }
 0x121   : > { %4650 = vmatpush1.bf16.msra.mxu0 %v4509_v58  ;;  %4693 = vmatpush1.bf16.msra.mxu1 %v4511_v9  ;;  %v4526_v21 = vpack.c.bf16 %v4218_v20, %v4204_v52  ;;  %v4203_v24 = vmul.f32 %v3344_v18, %v7067_v26  ;;  %v4217_v25 = vmul.f32 %v3344_v18, %v7069_v23  ;;  %v890_v58 = vsel %vm889_vm12, %v7143_v39, 0 }
 0x122   : > { %9554 = vst [vmem:[#allocation28_spill] sm:$0xff] %v7403_v53  ;;  %4651 = vmatprep.subr.bf16.mxu0 %v4524_v49  ;;  %v4523_v22 = vpack.c.bf16 %v4215_v19, %v4201_v28  ;;  %v3396_v12 = vrot.slane %v7360_v4, %v6535_v15  ;;  %v3404_v44 = vrot.slane %v7360_v4, %v6627_v33  ;;  %vm903_vm13 = vcmp.lt.s32.totalorder %v890_v58, 15 }
 0x123   : > { %v3392_v5 = vrot.slane %v7360_v4, %v6516_v8  ;;  %4694 = vmatprep.subr.bf16.mxu1 %v4526_v21  ;;  %v4525_v36 = vpack.c.bf16 %v4217_v25, %v4203_v24  ;;  %v3400_v41 = vrot.slane %v7360_v4, %v6630_v34  ;;  %v3452_v18 = vrot.slane %v7362_v54, %v6535_v15 }
 0x124   : > { %v3460_v16 = vrot.slane %v7362_v54, %v6627_v33  ;;  %v4230_v61 = vmul.f32 %v3396_v12, %v6963_v45  ;;  %v4244_v62 = vmul.f32 %v3396_v12, %v6965_v42  ;;  %v4232_v11 = vmul.f32 %v3404_v44, %v7024_v30 }
 0x125   : > { %v4246_v48 = vmul.f32 %v3404_v44, %v7026_v0  ;;  %4652 = vmatpush1.bf16.msra.mxu0 %v4523_v22  ;;  %4695 = vmatpush1.bf16.msra.mxu1 %v4525_v36  ;;  %v4229_v55 = vmul.f32 %v3392_v5, %v7035_v60  ;;  %v4243_v56 = vmul.f32 %v3392_v5, %v7037_v46 }
 0x126   : > { %v4231_v38 = vmul.f32 %v3400_v41, %v7067_v26  ;;  %v4538_v9 = vpack.c.bf16 %v4244_v62, %v4230_v61  ;;  %v4245_v20 = vmul.f32 %v3400_v41, %v7069_v23  ;;  %v4258_v49 = vmul.f32 %v3452_v18, %v6963_v45 }
 0x127   : > { %v4540_v52 = vpack.c.bf16 %v4246_v48, %v4232_v11  ;;  %v4537_v28 = vpack.c.bf16 %v4243_v56, %v4229_v55  ;;  %v4272_v19 = vmul.f32 %v3452_v18, %v6965_v42  ;;  %v4260_v21 = vmul.f32 %v3460_v16, %v7024_v30 }
 0x128   : > { %v4274_v24 = vmul.f32 %v3460_v16, %v7026_v0  ;;  %4653 = vmatprep.subr.bf16.mxu0 %v4538_v9  ;;  %v4539_v25 = vpack.c.bf16 %v4245_v20, %v4231_v38  ;;  %v3448_v22 = vrot.slane %v7362_v54, %v6516_v8  ;;  %v3456_v12 = vrot.slane %v7362_v54, %v6630_v34 }
 0x129   : > { %4696 = vmatprep.subr.bf16.mxu1 %v4540_v52  ;;  %4654 = vmatpush1.bf16.msra.mxu0 %v4537_v28  ;;  %v4552_v44 = vpack.c.bf16 %v4272_v19, %v4258_v49  ;;  %v3508_v36 = vrot.slane %v7364_v6, %v6535_v15  ;;  %v3516_v41 = vrot.slane %v7364_v6, %v6627_v33  ;;  %v7451_v56 = vsel %vm903_vm13, %v890_v58, 15 }
 0x12a   : > { %v4554_v5 = vpack.c.bf16 %v4274_v24, %v4260_v21  ;;  %4697 = vmatpush1.bf16.msra.mxu1 %v4539_v25  ;;  %v4257_v18 = vmul.f32 %v3448_v22, %v7035_v60  ;;  %v4271_v16 = vmul.f32 %v3448_v22, %v7037_v46  ;;  %v4259_v61 = vmul.f32 %v3456_v12, %v7067_v26 }
 0x12b   : > { %v4273_v62 = vmul.f32 %v3456_v12, %v7069_v23  ;;  %4655 = vmatprep.subr.bf16.mxu0 %v4552_v44  ;;  %v4286_v11 = vmul.f32 %v3508_v36, %v6963_v45  ;;  %v4300_v48 = vmul.f32 %v3508_v36, %v6965_v42  ;;  %v4288_v55 = vmul.f32 %v3516_v41, %v7024_v30 }
 0x12c   : > { %4698 = vmatprep.subr.bf16.mxu1 %v4554_v5  ;;  %v4551_v38 = vpack.c.bf16 %v4271_v16, %v4257_v18  ;;  %v4302_v52 = vmul.f32 %v3516_v41, %v7026_v0  ;;  %v3504_v20 = vrot.slane %v7364_v6, %v6516_v8  ;;  %v3512_v28 = vrot.slane %v7364_v6, %v6630_v34 }
 0x12d   : > { %v4553_v9 = vpack.c.bf16 %v4273_v62, %v4259_v61  ;;  %v4566_v49 = vpack.c.bf16 %v4300_v48, %v4286_v11  ;;  %v3564_v19 = vrot.slane %v7366_v1, %v6535_v15  ;;  %v3572_v21 = vrot.slane %v7366_v1, %v6627_v33 }
 0x12e   : > { %4656 = vmatpush1.bf16.msra.mxu0 %v4551_v38  ;;  %v4568_v58 = vpack.c.bf16 %v4302_v52, %v4288_v55  ;;  %v4285_v24 = vmul.f32 %v3504_v20, %v7035_v60  ;;  %v4299_v25 = vmul.f32 %v3504_v20, %v7037_v46  ;;  %v914_v22 = vadd.s32 1, %v7143_v39 }
 0x12f   : > { %4699 = vmatpush1.bf16.msra.mxu1 %v4553_v9  ;;  %4657 = vmatprep.subr.bf16.mxu0 %v4566_v49  ;;  %v4287_v12 = vmul.f32 %v3512_v28, %v7067_v26  ;;  %v4301_v44 = vmul.f32 %v3512_v28, %v7069_v23  ;;  %v4314_v5 = vmul.f32 %v3564_v19, %v6963_v45 }
 0x130   : > { %v4328_v36 = vmul.f32 %v3564_v19, %v6965_v42  ;;  %4700 = vmatprep.subr.bf16.mxu1 %v4568_v58  ;;  %v4565_v41 = vpack.c.bf16 %v4299_v25, %v4285_v24  ;;  %v4316_v18 = vmul.f32 %v3572_v21, %v7024_v30  ;;  %v4330_v16 = vmul.f32 %v3572_v21, %v7026_v0 }
 0x131   : > { %v3560_v61 = vrot.slane %v7366_v1, %v6516_v8  ;;  %v4567_v62 = vpack.c.bf16 %v4301_v44, %v4287_v12  ;;  %v3568_v11 = vrot.slane %v7366_v1, %v6630_v34  ;;  %v3620_v48 = vrot.slane %v7368_v29, %v6535_v15 }
 0x132   : > { %v4580_v39 = vpack.c.bf16 %v4328_v36, %v4314_v5  ;;  %4658 = vmatpush1.bf16.msra.mxu0 %v4565_v41  ;;  %v4582_v55 = vpack.c.bf16 %v4330_v16, %v4316_v18  ;;  %v3628_v52 = vrot.slane %v7368_v29, %v6627_v33  ;;  %vm924_vm14 = vcmp.gt.s32.totalorder %v914_v22, 0 }
 0x133   : > { %v4313_v38 = vmul.f32 %v3560_v61, %v7035_v60  ;;  %v4327_v9 = vmul.f32 %v3560_v61, %v7037_v46  ;;  %4701 = vmatpush1.bf16.msra.mxu1 %v4567_v62  ;;  %v4315_v20 = vmul.f32 %v3568_v11, %v7067_v26  ;;  %v4329_v49 = vmul.f32 %v3568_v11, %v7069_v23 }
 0x134   : > { %4659 = vmatprep.subr.bf16.mxu0 %v4580_v39  ;;  %v4342_v28 = vmul.f32 %v3620_v48, %v6963_v45  ;;  %4702 = vmatprep.subr.bf16.mxu1 %v4582_v55  ;;  %v4356_v21 = vmul.f32 %v3620_v48, %v6965_v42  ;;  %v4344_v58 = vmul.f32 %v3628_v52, %v7024_v30 }
 0x135   : > { %v4579_v19 = vpack.c.bf16 %v4327_v9, %v4313_v38  ;;  %v4358_v24 = vmul.f32 %v3628_v52, %v7026_v0  ;;  %v4581_v25 = vpack.c.bf16 %v4329_v49, %v4315_v20  ;;  %v3616_v12 = vrot.slane %v7368_v29, %v6516_v8 }
 0x136   : > { %v3624_v44 = vrot.slane %v7368_v29, %v6630_v34  ;;  %v3676_v5 = vrot.slane %v7370_v2, %v6535_v15  ;;  %v4594_v36 = vpack.c.bf16 %v4356_v21, %v4342_v28  ;;  %v3684_v18 = vrot.slane %v7370_v2, %v6627_v33 }
 0x137   : > { %4660 = vmatpush1.bf16.msra.mxu0 %v4579_v19  ;;  %v4596_v41 = vpack.c.bf16 %v4358_v24, %v4344_v58  ;;  %v3672_v16 = vrot.slane %v7370_v2, %v6516_v8  ;;  %4703 = vmatpush1.bf16.msra.mxu1 %v4581_v25  ;;  %v4341_v61 = vmul.f32 %v3616_v12, %v7035_v60  ;;  %v925_v9 = vsel %vm924_vm14, %v914_v22, 0 }
 0x138   : > { %v4355_v62 = vmul.f32 %v3616_v12, %v7037_v46  ;;  %v4343_v39 = vmul.f32 %v3624_v44, %v7067_v26  ;;  %v4357_v11 = vmul.f32 %v3624_v44, %v7069_v23  ;;  %4661 = vmatprep.subr.bf16.mxu0 %v4594_v36  ;;  %v4370_v48 = vmul.f32 %v3676_v5, %v6963_v45 }
 0x139   : > { %4704 = vmatprep.subr.bf16.mxu1 %v4596_v41  ;;  %v4384_v55 = vmul.f32 %v3676_v5, %v6965_v42  ;;  %v4372_v38 = vmul.f32 %v3684_v18, %v7024_v30  ;;  %v4386_v49 = vmul.f32 %v3684_v18, %v7026_v0  ;;  %v4369_v28 = vmul.f32 %v3672_v16, %v7035_v60 }
 0x13a   : > { %v4593_v52 = vpack.c.bf16 %v4355_v62, %v4341_v61  ;;  %v4595_v20 = vpack.c.bf16 %v4357_v11, %v4343_v39  ;;  %v4383_v21 = vmul.f32 %v3672_v16, %v7037_v46  ;;  %v3680_v58 = vrot.slane %v7370_v2, %v6630_v34 }
 0x13b   : > { %v4608_v19 = vpack.c.bf16 %v4384_v55, %v4370_v48  ;;  %v1735_v45 = vrot.slane %v1679_v50, %v6516_v8  ;;  %v4610_v42 = vpack.c.bf16 %v4386_v49, %v4372_v38  ;;  %v1833_v30 = vrot.slane %v1798_v57, %v9552_v32  ;;  %v7569_v48 = vld [vmem:[%s6485_s28 + $0x4] ss:$8 sps:$4 sm:$0xff]  }
 0x13c   : > { %4662 = vmatpush1.bf16.msra.mxu0 %v4593_v52  ;;  %4705 = vmatpush1.bf16.msra.mxu1 %v4595_v20  ;;  %v2043_v0 = vrot.slane %v1987_v40, %v6516_v8  ;;  %vm938_vm15 = vcmp.lt.s32.totalorder %v925_v9, 15  ;;  %v4607_v60 = vpack.c.bf16 %v4383_v21, %v4369_v28  ;;  %v4371_v46 = vmul.f32 %v3680_v58, %v7067_v26  ;;  %v7529_v40 = vld [vmem:[%s6485_s28] ss:$8 sps:$4 sm:$0xff]  }
 0x13d   : > { %4663 = vmatprep.subr.bf16.mxu0 %v4608_v19  ;;  %v4385_v50 = vmul.f32 %v3680_v58, %v7069_v23  ;;  %vm1773_vm0 = vcmp.eq.s32.totalorder %v6499_v3, %v1735_v45  ;;  %4706 = vmatprep.subr.bf16.mxu1 %v4610_v42  ;;  %vm1787_vm1 = vcmp.eq.s32.totalorder %v6513_v7, %v1735_v45  ;;  %v9555_v26 = vld [vmem:[#allocation44_spill] sm:$0xff]  ;;  %v9556_v58 = vld [vmem:[#allocation25_spill] sm:$0xff] }
 0x13e   : > { %v1903_v22 = vrot.slane %v1833_v30, %v6516_v8  ;;  %vm2081_vm2 = vcmp.eq.s32.totalorder %v6499_v3, %v2043_v0  ;;  %vm2095_vm3 = vcmp.eq.s32.totalorder %v6513_v7, %v2043_v0  ;;  %v2134_v25 = vrot.slane %v9553_v51, %v9552_v32 }
 0x13f   : > { %v4609_v24 = vpack.c.bf16 %v4385_v50, %v4371_v46  ;;  %v2852_v23 = vrot.slane %v9555_v26, %v7403_v53  ;;  %v1731_v12 = vrot.slane %v1675_v59, %v6516_v8  ;;  %v1829_v36 = vrot.slane %v1798_v57, %v6516_v8 }
 0x140   : > { %4664 = vmatpush1.bf16.msra.mxu0 %v4607_v60  ;;  %v1941_v44 = vsel %vm1773_vm0, %v1903_v22, 0.0  ;;  %v1955_v5 = vsel %vm1787_vm1, %v1903_v22, 0.0  ;;  %v2039_v41 = vrot.slane %v1983_v31, %v6516_v8  ;;  %v2204_v18 = vrot.slane %v2134_v25, %v6516_v8 }
 0x141   : > { %4707 = vmatpush1.bf16.msra.mxu1 %v4609_v24  ;;  %vm1772_vm4 = vcmp.eq.s32.totalorder %v6499_v3, %v1731_v12  ;;  %vm1786_vm5 = vcmp.eq.s32.totalorder %v6513_v7, %v1731_v12  ;;  %v2130_v35 = vrot.slane %v9553_v51, %v6516_v8  ;;  %v1899_v59 = vrot.slane %v1829_v36, %v6516_v8 }
 0x142   : > { %vm2080_vm6 = vcmp.eq.s32.totalorder %v6499_v3, %v2039_v41  ;;  %vm2094_vm7 = vcmp.eq.s32.totalorder %v6513_v7, %v2039_v41  ;;  %v2848_v37 = vrot.slane %v9555_v26, %v9552_v32  ;;  %v2242_v57 = vsel %vm2081_vm2, %v2204_v18, 0.0 }
 0x143   : > { %4666 = vmatmul.mubr.bf16.vlgmr.msra.gmra.mrb[0].mxu0 %v7529_v40  ;;  %v2256_v31 = vsel %vm2095_vm3, %v2204_v18, 0.0  ;;  %v2200_v16 = vrot.slane %v2130_v35, %v6516_v8  ;;  %v939_v51 = vsel %vm938_vm15, %v925_v9, 15  ;;  %v7564_v61 = vadd.f32 %v2242_v57, %v1941_v44 }
 0x144   : > { %4709 = vmatmul.mubr.bf16.vlgmr.msra.gmra.mrb[0].mxu1 %v7529_v40  ;;  %v7566_v62 = vadd.f32 %v2256_v31, %v1955_v5  ;;  %v1940_v39 = vsel %vm1772_vm4, %v1899_v59, 0.0  ;;  %v1954_v11 = vsel %vm1786_vm5, %v1899_v59, 0.0  ;;  %4751 = vmatprep.mubr.bf16.mxu0 %v7569_v48  ;;  %v1683_v52 = vrot.slane %v7451_v56, %v6516_v8 }
 0x145   : > { %v2241_v55 = vsel %vm2080_vm6, %v2200_v16, 0.0  ;;  %v2255_v38 = vsel %vm2094_vm7, %v2200_v16, 0.0  ;;  %v1687_v9 = vrot.slane %v7451_v56, %v9552_v32  ;;  %4794 = vmatprep.mubr.bf16.mxu1 %v7569_v48  ;;  %v3954_v20 = vmul.f32 %v2852_v23, %v7564_v61 }
 0x146   : > { %v3968_v49 = vmul.f32 %v2852_v23, %v7566_v62  ;;  %v7579_v28 = vadd.f32 %v2241_v55, %v1940_v39  ;;  %v7581_v19 = vadd.f32 %v2255_v38, %v1954_v11  ;;  %v1799_v45 = vsub.f32 1.0, %v9556_v58  ;;  %v9557_v38 = vld [vmem:[#allocation46_spill] sm:$0xff] }
 0x147   : > { %v1743_v21 = vrot.slane %v1687_v9, %v6516_v8  ;;  %v1991_v42 = vrot.slane %v939_v51, %v6516_v8  ;;  %v1995_v30 = vrot.slane %v939_v51, %v9552_v32  ;;  %v2142_v46 = vrot.slane %v9556_v58, %v9552_v32 }
 0x148   : > { %v4402_v0 = vpack.c.bf16 %v3968_v49, %v3954_v20  ;;  %v3953_v56 = vmul.f32 %v2848_v37, %v7579_v28  ;;  %v3967_v60 = vmul.f32 %v2848_v37, %v7581_v19  ;;  %v1841_v50 = vrot.slane %v1799_v45, %v9552_v32 }
 0x149   : > { %vm1775_vm8 = vcmp.eq.s32.totalorder %v6499_v3, %v1743_v21  ;;  %vm1789_vm9 = vcmp.eq.s32.totalorder %v6513_v7, %v1743_v21  ;;  %v2051_v22 = vrot.slane %v1995_v30, %v6516_v8  ;;  %v2212_v25 = vrot.slane %v2142_v46, %v6516_v8 }
 0x14a   : > { %4719 = vmatprep.subr.bf16.mxu0 %v4402_v0  ;;  %v4401_v24 = vpack.c.bf16 %v3967_v60, %v3953_v56  ;;  %v7597_v23 = vsub.s32 7, %v6499_v3  ;;  %v1739_v12 = vrot.slane %v1683_v52, %v6516_v8  ;;  %v1911_v44 = vrot.slane %v1841_v50, %v6516_v8 }
 0x14b   : > { %vm2083_vm10 = vcmp.eq.s32.totalorder %v6499_v3, %v2051_v22  ;;  %vm2097_vm11 = vcmp.eq.s32.totalorder %v6513_v7, %v2051_v22  ;;  %v1837_v5 = vrot.slane %v1799_v45, %v6516_v8  ;;  %v2047_v16 = vrot.slane %v1991_v42, %v6516_v8  ;;  %v9558_v22 = vld [vmem:[#allocation45_spill] sm:$0xff] }
 0x14c   : > { %4720 = vmatpush1.bf16.msra.mxu0 %v4401_v24  ;;  %v2244_v36 = vsel %vm2083_vm10, %v2212_v25, 0.0  ;;  %v2258_v41 = vsel %vm2097_vm11, %v2212_v25, 0.0  ;;  %v2860_v18 = vrot.slane %v9555_v26, %v7597_v23  ;;  %vm1774_vm12 = vcmp.eq.s32.totalorder %v6499_v3, %v1739_v12 }
 0x14d   : > { %v1943_v35 = vsel %vm1775_vm8, %v1911_v44, 0.0  ;;  %v1957_v59 = vsel %vm1789_vm9, %v1911_v44, 0.0  ;;  %vm1788_vm13 = vcmp.eq.s32.totalorder %v6513_v7, %v1739_v12  ;;  %v1907_v37 = vrot.slane %v1837_v5, %v6516_v8 }
 0x14e   : > { %v7613_v57 = vadd.f32 %v2244_v36, %v1943_v35  ;;  %v7615_v31 = vadd.f32 %v2258_v41, %v1957_v59  ;;  %v2138_v51 = vrot.slane %v9556_v58, %v6516_v8  ;;  %v7621_v55 = vsub.s32 6, %v6499_v3 }
 0x14f   : > { %v1942_v39 = vsel %vm1774_vm12, %v1907_v37, 0.0  ;;  %v1956_v11 = vsel %vm1788_vm13, %v1907_v37, 0.0  ;;  %v2908_v52 = vrot.slane %v9557_v38, %v7403_v53  ;;  %vm2082_vm14 = vcmp.eq.s32.totalorder %v6499_v3, %v2047_v16 }
 0x150   : > { %v3956_v9 = vmul.f32 %v2860_v18, %v7613_v57  ;;  %v3970_v20 = vmul.f32 %v2860_v18, %v7615_v31  ;;  %vm2096_vm15 = vcmp.eq.s32.totalorder %v6513_v7, %v2047_v16  ;;  %v2208_v49 = vrot.slane %v2138_v51, %v6516_v8 }
 0x151   : > { %v2856_v21 = vrot.slane %v9555_v26, %v7621_v55  ;;  %v3982_v58 = vmul.f32 %v2908_v52, %v7564_v61  ;;  %v3996_v45 = vmul.f32 %v2908_v52, %v7566_v62  ;;  %v2904_v30 = vrot.slane %v9557_v38, %v9552_v32 }
 0x152   : > { %v4404_v42 = vpack.c.bf16 %v3970_v20, %v3956_v9  ;;  %v2916_v0 = vrot.slane %v9557_v38, %v7597_v23  ;;  %v2912_v56 = vrot.slane %v9557_v38, %v7621_v55  ;;  %v2243_v60 = vsel %vm2082_vm14, %v2208_v49, 0.0 }
 0x153   : > { %v2257_v46 = vsel %vm2096_vm15, %v2208_v49, 0.0  ;;  %v4416_v50 = vpack.c.bf16 %v3996_v45, %v3982_v58  ;;  %v2964_v26 = vrot.slane %v9558_v22, %v7403_v53  ;;  %v7642_v24 = vadd.f32 %v2243_v60, %v1942_v39 }
 0x154   : > { %4762 = vmatprep.subr.bf16.mxu1 %v4404_v42  ;;  %v7644_v25 = vadd.f32 %v2257_v46, %v1956_v11  ;;  %v3981_v12 = vmul.f32 %v2904_v30, %v7579_v28  ;;  %v3995_v44 = vmul.f32 %v2904_v30, %v7581_v19  ;;  %v3984_v5 = vmul.f32 %v2916_v0, %v7613_v57 }
 0x155   : > { %4721 = vmatprep.subr.bf16.mxu0 %v4416_v50  ;;  %v3998_v36 = vmul.f32 %v2916_v0, %v7615_v31  ;;  %v4010_v41 = vmul.f32 %v2964_v26, %v7564_v61  ;;  %v4024_v18 = vmul.f32 %v2964_v26, %v7566_v62  ;;  %v3955_v35 = vmul.f32 %v2856_v21, %v7642_v24 }
 0x156   : > { %v3969_v59 = vmul.f32 %v2856_v21, %v7644_v25  ;;  %v4415_v37 = vpack.c.bf16 %v3995_v44, %v3981_v12  ;;  %v3983_v16 = vmul.f32 %v2912_v56, %v7642_v24  ;;  %v3997_v39 = vmul.f32 %v2912_v56, %v7644_v25 }
 0x157   : > { %v4418_v51 = vpack.c.bf16 %v3998_v36, %v3984_v5  ;;  %v4430_v11 = vpack.c.bf16 %v4024_v18, %v4010_v41  ;;  %v2960_v38 = vrot.slane %v9558_v22, %v9552_v32  ;;  %v2972_v9 = vrot.slane %v9558_v22, %v7597_v23 }
 0x158   : > { %v4403_v52 = vpack.c.bf16 %v3969_v59, %v3955_v35  ;;  %4722 = vmatpush1.bf16.msra.mxu0 %v4415_v37  ;;  %v2968_v20 = vrot.slane %v9558_v22, %v7621_v55  ;;  %v3020_v49 = vrot.slane %v7085_v13, %v7403_v53  ;;  %v4417_v21 = vpack.c.bf16 %v3997_v39, %v3983_v16 }
 0x159   : > { %4723 = vmatprep.subr.bf16.mxu0 %v4430_v11  ;;  %v4009_v58 = vmul.f32 %v2960_v38, %v7579_v28  ;;  %v4023_v45 = vmul.f32 %v2960_v38, %v7581_v19  ;;  %v3016_v42 = vrot.slane %v7085_v13, %v9552_v32  ;;  %v4012_v30 = vmul.f32 %v2972_v9, %v7613_v57 }
 0x15a   : > { %4763 = vmatpush1.bf16.msra.mxu1 %v4403_v52  ;;  %v4026_v0 = vmul.f32 %v2972_v9, %v7615_v31  ;;  %v4011_v56 = vmul.f32 %v2968_v20, %v7642_v24  ;;  %v4025_v60 = vmul.f32 %v2968_v20, %v7644_v25  ;;  %v4038_v50 = vmul.f32 %v3020_v49, %v7564_v61 }
 0x15b   : > { %4764 = vmatprep.subr.bf16.mxu1 %v4418_v51  ;;  %v4429_v46 = vpack.c.bf16 %v4023_v45, %v4009_v58  ;;  %v4052_v22 = vmul.f32 %v3020_v49, %v7566_v62  ;;  %v4037_v26 = vmul.f32 %v3016_v42, %v7579_v28  ;;  %v4051_v5 = vmul.f32 %v3016_v42, %v7581_v19 }
 0x15c   : > { %v4432_v12 = vpack.c.bf16 %v4026_v0, %v4012_v30  ;;  %v4431_v44 = vpack.c.bf16 %v4025_v60, %v4011_v56  ;;  %v3028_v36 = vrot.slane %v7085_v13, %v7597_v23  ;;  %v3024_v18 = vrot.slane %v7085_v13, %v7621_v55 }
 0x15d   : > { %4724 = vmatpush1.bf16.msra.mxu0 %v4429_v46  ;;  %v4444_v41 = vpack.c.bf16 %v4052_v22, %v4038_v50  ;;  %v3076_v35 = vrot.slane %v7192_v27, %v7403_v53  ;;  %v3072_v59 = vrot.slane %v7192_v27, %v9552_v32  ;;  %v4443_v37 = vpack.c.bf16 %v4051_v5, %v4037_v26 }
 0x15e   : > { %4765 = vmatpush1.bf16.msra.mxu1 %v4417_v21  ;;  %v4040_v16 = vmul.f32 %v3028_v36, %v7613_v57  ;;  %v4054_v51 = vmul.f32 %v3028_v36, %v7615_v31  ;;  %v3084_v39 = vrot.slane %v7192_v27, %v7597_v23  ;;  %v4039_v11 = vmul.f32 %v3024_v18, %v7642_v24 }
 0x15f   : > { %4766 = vmatprep.subr.bf16.mxu1 %v4432_v12  ;;  %4725 = vmatprep.subr.bf16.mxu0 %v4444_v41  ;;  %v4053_v13 = vmul.f32 %v3024_v18, %v7644_v25  ;;  %v4066_v38 = vmul.f32 %v3076_v35, %v7564_v61  ;;  %v4080_v9 = vmul.f32 %v3076_v35, %v7566_v62 }
 0x160   : > { %v4446_v52 = vpack.c.bf16 %v4054_v51, %v4040_v16  ;;  %v4065_v20 = vmul.f32 %v3072_v59, %v7579_v28  ;;  %v4079_v49 = vmul.f32 %v3072_v59, %v7581_v19  ;;  %v4068_v58 = vmul.f32 %v3084_v39, %v7613_v57 }
 0x161   : > { %4726 = vmatpush1.bf16.msra.mxu0 %v4443_v37  ;;  %v4445_v21 = vpack.c.bf16 %v4053_v13, %v4039_v11  ;;  %v4082_v45 = vmul.f32 %v3084_v39, %v7615_v31  ;;  %v3080_v42 = vrot.slane %v7192_v27, %v7621_v55  ;;  %v4458_v30 = vpack.c.bf16 %v4080_v9, %v4066_v38 }
 0x162   : > { %4767 = vmatpush1.bf16.msra.mxu1 %v4431_v44  ;;  %v4457_v0 = vpack.c.bf16 %v4079_v49, %v4065_v20  ;;  %v3132_v56 = vrot.slane %v7194_v63, %v7403_v53  ;;  %v3128_v60 = vrot.slane %v7194_v63, %v9552_v32  ;;  %v3140_v26 = vrot.slane %v7194_v63, %v7597_v23 }
 0x163   : > { %4768 = vmatprep.subr.bf16.mxu1 %v4446_v52  ;;  %v4460_v46 = vpack.c.bf16 %v4082_v45, %v4068_v58  ;;  %v4067_v50 = vmul.f32 %v3080_v42, %v7642_v24  ;;  %v4081_v22 = vmul.f32 %v3080_v42, %v7644_v25  ;;  %4727 = vmatprep.subr.bf16.mxu0 %v4458_v30 }
 0x164   : > { %v4094_v27 = vmul.f32 %v3132_v56, %v7564_v61  ;;  %v4108_v12 = vmul.f32 %v3132_v56, %v7566_v62  ;;  %v4093_v44 = vmul.f32 %v3128_v60, %v7579_v28  ;;  %v4107_v5 = vmul.f32 %v3128_v60, %v7581_v19 }
 0x165   : > { %4728 = vmatpush1.bf16.msra.mxu0 %v4457_v0  ;;  %v4459_v36 = vpack.c.bf16 %v4081_v22, %v4067_v50  ;;  %v4096_v41 = vmul.f32 %v3140_v26, %v7613_v57  ;;  %v4110_v18 = vmul.f32 %v3140_v26, %v7615_v31  ;;  %v3136_v35 = vrot.slane %v7194_v63, %v7621_v55 }
 0x166   : > { %4769 = vmatpush1.bf16.msra.mxu1 %v4445_v21  ;;  %v4472_v59 = vpack.c.bf16 %v4108_v12, %v4094_v27  ;;  %v4471_v37 = vpack.c.bf16 %v4107_v5, %v4093_v44  ;;  %v3188_v16 = vrot.slane %v7196_v43, %v7403_v53  ;;  %v3184_v51 = vrot.slane %v7196_v43, %v9552_v32 }
 0x167   : > { %4770 = vmatprep.subr.bf16.mxu1 %v4460_v46  ;;  %v4474_v39 = vpack.c.bf16 %v4110_v18, %v4096_v41  ;;  %v4095_v11 = vmul.f32 %v3136_v35, %v7642_v24  ;;  %v4109_v13 = vmul.f32 %v3136_v35, %v7644_v25  ;;  %v3196_v38 = vrot.slane %v7196_v43, %v7597_v23 }
 0x168   : > { %4729 = vmatprep.subr.bf16.mxu0 %v4472_v59  ;;  %v4122_v63 = vmul.f32 %v3188_v16, %v7564_v61  ;;  %v4136_v52 = vmul.f32 %v3188_v16, %v7566_v62  ;;  %v4121_v9 = vmul.f32 %v3184_v51, %v7579_v28  ;;  %v4135_v20 = vmul.f32 %v3184_v51, %v7581_v19 }
 0x169   : > { %4730 = vmatpush1.bf16.msra.mxu0 %v4471_v37  ;;  %v4473_v49 = vpack.c.bf16 %v4109_v13, %v4095_v11  ;;  %v4124_v21 = vmul.f32 %v3196_v38, %v7613_v57  ;;  %v4138_v58 = vmul.f32 %v3196_v38, %v7615_v31  ;;  %v3192_v45 = vrot.slane %v7196_v43, %v7621_v55 }
 0x16a   : > { %4771 = vmatpush1.bf16.msra.mxu1 %v4459_v36  ;;  %v4486_v42 = vpack.c.bf16 %v4136_v52, %v4122_v63  ;;  %v4485_v30 = vpack.c.bf16 %v4135_v20, %v4121_v9  ;;  %v3244_v0 = vrot.slane %v7201_v17, %v7403_v53  ;;  %v3240_v56 = vrot.slane %v7201_v17, %v9552_v32 }
 0x16b   : > { %4772 = vmatprep.subr.bf16.mxu1 %v4474_v39  ;;  %v4488_v60 = vpack.c.bf16 %v4138_v58, %v4124_v21  ;;  %v4123_v46 = vmul.f32 %v3192_v45, %v7642_v24  ;;  %v4137_v50 = vmul.f32 %v3192_v45, %v7644_v25  ;;  %v3252_v22 = vrot.slane %v7201_v17, %v7597_v23 }
 0x16c   : > { %4731 = vmatprep.subr.bf16.mxu0 %v4486_v42  ;;  %v4150_v43 = vmul.f32 %v3244_v0, %v7564_v61  ;;  %v4164_v26 = vmul.f32 %v3244_v0, %v7566_v62  ;;  %v4149_v27 = vmul.f32 %v3240_v56, %v7579_v28  ;;  %v4163_v12 = vmul.f32 %v3240_v56, %v7581_v19 }
 0x16d   : > { %4732 = vmatpush1.bf16.msra.mxu0 %v4485_v30  ;;  %v4487_v44 = vpack.c.bf16 %v4137_v50, %v4123_v46  ;;  %v4152_v5 = vmul.f32 %v3252_v22, %v7613_v57  ;;  %v4166_v36 = vmul.f32 %v3252_v22, %v7615_v31  ;;  %v3248_v41 = vrot.slane %v7201_v17, %v7621_v55 }
 0x16e   : > { %4773 = vmatpush1.bf16.msra.mxu1 %v4473_v49  ;;  %v4500_v18 = vpack.c.bf16 %v4164_v26, %v4150_v43  ;;  %v4499_v35 = vpack.c.bf16 %v4163_v12, %v4149_v27  ;;  %v3300_v59 = vrot.slane %v7356_v10, %v7403_v53  ;;  %v3296_v37 = vrot.slane %v7356_v10, %v9552_v32 }
 0x16f   : > { %4774 = vmatprep.subr.bf16.mxu1 %v4488_v60  ;;  %v4502_v16 = vpack.c.bf16 %v4166_v36, %v4152_v5  ;;  %v4151_v51 = vmul.f32 %v3248_v41, %v7642_v24  ;;  %v4165_v39 = vmul.f32 %v3248_v41, %v7644_v25  ;;  %v3308_v11 = vrot.slane %v7356_v10, %v7597_v23 }
 0x170   : > { %4733 = vmatprep.subr.bf16.mxu0 %v4500_v18  ;;  %v4178_v17 = vmul.f32 %v3300_v59, %v7564_v61  ;;  %v4192_v13 = vmul.f32 %v3300_v59, %v7566_v62  ;;  %v4177_v38 = vmul.f32 %v3296_v37, %v7579_v28  ;;  %v4191_v63 = vmul.f32 %v3296_v37, %v7581_v19 }
 0x171   : > { %4734 = vmatpush1.bf16.msra.mxu0 %v4499_v35  ;;  %v4501_v52 = vpack.c.bf16 %v4165_v39, %v4151_v51  ;;  %v4180_v9 = vmul.f32 %v3308_v11, %v7613_v57  ;;  %v4194_v20 = vmul.f32 %v3308_v11, %v7615_v31  ;;  %v3304_v49 = vrot.slane %v7356_v10, %v7621_v55 }
 0x172   : > { %4775 = vmatpush1.bf16.msra.mxu1 %v4487_v44  ;;  %v4514_v21 = vpack.c.bf16 %v4192_v13, %v4178_v17  ;;  %v4513_v58 = vpack.c.bf16 %v4191_v63, %v4177_v38  ;;  %v3356_v45 = vrot.slane %v7358_v47, %v7403_v53  ;;  %v3352_v42 = vrot.slane %v7358_v47, %v9552_v32 }
 0x173   : > { %4776 = vmatprep.subr.bf16.mxu1 %v4502_v16  ;;  %v4516_v30 = vpack.c.bf16 %v4194_v20, %v4180_v9  ;;  %v4179_v0 = vmul.f32 %v3304_v49, %v7642_v24  ;;  %v4193_v56 = vmul.f32 %v3304_v49, %v7644_v25  ;;  %v3364_v60 = vrot.slane %v7358_v47, %v7597_v23 }
 0x174   : > { %4735 = vmatprep.subr.bf16.mxu0 %v4514_v21  ;;  %v4206_v10 = vmul.f32 %v3356_v45, %v7564_v61  ;;  %v4220_v46 = vmul.f32 %v3356_v45, %v7566_v62  ;;  %v4205_v50 = vmul.f32 %v3352_v42, %v7579_v28  ;;  %v4219_v22 = vmul.f32 %v3352_v42, %v7581_v19 }
 0x175   : > { %4736 = vmatpush1.bf16.msra.mxu0 %v4513_v58  ;;  %v4515_v43 = vpack.c.bf16 %v4193_v56, %v4179_v0  ;;  %v4208_v26 = vmul.f32 %v3364_v60, %v7613_v57  ;;  %v4222_v27 = vmul.f32 %v3364_v60, %v7615_v31  ;;  %v3360_v12 = vrot.slane %v7358_v47, %v7621_v55 }
 0x176   : > { %4777 = vmatpush1.bf16.msra.mxu1 %v4501_v52  ;;  %v4528_v44 = vpack.c.bf16 %v4220_v46, %v4206_v10  ;;  %v4527_v5 = vpack.c.bf16 %v4219_v22, %v4205_v50  ;;  %v3412_v36 = vrot.slane %v7360_v4, %v7403_v53  ;;  %v3408_v41 = vrot.slane %v7360_v4, %v9552_v32 }
 0x177   : > { %4778 = vmatprep.subr.bf16.mxu1 %v4516_v30  ;;  %v4530_v18 = vpack.c.bf16 %v4222_v27, %v4208_v26  ;;  %v4207_v35 = vmul.f32 %v3360_v12, %v7642_v24  ;;  %v4221_v59 = vmul.f32 %v3360_v12, %v7644_v25  ;;  %v3420_v37 = vrot.slane %v7360_v4, %v7597_v23 }
 0x178   : > { %4737 = vmatprep.subr.bf16.mxu0 %v4528_v44  ;;  %v4234_v47 = vmul.f32 %v3412_v36, %v7564_v61  ;;  %v4248_v16 = vmul.f32 %v3412_v36, %v7566_v62  ;;  %v4233_v51 = vmul.f32 %v3408_v41, %v7579_v28  ;;  %v4247_v39 = vmul.f32 %v3408_v41, %v7581_v19 }
 0x179   : > { %4738 = vmatpush1.bf16.msra.mxu0 %v4527_v5  ;;  %v4529_v11 = vpack.c.bf16 %v4221_v59, %v4207_v35  ;;  %v4236_v17 = vmul.f32 %v3420_v37, %v7613_v57  ;;  %v4250_v13 = vmul.f32 %v3420_v37, %v7615_v31  ;;  %v3416_v38 = vrot.slane %v7360_v4, %v7621_v55 }
 0x17a   : > { %4779 = vmatpush1.bf16.msra.mxu1 %v4515_v43  ;;  %v4542_v63 = vpack.c.bf16 %v4248_v16, %v4234_v47  ;;  %v4541_v52 = vpack.c.bf16 %v4247_v39, %v4233_v51  ;;  %v3468_v9 = vrot.slane %v7362_v54, %v7403_v53  ;;  %v3464_v20 = vrot.slane %v7362_v54, %v9552_v32 }
 0x17b   : > { %4780 = vmatprep.subr.bf16.mxu1 %v4530_v18  ;;  %v4544_v49 = vpack.c.bf16 %v4250_v13, %v4236_v17  ;;  %v4235_v21 = vmul.f32 %v3416_v38, %v7642_v24  ;;  %v4249_v58 = vmul.f32 %v3416_v38, %v7644_v25  ;;  %v3476_v45 = vrot.slane %v7362_v54, %v7597_v23 }
 0x17c   : > { %4739 = vmatprep.subr.bf16.mxu0 %v4542_v63  ;;  %v4262_v4 = vmul.f32 %v3468_v9, %v7564_v61  ;;  %v4276_v42 = vmul.f32 %v3468_v9, %v7566_v62  ;;  %v4261_v30 = vmul.f32 %v3464_v20, %v7579_v28  ;;  %v4275_v0 = vmul.f32 %v3464_v20, %v7581_v19 }
 0x17d   : > { %4740 = vmatpush1.bf16.msra.mxu0 %v4541_v52  ;;  %v4543_v56 = vpack.c.bf16 %v4249_v58, %v4235_v21  ;;  %v4264_v60 = vmul.f32 %v3476_v45, %v7613_v57  ;;  %v4278_v10 = vmul.f32 %v3476_v45, %v7615_v31  ;;  %v3472_v46 = vrot.slane %v7362_v54, %v7621_v55 }
 0x17e   : > { %4781 = vmatpush1.bf16.msra.mxu1 %v4529_v11  ;;  %v4556_v50 = vpack.c.bf16 %v4276_v42, %v4262_v4  ;;  %v4555_v22 = vpack.c.bf16 %v4275_v0, %v4261_v30  ;;  %v3524_v43 = vrot.slane %v7364_v6, %v7403_v53  ;;  %v3520_v26 = vrot.slane %v7364_v6, %v9552_v32 }
 0x17f   : > { %4782 = vmatprep.subr.bf16.mxu1 %v4544_v49  ;;  %v4558_v27 = vpack.c.bf16 %v4278_v10, %v4264_v60  ;;  %v4263_v12 = vmul.f32 %v3472_v46, %v7642_v24  ;;  %v4277_v44 = vmul.f32 %v3472_v46, %v7644_v25  ;;  %v3532_v5 = vrot.slane %v7364_v6, %v7597_v23 }
 0x180   : > { %4741 = vmatprep.subr.bf16.mxu0 %v4556_v50  ;;  %v4290_v54 = vmul.f32 %v3524_v43, %v7564_v61  ;;  %v4304_v36 = vmul.f32 %v3524_v43, %v7566_v62  ;;  %v4289_v41 = vmul.f32 %v3520_v26, %v7579_v28  ;;  %v4303_v18 = vmul.f32 %v3520_v26, %v7581_v19 }
 0x181   : > { %4742 = vmatpush1.bf16.msra.mxu0 %v4555_v22  ;;  %v4557_v35 = vpack.c.bf16 %v4277_v44, %v4263_v12  ;;  %v4292_v59 = vmul.f32 %v3532_v5, %v7613_v57  ;;  %v4306_v37 = vmul.f32 %v3532_v5, %v7615_v31  ;;  %v3528_v47 = vrot.slane %v7364_v6, %v7621_v55 }
 0x182   : > { %4783 = vmatpush1.bf16.msra.mxu1 %v4543_v56  ;;  %v4570_v16 = vpack.c.bf16 %v4304_v36, %v4290_v54  ;;  %v4569_v51 = vpack.c.bf16 %v4303_v18, %v4289_v41  ;;  %v3580_v39 = vrot.slane %v7366_v1, %v7403_v53  ;;  %v3576_v11 = vrot.slane %v7366_v1, %v9552_v32 }
 0x183   : > { %4784 = vmatprep.subr.bf16.mxu1 %v4558_v27  ;;  %v4572_v17 = vpack.c.bf16 %v4306_v37, %v4292_v59  ;;  %v4291_v13 = vmul.f32 %v3528_v47, %v7642_v24  ;;  %v4305_v38 = vmul.f32 %v3528_v47, %v7644_v25  ;;  %v3588_v63 = vrot.slane %v7366_v1, %v7597_v23 }
 0x184   : > { %4743 = vmatprep.subr.bf16.mxu0 %v4570_v16  ;;  %v4318_v6 = vmul.f32 %v3580_v39, %v7564_v61  ;;  %v4332_v52 = vmul.f32 %v3580_v39, %v7566_v62  ;;  %v4317_v9 = vmul.f32 %v3576_v11, %v7579_v28  ;;  %v4331_v20 = vmul.f32 %v3576_v11, %v7581_v19 }
 0x185   : > { %4744 = vmatpush1.bf16.msra.mxu0 %v4569_v51  ;;  %v4571_v49 = vpack.c.bf16 %v4305_v38, %v4291_v13  ;;  %v4320_v21 = vmul.f32 %v3588_v63, %v7613_v57  ;;  %v4334_v58 = vmul.f32 %v3588_v63, %v7615_v31  ;;  %v3584_v45 = vrot.slane %v7366_v1, %v7621_v55  ;;  %v7878_v38 = vld [vmem:[%s6477_s30 + $0x28] sm:$0xff]  ;;  %v7881_v63 = vld [vmem:[%s6477_s30 + $0x30] sm:$0xff] }
 0x186   : > { %4785 = vmatpush1.bf16.msra.mxu1 %v4557_v35  ;;  %v4584_v4 = vpack.c.bf16 %v4332_v52, %v4318_v6  ;;  %v4583_v42 = vpack.c.bf16 %v4331_v20, %v4317_v9  ;;  %v3636_v30 = vrot.slane %v7368_v29, %v7403_v53  ;;  %v3632_v0 = vrot.slane %v7368_v29, %v9552_v32  ;;  %v9560_v52 = vld [vmem:[#allocation18_spill] sm:$0xff] }
 0x187   : > { %4786 = vmatprep.subr.bf16.mxu1 %v4572_v17  ;;  %v4586_v56 = vpack.c.bf16 %v4334_v58, %v4320_v21  ;;  %v4319_v60 = vmul.f32 %v3584_v45, %v7642_v24  ;;  %v4333_v10 = vmul.f32 %v3584_v45, %v7644_v25  ;;  %v3644_v46 = vrot.slane %v7368_v29, %v7597_v23  ;;  %v9561_v21 = vld [vmem:[#allocation19_spill] sm:$0xff] }
 0x188   : > { %4745 = vmatprep.subr.bf16.mxu0 %v4584_v4  ;;  %v4346_v1 = vmul.f32 %v3636_v30, %v7564_v61  ;;  %v4360_v50 = vmul.f32 %v3636_v30, %v7566_v62  ;;  %v4345_v22 = vmul.f32 %v3632_v0, %v7579_v28  ;;  %v4359_v43 = vmul.f32 %v3632_v0, %v7581_v19  ;;  %v9562_v4 = vld [vmem:[#allocation22_spill] sm:$0xff] }
 0x189   : > { %4746 = vmatpush1.bf16.msra.mxu0 %v4583_v42  ;;  %v4585_v26 = vpack.c.bf16 %v4333_v10, %v4319_v60  ;;  %v4348_v27 = vmul.f32 %v3644_v46, %v7613_v57  ;;  %v4362_v12 = vmul.f32 %v3644_v46, %v7615_v31  ;;  %v3640_v44 = vrot.slane %v7368_v29, %v7621_v55 }
 0x18a   : > { %4787 = vmatpush1.bf16.msra.mxu1 %v4571_v49  ;;  %v4598_v5 = vpack.c.bf16 %v4360_v50, %v4346_v1  ;;  %v4597_v54 = vpack.c.bf16 %v4359_v43, %v4345_v22  ;;  %v3692_v36 = vrot.slane %v7370_v2, %v7403_v53  ;;  %v3688_v41 = vrot.slane %v7370_v2, %v9552_v32 }
 0x18b   : > { %4788 = vmatprep.subr.bf16.mxu1 %v4586_v56  ;;  %v4600_v18 = vpack.c.bf16 %v4362_v12, %v4348_v27  ;;  %v4347_v35 = vmul.f32 %v3640_v44, %v7642_v24  ;;  %v4361_v59 = vmul.f32 %v3640_v44, %v7644_v25  ;;  %v3700_v29 = vrot.slane %v7370_v2, %v7597_v23  ;;  %v7875_v23 = vld [vmem:[%s6477_s30 + $0x20] sm:$0xff] }
 0x18c   : > { %4747 = vmatprep.subr.bf16.mxu0 %v4598_v5  ;;  %v4374_v37 = vmul.f32 %v3692_v36, %v7564_v61  ;;  %v4388_v47 = vmul.f32 %v3692_v36, %v7566_v62  ;;  %v4373_v16 = vmul.f32 %v3688_v41, %v7579_v28  ;;  %v4387_v51 = vmul.f32 %v3688_v41, %v7581_v19  ;;  %v9559_v28 = vld [vmem:[#allocation15_spill] sm:$0xff]  ;;  %v9563_v5 = vld [vmem:[#allocation16_spill] sm:$0xff] }
 0x18d   : > { %4748 = vmatpush1.bf16.msra.mxu0 %v4597_v54  ;;  %v4599_v39 = vpack.c.bf16 %v4361_v59, %v4347_v35  ;;  %v4376_v11 = vmul.f32 %v3700_v29, %v7613_v57  ;;  %v4390_v17 = vmul.f32 %v3700_v29, %v7615_v31  ;;  %v3696_v13 = vrot.slane %v7370_v2, %v7621_v55  ;;  %v9564_v29 = vld [vmem:[#allocation20_spill] sm:$0xff] }
 0x18e   : > { %4789 = vmatpush1.bf16.msra.mxu1 %v4585_v26  ;;  %v4612_v61 = vpack.c.bf16 %v4388_v47, %v4374_v37  ;;  %v4611_v62 = vpack.c.bf16 %v4387_v51, %v4373_v16  ;;  %v432_v19 = vmul.f32 %v9559_v28, %v7875_v23  ;;  %v433_v57 = vmul.f32 %v9559_v28, %v7878_v38  ;;  %v9565_v51 = vld [vmem:[#allocation21_spill] sm:$0xff] }
 0x18f   : > { %4790 = vmatprep.subr.bf16.mxu1 %v4600_v18  ;;  %v4614_v31 = vpack.c.bf16 %v4390_v17, %v4376_v11  ;;  %v4375_v6 = vmul.f32 %v3696_v13, %v7642_v24  ;;  %v4389_v2 = vmul.f32 %v3696_v13, %v7644_v25  ;;  %v434_v55 = vmul.f32 %v9559_v28, %v7881_v63 }
 0x190   : > { %4749 = vmatprep.subr.bf16.mxu0 %v4612_v61  ;;  %v440_v9 = vmul.f32 %v9560_v52, %v7875_v23  ;;  %v441_v20 = vmul.f32 %v9560_v52, %v7878_v38  ;;  %v442_v49 = vmul.f32 %v9560_v52, %v7881_v63  ;;  %v483_v58 = vmul.f32 %v9561_v21, %v7875_v23 }
 0x191   : > { %4750 = vmatpush1.bf16.msra.mxu0 %v4611_v62  ;;  %v4613_v24 = vpack.c.bf16 %v4389_v2, %v4375_v6  ;;  %v484_v25 = vmul.f32 %v9561_v21, %v7878_v38  ;;  %v485_v45 = vmul.f32 %v9561_v21, %v7881_v63  ;;  %v526_v42 = vmul.f32 %v9562_v4, %v7875_v23  ;;  %v9566_v2 = vld [vmem:[#allocation23_spill] sm:$0xff] }
 0x192   : > { %4791 = vmatpush1.bf16.msra.mxu1 %v4599_v39  ;;  %v5907_v30 = vrot.slane %v440_v9, 9  ;;  %v5908_v0 = vrot.slane %v441_v20, 9  ;;  %v5909_v56 = vrot.slane %v442_v49, 9  ;;  %v5914_v60 = vrot.slane %v483_v58, 10 }
 0x193   : > { %4792 = vmatprep.subr.bf16.mxu1 %v4614_v31  ;;  %v5915_v10 = vrot.slane %v484_v25, 10  ;;  %v5916_v46 = vrot.slane %v485_v45, 10  ;;  %v527_v1 = vmul.f32 %v9562_v4, %v7878_v38  ;;  %v528_v50 = vmul.f32 %v9562_v4, %v7881_v63 }
 0x194   : > { %4752 = vmatmul.mubr.bf16.vlgmr.msra.gmra.mrb[4].mxu0 %v7529_v40  ;;  %v475_v22 = vadd.f32 %v5907_v30, %v432_v19  ;;  %v476_v43 = vadd.f32 %v5908_v0, %v433_v57  ;;  %v477_v26 = vadd.f32 %v5909_v56, %v434_v55  ;;  %v5921_v27 = vrot.slane %v526_v42, 11 }
 0x195   : > { %v5922_v12 = vrot.slane %v527_v1, 11  ;;  %v5923_v44 = vrot.slane %v528_v50, 11  ;;  %v569_v54 = vmul.f32 %v9563_v5, %v7875_v23  ;;  %v570_v36 = vmul.f32 %v9563_v5, %v7878_v38  ;;  %4837 = vmatprep.mubr.bf16.mxu0 %v7569_v48 }
 0x196   : > { %4793 = vmatpush1.bf16.msra.mxu1 %v4613_v24  ;;  %v518_v41 = vadd.f32 %v5914_v60, %v475_v22  ;;  %v519_v18 = vadd.f32 %v5915_v10, %v476_v43  ;;  %v520_v35 = vadd.f32 %v5916_v46, %v477_v26  ;;  %v571_v59 = vmul.f32 %v9563_v5, %v7881_v63 }
 0x197   : > { %v577_v37 = vmul.f32 %v9564_v29, %v7875_v23  ;;  %v578_v47 = vmul.f32 %v9564_v29, %v7878_v38  ;;  %v579_v16 = vmul.f32 %v9564_v29, %v7881_v63  ;;  %v620_v39 = vmul.f32 %v9565_v51, %v7875_v23 }
 0x198   : > { %v561_v11 = vadd.f32 %v5921_v27, %v518_v41  ;;  %v562_v17 = vadd.f32 %v5922_v12, %v519_v18  ;;  %v563_v13 = vadd.f32 %v5923_v44, %v520_v35  ;;  %v621_v61 = vmul.f32 %v9565_v51, %v7878_v38 }
 0x199   : > { %v5928_v62 = vrot.slane %v577_v37, 9  ;;  %v5929_v28 = vrot.slane %v578_v47, 9  ;;  %v5930_v19 = vrot.slane %v579_v16, 9  ;;  %v622_v57 = vmul.f32 %v9565_v51, %v7881_v63  ;;  %4795 = vmatmul.mubr.bf16.vlgmr.msra.gmra.mrb[4].mxu1 %v7529_v40 }
 0x19a   : > { %v5935_v31 = vrot.slane %v620_v39, 10  ;;  %v5936_v6 = vrot.slane %v621_v61, 10  ;;  %v663_v55 = vmul.f32 %v9566_v2, %v7875_v23  ;;  %v664_v52 = vmul.f32 %v9566_v2, %v7878_v38  ;;  %4880 = vmatprep.mubr.bf16.mxu1 %v7569_v48 }
 0x19b   : > { %v612_v9 = vadd.f32 %v5928_v62, %v569_v54  ;;  %v613_v20 = vadd.f32 %v5929_v28, %v570_v36  ;;  %v614_v49 = vadd.f32 %v5930_v19, %v571_v59  ;;  %v5937_v21 = vrot.slane %v622_v57, 10 }
 0x19c   : > { %v665_v58 = vmul.f32 %v9566_v2, %v7881_v63  ;;  %v5942_v24 = vrot.slane %v663_v55, 11  ;;  %v5943_v25 = vrot.slane %v664_v52, 11  ;;  %v726_v40 = vmul.f32 0.5, %v561_v11 }
 0x19d   : > { %v655_v45 = vadd.f32 %v5935_v31, %v612_v9  ;;  %v656_v4 = vadd.f32 %v5936_v6, %v613_v20  ;;  %v657_v42 = vadd.f32 %v5937_v21, %v614_v49  ;;  %v727_v30 = vmul.f32 0.5, %v562_v17 }
 0x19e   : > { %v5944_v23 = vrot.slane %v665_v58, 11  ;;  %v728_v0 = vmul.f32 0.5, %v563_v13  ;;  %v733_v56 = vadd.f32 0.5, %v726_v40 }
 0x19f   : > { %v698_v38 = vadd.f32 %v5942_v24, %v655_v45  ;;  %v699_v60 = vadd.f32 %v5943_v25, %v656_v4  ;;  %v734_v48 = vadd.f32 0.5, %v727_v30 }
 0x1a0   : > { %v700_v10 = vadd.f32 %v5944_v23, %v657_v42  ;;  %v735_v46 = vadd.f32 0.5, %v728_v0  ;;  %v740_v1 = vmul.f32 16.0, %v733_v56 }
 0x1a1   : > { %v741_v50 = vmul.f32 16.0, %v734_v48  ;;  %v747_v22 = vmul.f32 0.5, %v698_v38  ;;  %v748_v43 = vmul.f32 0.5, %v699_v60 }
 0x1a2   : > { %v742_v63 = vmul.f32 16.0, %v735_v46  ;;  %v749_v26 = vmul.f32 0.5, %v700_v10  ;;  %v775_v27 = vfloor.f32 %v740_v1 }
 0x1a3   : > { %v754_v12 = vadd.f32 0.5, %v747_v22  ;;  %v755_v44 = vadd.f32 0.5, %v748_v43  ;;  %v776_v5 = vfloor.f32 %v741_v50 }
 0x1a4   : > { %v756_v54 = vadd.f32 0.5, %v749_v26  ;;  %v777_v36 = vfloor.f32 %v742_v63  ;;  %v5979_v41 = vtrunc.f32 %v775_v27  ;;  %v7937_v51 = vsub.f32 %v740_v1, %v775_v27 }
 0x1a5   : > { %v761_v18 = vmul.f32 16.0, %v754_v12  ;;  %v5981_v35 = vtrunc.f32 %v776_v5  ;;  %v762_v59 = vmul.f32 16.0, %v755_v44  ;;  %v7939_v28 = vsub.f32 %v741_v50, %v776_v5 }
 0x1a6   : > { %v5980_v29 = vcvt.f32.s32 %v5979_v41  ;;  %v5983_v37 = vtrunc.f32 %v777_v36  ;;  %v763_v16 = vmul.f32 16.0, %v756_v54  ;;  %v7941_v57 = vsub.f32 %v742_v63, %v777_v36 }
 0x1a7   : > { %v5982_v47 = vcvt.f32.s32 %v5981_v35  ;;  %v782_v11 = vfloor.f32 %v761_v18  ;;  %v783_v13 = vfloor.f32 %v762_v59  ;;  %v1800_v31 = vsub.f32 1.0, %v7937_v51 }
 0x1a8   : > { %v5984_v39 = vcvt.f32.s32 %v5983_v37  ;;  %vm891_vm0 = vcmp.gt.s32.totalorder %v5980_v29, 0  ;;  %v915_v62 = vadd.s32 1, %v5980_v29  ;;  %v784_v19 = vfloor.f32 %v763_v16 }
 0x1a9   : > { %v892_v17 = vsel %vm891_vm0, %v5980_v29, 0  ;;  %vm893_vm1 = vcmp.gt.s32.totalorder %v5982_v47, 0  ;;  %v916_v2 = vadd.s32 1, %v5982_v47  ;;  %v5993_v55 = vtrunc.f32 %v782_v11 }
 0x1aa   : > { %v894_v61 = vsel %vm893_vm1, %v5982_v47, 0  ;;  %vm895_vm2 = vcmp.gt.s32.totalorder %v5984_v39, 0  ;;  %vm905_vm3 = vcmp.lt.s32.totalorder %v892_v17, 15  ;;  %v7944_v52 = vsub.f32 %v761_v18, %v782_v11 }
 0x1ab   : > { %v896_v6 = vsel %vm895_vm2, %v5984_v39, 0  ;;  %vm907_vm4 = vcmp.lt.s32.totalorder %v894_v61, 15  ;;  %v7946_v9 = vsub.f32 %v762_v59, %v783_v13  ;;  %vm926_vm5 = vcmp.gt.s32.totalorder %v915_v62, 0 }
 0x1ac   : > { %v5995_v20 = vtrunc.f32 %v783_v13  ;;  %v7948_v49 = vsub.f32 %v763_v16, %v784_v19  ;;  %v7950_v21 = vsel %vm905_vm3, %v892_v17, 15  ;;  %v917_v58 = vadd.s32 1, %v5984_v39 }
 0x1ad   : > { %v5994_v24 = vcvt.f32.s32 %v5993_v55  ;;  %v7952_v25 = vsel %vm907_vm4, %v894_v61, 15  ;;  %vm909_vm6 = vcmp.lt.s32.totalorder %v896_v6, 15  ;;  %v5997_v45 = vtrunc.f32 %v784_v19 }
 0x1ae   : > { %v5996_v40 = vcvt.f32.s32 %v5995_v20  ;;  %v927_v4 = vsel %vm926_vm5, %v915_v62, 0  ;;  %vm928_vm7 = vcmp.gt.s32.totalorder %v916_v2, 0  ;;  %vm930_vm10 = vcmp.gt.s32.totalorder %v917_v58, 0 }
 0x1af   : > { %vm961_vm8 = vcmp.gt.s32.totalorder %v5994_v24, 0  ;;  %v985_v42 = vadd.s32 1, %v5994_v24  ;;  %v5998_v30 = vcvt.f32.s32 %v5997_v45  ;;  %vm940_vm13 = vcmp.lt.s32.totalorder %v927_v4, 15 }
 0x1b0   : > { %v962_v23 = vsel %vm961_vm8, %v5994_v24, 0  ;;  %vm963_vm9 = vcmp.gt.s32.totalorder %v5996_v40, 0  ;;  %v986_v0 = vadd.s32 1, %v5996_v40  ;;  %v7955_v46 = vsel %vm909_vm6, %v896_v6, 15 }
 0x1b1   : > { %v964_v56 = vsel %vm963_vm9, %v5996_v40, 0  ;;  %vm975_vm11 = vcmp.lt.s32.totalorder %v962_v23, 15  ;;  %vm996_vm12 = vcmp.gt.s32.totalorder %v985_v42, 0  ;;  %vm965_vm14 = vcmp.gt.s32.totalorder %v5998_v30, 0  ;;  %9567 = vst [vmem:[#allocation26_spill] sm:$0xff] %v7955_v46 }
 0x1b2   : > { %vm977_vm15 = vcmp.lt.s32.totalorder %v964_v56, 15  ;;  %v987_v38 = vadd.s32 1, %v5998_v30  ;;  %v966_v60 = vsel %vm965_vm14, %v5998_v30, 0  ;;  %v976_v48 = vsel %vm975_vm11, %v962_v23, 15 }
 0x1b3   : > { %v997_v10 = vsel %vm996_vm12, %v985_v42, 0  ;;  %vm998_vm0 = vcmp.gt.s32.totalorder %v986_v0, 0  ;;  %v978_v1 = vsel %vm977_vm15, %v964_v56, 15  ;;  %vm979_vm1 = vcmp.lt.s32.totalorder %v966_v60, 15 }
 0x1b4   : > { %vm1000_vm2 = vcmp.gt.s32.totalorder %v987_v38, 0  ;;  %v929_v50 = vsel %vm928_vm7, %v916_v2, 0  ;;  %v931_v22 = vsel %vm930_vm10, %v917_v58, 0  ;;  %v7959_v43 = vsel %vm940_vm13, %v927_v4, 15 }
 0x1b5   : > { %v980_v63 = vsel %vm979_vm1, %v966_v60, 15  ;;  %v999_v26 = vsel %vm998_vm0, %v986_v0, 0  ;;  %vm1010_vm3 = vcmp.lt.s32.totalorder %v997_v10, 15  ;;  %v1054_v27 = vrot.slane %v976_v48, %v6516_v8 }
 0x1b6   : > { %v1058_v12 = vrot.slane %v976_v48, %v9552_v32  ;;  %v1001_v44 = vsel %vm1000_vm2, %v987_v38, 0  ;;  %v1062_v5 = vrot.slane %v978_v1, %v6516_v8  ;;  %v1066_v54 = vrot.slane %v978_v1, %v9552_v32 }
 0x1b7   : > { %v1070_v36 = vrot.slane %v980_v63, %v6516_v8  ;;  %vm942_vm4 = vcmp.lt.s32.totalorder %v929_v50, 15  ;;  %vm944_vm5 = vcmp.lt.s32.totalorder %v931_v22, 15  ;;  %v1074_v41 = vrot.slane %v980_v63, %v9552_v32 }
 0x1b8   : > { %v1163_v18 = vsub.f32 1.0, %v7944_v52  ;;  %vm1012_vm6 = vcmp.lt.s32.totalorder %v999_v26, 15  ;;  %v7969_v35 = vrot.slane %v1054_v27, %v6516_v8  ;;  %v7972_v59 = vrot.slane %v1058_v12, %v6516_v8 }
 0x1b9   : > { %v1164_v29 = vsub.f32 1.0, %v7946_v9  ;;  %v1011_v37 = vsel %vm1010_vm3, %v997_v10, 15  ;;  %vm1014_vm7 = vcmp.lt.s32.totalorder %v1001_v44, 15  ;;  %v7976_v47 = vrot.slane %v1062_v5, %v6516_v8 }
 0x1ba   : > { %v7979_v16 = vrot.slane %v1066_v54, %v6516_v8  ;;  %v7981_v39 = vsel %vm942_vm4, %v929_v50, 15  ;;  %v7983_v11 = vsel %vm944_vm5, %v931_v22, 15  ;;  %v7986_v17 = vrot.slane %v1070_v36, %v6516_v8 }
 0x1bb   : > { %9568 = vst [vmem:[#allocation36_spill] sm:$0xff] %v7983_v11  ;;  %v1165_v13 = vsub.f32 1.0, %v7948_v49  ;;  %v1013_v61 = vsel %vm1012_vm6, %v999_v26, 15  ;;  %v7990_v62 = vrot.slane %v1074_v41, %v6516_v8  ;;  %v1208_v19 = vrot.slane %v1163_v18, %v6516_v8 }
 0x1bc   : > { %v1212_v6 = vrot.slane %v1163_v18, %v9552_v32  ;;  %v1015_v2 = vsel %vm1014_vm7, %v1001_v44, 15  ;;  %vm1139_vm8 = vcmp.eq.s32.totalorder %v6499_v3, %v7969_v35  ;;  %vm1140_vm9 = vcmp.eq.s32.totalorder %v6499_v3, %v7972_v59 }
 0x1bd   : > { %v1362_v55 = vrot.slane %v1011_v37, %v6516_v8  ;;  %vm1141_vm10 = vcmp.eq.s32.totalorder %v6499_v3, %v7976_v47  ;;  %vm1142_vm11 = vcmp.eq.s32.totalorder %v6499_v3, %v7979_v16  ;;  %v1216_v20 = vrot.slane %v1164_v29, %v6516_v8 }
 0x1be   : > { %v1220_v58 = vrot.slane %v1164_v29, %v9552_v32  ;;  %v1366_v24 = vrot.slane %v1011_v37, %v9552_v32  ;;  %vm1143_vm12 = vcmp.eq.s32.totalorder %v6499_v3, %v7986_v17  ;;  %v1224_v40 = vrot.slane %v1165_v13, %v6516_v8 }
 0x1bf   : > { %v1228_v45 = vrot.slane %v1165_v13, %v9552_v32  ;;  %v1370_v4 = vrot.slane %v1013_v61, %v6516_v8  ;;  %vm1144_vm13 = vcmp.eq.s32.totalorder %v6499_v3, %v7990_v62  ;;  %v8014_v42 = vrot.slane %v1208_v19, %v6516_v8 }
 0x1c0   : > { %v8017_v30 = vrot.slane %v1212_v6, %v6516_v8  ;;  %v1374_v23 = vrot.slane %v1013_v61, %v9552_v32  ;;  %v1378_v0 = vrot.slane %v1015_v2, %v6516_v8  ;;  %v1382_v56 = vrot.slane %v1015_v2, %v9552_v32 }
 0x1c1   : > { %v8023_v38 = vrot.slane %v1362_v55, %v6516_v8  ;;  %v8026_v60 = vrot.slane %v1366_v24, %v6516_v8  ;;  %v8029_v48 = vrot.slane %v1216_v20, %v6516_v8  ;;  %v8032_v10 = vrot.slane %v1220_v58, %v6516_v8 }
 0x1c2   : > { %v1509_v1 = vrot.slane %v7944_v52, %v6516_v8  ;;  %v1513_v50 = vrot.slane %v7944_v52, %v9552_v32  ;;  %v8039_v22 = vrot.slane %v1224_v40, %v6516_v8  ;;  %v8042_v63 = vrot.slane %v1228_v45, %v6516_v8 }
 0x1c3   : > { %v8045_v26 = vrot.slane %v1370_v4, %v6516_v8  ;;  %v8048_v27 = vrot.slane %v1374_v23, %v6516_v8  ;;  %v8051_v12 = vrot.slane %v1378_v0, %v6516_v8  ;;  %v8054_v44 = vrot.slane %v1382_v56, %v6516_v8 }
 0x1c4   : > { %v1517_v52 = vrot.slane %v7946_v9, %v6516_v8  ;;  %v1521_v5 = vrot.slane %v7946_v9, %v9552_v32  ;;  %vm1447_vm14 = vcmp.eq.s32.totalorder %v6499_v3, %v8023_v38  ;;  %vm1448_vm15 = vcmp.eq.s32.totalorder %v6499_v3, %v8026_v60 }
 0x1c5   : > { %9569 = vst [vmem:[#allocation27_spill] sm:$0xff] %v8045_v26  ;;  %9570 = vst [vmem:[#allocation29_spill] sm:$0xff] %v8048_v27  ;;  %v1525_v54 = vrot.slane %v7948_v49, %v6516_v8  ;;  %v1529_v36 = vrot.slane %v7948_v49, %v9552_v32  ;;  %v8069_v41 = vrot.slane %v1509_v1, %v6516_v8  ;;  %v1307_v13 = vsel %vm1139_vm8, %v8014_v42, 0.0 }
 0x1c6   : > { %9571 = vst [vmem:[#allocation30_spill] sm:$0xff] %v8051_v12  ;;  %9572 = vst [vmem:[#allocation31_spill] sm:$0xff] %v8054_v44  ;;  %v8072_v18 = vrot.slane %v1513_v50, %v6516_v8  ;;  %v8075_v9 = vrot.slane %v1517_v52, %v6516_v8  ;;  %v8078_v29 = vrot.slane %v1521_v5, %v6516_v8  ;;  %v1308_v61 = vsel %vm1140_vm9, %v8017_v30, 0.0 }
 0x1c7   : > { %9573 = vst [vmem:[#allocation32_spill] sm:$0xff] %v8069_v41  ;;  %vm1449_vm0 = vcmp.eq.s32.totalorder %v6499_v3, %v8045_v26  ;;  %vm1450_vm1 = vcmp.eq.s32.totalorder %v6499_v3, %v8048_v27  ;;  %v8085_v49 = vrot.slane %v1525_v54, %v6516_v8  ;;  %v8088_v37 = vrot.slane %v1529_v36, %v6516_v8 }
 0x1c8   : > { %9574 = vst [vmem:[#allocation33_spill] sm:$0xff] %v8072_v18  ;;  %9575 = vst [vmem:[#allocation37_spill] sm:$0xff] %v8075_v9  ;;  %vm1451_vm2 = vcmp.eq.s32.totalorder %v6499_v3, %v8051_v12  ;;  %vm1452_vm3 = vcmp.eq.s32.totalorder %v6499_v3, %v8054_v44  ;;  %v1309_v19 = vsel %vm1141_vm10, %v8029_v48, 0.0  ;;  %v1310_v6 = vsel %vm1142_vm11, %v8032_v10, 0.0 }
 0x1c9   : > { %9576 = vst [vmem:[#allocation34_spill] sm:$0xff] %v8078_v29  ;;  %9577 = vst [vmem:[#allocation35_spill] sm:$0xff] %v8085_v49  ;;  %v1311_v2 = vsel %vm1143_vm12, %v8039_v22, 0.0  ;;  %v1608_v55 = vsel %vm1447_vm14, %v8069_v41, 0.0  ;;  %v1609_v20 = vsel %vm1448_vm15, %v8072_v18, 0.0  ;;  %v1610_v58 = vsel %vm1449_vm0, %v8075_v9, 0.0 }
 0x1ca   : > { %9578 = vst [vmem:[#allocation38_spill] sm:$0xff] %v8088_v37  ;;  %v1611_v24 = vsel %vm1450_vm1, %v8078_v29, 0.0  ;;  %v1695_v40 = vrot.slane %v7950_v21, %v9552_v32  ;;  %v1312_v45 = vsel %vm1144_vm13, %v8042_v63, 0.0  ;;  %v1612_v4 = vsel %vm1451_vm2, %v8085_v49, 0.0 }
 0x1cb   : > { %v1613_v23 = vsel %vm1452_vm3, %v8088_v37, 0.0  ;;  %v1691_v0 = vrot.slane %v7950_v21, %v6516_v8  ;;  %v8134_v56 = vadd.f32 %v1608_v55, %v1307_v13  ;;  %v1699_v1 = vrot.slane %v7952_v25, %v6516_v8 }
 0x1cc   : > { %v1801_v50 = vsub.f32 1.0, %v7939_v28  ;;  %v1802_v52 = vsub.f32 1.0, %v7941_v57  ;;  %v8140_v5 = vadd.f32 %v1609_v20, %v1308_v61  ;;  %v8142_v54 = vadd.f32 %v1610_v58, %v1309_v19 }
 0x1cd   : > { %v8144_v36 = vadd.f32 %v1611_v24, %v1310_v6  ;;  %v1849_v53 = vrot.slane %v1800_v31, %v9552_v32  ;;  %v8149_v21 = vadd.f32 %v1612_v4, %v1311_v2  ;;  %v8151_v13 = vadd.f32 %v1613_v23, %v1312_v45 }
 0x1ce   : > { %v1707_v55 = vrot.slane %v7955_v46, %v6516_v8  ;;  %v1751_v37 = vrot.slane %v1695_v40, %v6516_v8  ;;  %v1703_v61 = vrot.slane %v7952_v25, %v9552_v32  ;;  %v1845_v6 = vrot.slane %v1800_v31, %v6516_v8 }
 0x1cf   : > { %v1853_v2 = vrot.slane %v1801_v50, %v6516_v8  ;;  %v8165_v20 = vrot.slane %v1691_v0, %v6516_v8  ;;  %v8168_v58 = vrot.slane %v1699_v1, %v6516_v8  ;;  %v1861_v24 = vrot.slane %v1802_v52, %v6516_v8 }
 0x1d0   : > { %v1999_v25 = vrot.slane %v7959_v43, %v6516_v8  ;;  %v1865_v40 = vrot.slane %v1802_v52, %v9552_v32  ;;  %v1919_v45 = vrot.slane %v1849_v53, %v6516_v8  ;;  %v2003_v31 = vrot.slane %v7959_v43, %v9552_v32 }
 0x1d1   : > { %v2007_v4 = vrot.slane %v7981_v39, %v6516_v8  ;;  %v8180_v23 = vrot.slane %v1707_v55, %v6516_v8  ;;  %vm1777_vm4 = vcmp.eq.s32.totalorder %v6499_v3, %v1751_v37  ;;  %vm1791_vm5 = vcmp.eq.s32.totalorder %v6513_v7, %v1751_v37 }
 0x1d2   : > { %v1857_v0 = vrot.slane %v1801_v50, %v9552_v32  ;;  %v1915_v1 = vrot.slane %v1845_v6, %v6516_v8  ;;  %v8187_v52 = vrot.slane %v1853_v2, %v6516_v8  ;;  %v2055_v53 = vrot.slane %v1999_v25, %v6516_v8 }
 0x1d3   : > { %v2059_v43 = vrot.slane %v2003_v31, %v6516_v8  ;;  %v8192_v19 = vrot.slane %v1861_v24, %v6516_v8  ;;  %v2063_v55 = vrot.slane %v2007_v4, %v6516_v8  ;;  %v2146_v46 = vrot.slane %v7937_v51, %v6516_v8 }
 0x1d4   : > { %v2150_v37 = vrot.slane %v7937_v51, %v9552_v32  ;;  %v8200_v50 = vrot.slane %v1865_v40, %v6516_v8  ;;  %v1945_v6 = vsel %vm1777_vm4, %v1919_v45, 0.0  ;;  %v1959_v2 = vsel %vm1791_vm5, %v1919_v45, 0.0 }
 0x1d5   : > { %v2015_v25 = vrot.slane %v7983_v11, %v6516_v8  ;;  %vm2084_vm6 = vcmp.eq.s32.totalorder %v6499_v3, %v2055_v53  ;;  %vm2085_vm7 = vcmp.eq.s32.totalorder %v6499_v3, %v2059_v43  ;;  %vm2099_vm8 = vcmp.eq.s32.totalorder %v6513_v7, %v2059_v43 }
 0x1d6   : > { %9579 = vst [vmem:[#allocation39_spill] sm:$0xff] %v8200_v50  ;;  %v2154_v51 = vrot.slane %v7939_v28, %v6516_v8  ;;  %v2158_v40 = vrot.slane %v7939_v28, %v9552_v32  ;;  %v2162_v45 = vrot.slane %v7941_v57, %v6516_v8  ;;  %v2166_v31 = vrot.slane %v7941_v57, %v9552_v32 }
 0x1d7   : > { %vm2086_vm9 = vcmp.eq.s32.totalorder %v6499_v3, %v2063_v55  ;;  %vm2098_vm10 = vcmp.eq.s32.totalorder %v6513_v7, %v2055_v53  ;;  %v2216_v4 = vrot.slane %v2146_v46, %v6516_v8  ;;  %v2220_v24 = vrot.slane %v2150_v37, %v6516_v8 }
 0x1d8   : > { %vm2100_vm11 = vcmp.eq.s32.totalorder %v6513_v7, %v2063_v55  ;;  %v2224_v50 = vrot.slane %v2154_v51, %v6516_v8  ;;  %v2457_v28 = vcombine.low %v8134_v56, %v8140_v5  ;;  %v2459_v11 = vcombine.low %v8142_v54, %v8144_v36 }
 0x1d9   : > { %v8228_v57 = vrot.slane %v2015_v25, %v6516_v8  ;;  %v2228_v49 = vrot.slane %v2158_v40, %v6516_v8  ;;  %v2246_v46 = vsel %vm2085_vm7, %v2220_v24, 0.0  ;;  %v2260_v37 = vsel %vm2099_vm8, %v2220_v24, 0.0 }
 0x1da   : > { %v8236_v29 = vrot.slane %v2162_v45, %v6516_v8  ;;  %v8239_v51 = vrot.slane %v2166_v31, %v6516_v8  ;;  %v2245_v9 = vsel %vm2084_vm6, %v2216_v4, 0.0  ;;  %v2259_v44 = vsel %vm2098_vm10, %v2216_v4, 0.0 }
 0x1db   : > { %v2247_v25 = vsel %vm2086_vm9, %v2224_v50, 0.0  ;;  %v2261_v40 = vsel %vm2100_vm11, %v2224_v50, 0.0  ;;  %v8245_v12 = vadd.f32 %v2246_v46, %v1945_v6  ;;  %v8247_v27 = vadd.f32 %v2260_v37, %v1959_v2 }
 0x1dc   : > { %9580 = vst [vmem:[#allocation40_spill] sm:$0xff] %v8239_v51  ;;  %v2461_v43 = vcombine.low %v8149_v21, %v8151_v13  ;;  %v2469_v24 = vrot.slane %v2457_v28, %v6532_v14  ;;  %v2483_v45 = vrot.slane %v2459_v11, %v6532_v14  ;;  %vm1776_vm12 = vcmp.eq.s32.totalorder %v6499_v3, %v8165_v20 }
 0x1dd   : > { %vm1790_vm13 = vcmp.eq.s32.totalorder %v6513_v7, %v8165_v20  ;;  %v1944_v53 = vsel %vm1776_vm12, %v1915_v1, 0.0  ;;  %v1759_v55 = vrot.slane %v1703_v61, %v6516_v8  ;;  %v1927_v50 = vrot.slane %v1857_v0, %v6516_v8 }
 0x1de   : > { %v2497_v6 = vrot.slane %v2461_v43, %v6532_v14  ;;  %v2505_v2 = vcombine.low %v2469_v24, %v2483_v45  ;;  %v1958_v31 = vsel %vm1790_vm13, %v1915_v1, 0.0  ;;  %v8260_v4 = vadd.f32 %v2245_v9, %v1944_v53 }
 0x1df   : > { %v8262_v28 = vadd.f32 %v2259_v44, %v1958_v31  ;;  %vm1779_vm14 = vcmp.eq.s32.totalorder %v6499_v3, %v1759_v55  ;;  %vm1793_vm15 = vcmp.eq.s32.totalorder %v6513_v7, %v1759_v55  ;;  %v2011_v11 = vrot.slane %v7981_v39, %v9552_v32 }
 0x1e0   : > { %vm1780_vm0 = vcmp.eq.s32.totalorder %v6499_v3, %v8180_v23  ;;  %v2517_v61 = vrot.slane %v2505_v2, %v6532_v14  ;;  %v2545_v20 = vrot.slane %v2497_v6, %v6532_v14  ;;  %v1947_v0 = vsel %vm1779_vm14, %v1927_v50, 0.0 }
 0x1e1   : > { %v1961_v1 = vsel %vm1793_vm15, %v1927_v50, 0.0  ;;  %v2067_v9 = vrot.slane %v2011_v11, %v6516_v8  ;;  %vm1778_vm1 = vcmp.eq.s32.totalorder %v6499_v3, %v8168_v58  ;;  %vm1792_vm2 = vcmp.eq.s32.totalorder %v6513_v7, %v8168_v58 }
 0x1e2   : > { %v2506_v44 = vcombine.high %v2469_v24, %v2483_v45  ;;  %v8277_v46 = vcombine.low %v2517_v61, %v2545_v20  ;;  %v1946_v39 = vsel %vm1778_vm1, %v8187_v52, 0.0  ;;  %v1960_v37 = vsel %vm1792_vm2, %v8187_v52, 0.0 }
 0x1e3   : > { %v2509_v43 = vcombine.high %v2497_v6, %v2497_v6  ;;  %vm2087_vm3 = vcmp.eq.s32.totalorder %v6499_v3, %v2067_v9  ;;  %vm2101_vm4 = vcmp.eq.s32.totalorder %v6513_v7, %v2067_v9  ;;  %v8283_v53 = vadd.f32 %v2247_v25, %v1946_v39 }
 0x1e4   : > { %9581 = vst [vmem:[#allocation41_spill] sm:$0xff] %v8277_v46  ;;  %v8285_v55 = vadd.f32 %v2261_v40, %v1960_v37  ;;  %v2868_v50 = vrot.slane %v8277_v46, %v6535_v15  ;;  %v2864_v58 = vrot.slane %v8277_v46, %v6516_v8  ;;  %v2248_v24 = vsel %vm2087_vm3, %v2228_v49, 0.0 }
 0x1e5   : > { %v2262_v45 = vsel %vm2101_vm4, %v2228_v49, 0.0  ;;  %v8291_v2 = vadd.f32 %v2248_v24, %v1947_v0  ;;  %v2876_v6 = vrot.slane %v8277_v46, %v6627_v33  ;;  %v2872_v25 = vrot.slane %v8277_v46, %v6630_v34 }
 0x1e6   : > { %v8293_v52 = vadd.f32 %v2262_v45, %v1961_v1  ;;  %v3958_v40 = vmul.f32 %v2868_v50, %v8245_v12  ;;  %v3972_v31 = vmul.f32 %v2868_v50, %v8247_v27  ;;  %v3957_v11 = vmul.f32 %v2864_v58, %v8260_v4 }
 0x1e7   : > { %v3971_v9 = vmul.f32 %v2864_v58, %v8262_v28  ;;  %v3960_v49 = vmul.f32 %v2876_v6, %v8291_v2  ;;  %v3959_v1 = vmul.f32 %v2872_v25, %v8283_v53  ;;  %v3973_v39 = vmul.f32 %v2872_v25, %v8285_v55 }
 0x1e8   : > { %v3974_v0 = vmul.f32 %v2876_v6, %v8293_v52  ;;  %vm1794_vm5 = vcmp.eq.s32.totalorder %v6513_v7, %v8180_v23  ;;  %v4406_v37 = vpack.c.bf16 %v3972_v31, %v3958_v40  ;;  %v2531_v45 = vrot.slane %v2506_v44, %v6532_v14 }
 0x1e9   : > { %v4405_v24 = vpack.c.bf16 %v3971_v9, %v3957_v11  ;;  %v2559_v50 = vrot.slane %v2509_v43, %v6532_v14  ;;  %vm2088_vm6 = vcmp.eq.s32.totalorder %v6499_v3, %v8228_v57  ;;  %v4407_v51 = vpack.c.bf16 %v3973_v39, %v3959_v1 }
 0x1ea   : > { %v4408_v58 = vpack.c.bf16 %v3974_v0, %v3960_v49  ;;  %v8313_v46 = vcombine.high %v2517_v61, %v2545_v20  ;;  %v2458_v6 = vcombine.high %v8134_v56, %v8140_v5  ;;  %4805 = vmatprep.subr.bf16.mxu0 %v4406_v37  ;;  %v8329_v61 = vsel %vm1780_vm0, %v8192_v19, 0.0 }
 0x1eb   : > { %v8317_v25 = vcombine.low %v2531_v45, %v2559_v50  ;;  %v8319_v32 = vcombine.high %v2531_v45, %v2559_v50  ;;  %9583 = vst [vmem:[#allocation43_spill] sm:$0xff] %v8329_v61  ;;  %4806 = vmatpush1.bf16.msra.mxu0 %v4405_v24  ;;  %vm2102_vm7 = vcmp.eq.s32.totalorder %v6513_v7, %v8228_v57 }
 0x1ec   : > { %4848 = vmatprep.subr.bf16.mxu1 %v4408_v58  ;;  %v2980_v56 = vrot.slane %v8313_v46, %v6535_v15  ;;  %v2976_v5 = vrot.slane %v8313_v46, %v6516_v8  ;;  %v2988_v20 = vrot.slane %v8313_v46, %v6627_v33  ;;  %v2984_v26 = vrot.slane %v8313_v46, %v6630_v34 }
 0x1ed   : > { %9582 = vst [vmem:[#allocation42_spill] sm:$0xff] %v8317_v25  ;;  %4849 = vmatpush1.bf16.msra.mxu1 %v4407_v51  ;;  %v2924_v40 = vrot.slane %v8317_v25, %v6535_v15  ;;  %v2920_v31 = vrot.slane %v8317_v25, %v6516_v8  ;;  %v2932_v11 = vrot.slane %v8317_v25, %v6627_v33 }
 0x1ee   : > { %v2928_v9 = vrot.slane %v8317_v25, %v6630_v34  ;;  %v4014_v49 = vmul.f32 %v2980_v56, %v8245_v12  ;;  %v4028_v0 = vmul.f32 %v2980_v56, %v8247_v27  ;;  %v4013_v1 = vmul.f32 %v2976_v5, %v8260_v4 }
 0x1ef   : > { %v4027_v51 = vmul.f32 %v2976_v5, %v8262_v28  ;;  %v3986_v39 = vmul.f32 %v2924_v40, %v8245_v12  ;;  %v4000_v37 = vmul.f32 %v2924_v40, %v8247_v27  ;;  %v3985_v24 = vmul.f32 %v2920_v31, %v8260_v4 }
 0x1f0   : > { %v3999_v45 = vmul.f32 %v2920_v31, %v8262_v28  ;;  %v3988_v50 = vmul.f32 %v2932_v11, %v8291_v2  ;;  %v4002_v58 = vmul.f32 %v2932_v11, %v8293_v52  ;;  %v3987_v56 = vmul.f32 %v2928_v9, %v8283_v53 }
 0x1f1   : > { %v4001_v43 = vmul.f32 %v2928_v9, %v8285_v55  ;;  %v4420_v5 = vpack.c.bf16 %v4000_v37, %v3986_v39  ;;  %v4434_v25 = vpack.c.bf16 %v4028_v0, %v4014_v49  ;;  %v4433_v61 = vpack.c.bf16 %v4027_v51, %v4013_v1 }
 0x1f2   : > { %v4419_v44 = vpack.c.bf16 %v3999_v45, %v3985_v24  ;;  %v4422_v40 = vpack.c.bf16 %v4002_v58, %v3988_v50  ;;  %v4016_v41 = vmul.f32 %v2988_v20, %v8291_v2  ;;  %v4030_v31 = vmul.f32 %v2988_v20, %v8293_v52 }
 0x1f3   : > { %v4421_v18 = vpack.c.bf16 %v4001_v43, %v3987_v56  ;;  %4807 = vmatprep.subr.bf16.mxu0 %v4420_v5  ;;  %v3036_v11 = vrot.slane %v8319_v32, %v6535_v15  ;;  %v3032_v9 = vrot.slane %v8319_v32, %v6516_v8  ;;  %v3044_v49 = vrot.slane %v8319_v32, %v6627_v33 }
 0x1f4   : > { %v8373_v43 = vsel %vm1794_vm5, %v8192_v19, 0.0  ;;  %4808 = vmatpush1.bf16.msra.mxu0 %v4419_v44  ;;  %4850 = vmatprep.subr.bf16.mxu1 %v4422_v40  ;;  %v4436_v20 = vpack.c.bf16 %v4030_v31, %v4016_v41  ;;  %v3040_v0 = vrot.slane %v8319_v32, %v6630_v34  ;;  %v2476_v1 = vrot.slane %v2458_v6, %v6532_v14 }
 0x1f5   : > { %v8382_v51 = vsel %vm2088_vm6, %v8236_v29, 0.0  ;;  %4851 = vmatpush1.bf16.msra.mxu1 %v4421_v18  ;;  %4809 = vmatprep.subr.bf16.mxu0 %v4434_v25  ;;  %v4015_v23 = vmul.f32 %v2984_v26, %v8283_v53  ;;  %v4029_v19 = vmul.f32 %v2984_v26, %v8285_v55  ;;  %v4042_v44 = vmul.f32 %v3036_v11, %v8245_v12 }
 0x1f6   : > { %4852 = vmatprep.subr.bf16.mxu1 %v4436_v20  ;;  %v4056_v41 = vmul.f32 %v3036_v11, %v8247_v27  ;;  %v4041_v39 = vmul.f32 %v3032_v9, %v8260_v4  ;;  %v4055_v6 = vmul.f32 %v3032_v9, %v8262_v28  ;;  %v4044_v37 = vmul.f32 %v3044_v49, %v8291_v2 }
 0x1f7   : > { %v4435_v24 = vpack.c.bf16 %v4029_v19, %v4015_v23  ;;  %v4058_v45 = vmul.f32 %v3044_v49, %v8293_v52  ;;  %v4043_v18 = vmul.f32 %v3040_v0, %v8283_v53  ;;  %v4057_v25 = vmul.f32 %v3040_v0, %v8285_v55 }
 0x1f8   : > { %4810 = vmatpush1.bf16.msra.mxu0 %v4433_v61  ;;  %v4448_v26 = vpack.c.bf16 %v4056_v41, %v4042_v44  ;;  %v4447_v50 = vpack.c.bf16 %v4055_v6, %v4041_v39  ;;  %v9584_v58 = vcombine.high %v8142_v54, %v8144_v36  ;;  %v9585_v5 = vcombine.high %v8149_v21, %v8151_v13 }
 0x1f9   : > { %4853 = vmatpush1.bf16.msra.mxu1 %v4435_v24  ;;  %v4450_v31 = vpack.c.bf16 %v4058_v45, %v4044_v37  ;;  %v4449_v11 = vpack.c.bf16 %v4057_v25, %v4043_v18  ;;  %vm1153_vm8 = vcmp.eq.s32.totalorder %v6513_v7, %v7969_v35  ;;  %vm1154_vm9 = vcmp.eq.s32.totalorder %v6513_v7, %v7972_v59 }
 0x1fa   : > { %v2490_v56 = vrot.slane %v9584_v58, %v6532_v14  ;;  %v2504_v40 = vrot.slane %v9585_v5, %v6532_v14  ;;  %4811 = vmatprep.subr.bf16.mxu0 %v4448_v26  ;;  %v8411_v21 = vsel %vm2102_vm7, %v8236_v29, 0.0  ;;  %vm1155_vm10 = vcmp.eq.s32.totalorder %v6513_v7, %v7976_v47 }
 0x1fb   : > { %4854 = vmatprep.subr.bf16.mxu1 %v4450_v31  ;;  %vm1156_vm11 = vcmp.eq.s32.totalorder %v6513_v7, %v7979_v16  ;;  %vm1157_vm12 = vcmp.eq.s32.totalorder %v6513_v7, %v7986_v17  ;;  %vm1158_vm13 = vcmp.eq.s32.totalorder %v6513_v7, %v7990_v62  ;;  %v8428_v47 = vsel %vm1153_vm8, %v8014_v42, 0.0 }
 0x1fc   : > { %v2507_v61 = vcombine.low %v2476_v1, %v2490_v56  ;;  %v2552_v9 = vrot.slane %v2504_v40, %v6532_v14  ;;  %v2508_v54 = vcombine.high %v2476_v1, %v2490_v56  ;;  %v2510_v36 = vcombine.high %v2504_v40, %v2504_v40  ;;  %4812 = vmatpush1.bf16.msra.mxu0 %v4447_v50 }
 0x1fd   : > { %4855 = vmatpush1.bf16.msra.mxu1 %v4449_v11  ;;  %v8434_v16 = vsel %vm1154_vm9, %v8017_v30, 0.0  ;;  %v8437_v17 = vsel %vm1155_vm10, %v8029_v48, 0.0  ;;  %v8440_v29 = vsel %vm1156_vm11, %v8032_v10, 0.0  ;;  %v8449_v35 = vsel %vm1157_vm12, %v8039_v22, 0.0 }
 0x1fe   : > { %v2524_v13 = vrot.slane %v2507_v61, %v6532_v14  ;;  %v2538_v49 = vrot.slane %v2508_v54, %v6532_v14  ;;  %v2566_v20 = vrot.slane %v2510_v36, %v6532_v14  ;;  %v8454_v59 = vsel %vm1158_vm13, %v8042_v63, 0.0  ;;  %v9586_v36 = vld [vmem:[#allocation27_spill] sm:$0xff] }
 0x1ff   : > { %vm1461_vm14 = vcmp.eq.s32.totalorder %v6513_v7, %v8023_v38  ;;  %vm1462_vm15 = vcmp.eq.s32.totalorder %v6513_v7, %v8026_v60  ;;  %vm1463_vm0 = vcmp.eq.s32.totalorder %v6513_v7, %v9586_v36 }
 0x200   : > { %v8442_v62 = vcombine.low %v2524_v13, %v2552_v9  ;;  %v8444_v57 = vcombine.low %v2538_v49, %v2566_v20  ;;  %v8446_v0 = vcombine.high %v2524_v13, %v2552_v9  ;;  %v8451_v42 = vcombine.high %v2538_v49, %v2566_v20 }
 0x202   : > { %v3092_v30 = vrot.slane %v8442_v62, %v6535_v15  ;;  %v3088_v48 = vrot.slane %v8442_v62, %v6516_v8  ;;  %v3100_v10 = vrot.slane %v8442_v62, %v6627_v33  ;;  %v3096_v22 = vrot.slane %v8442_v62, %v6630_v34 }
 0x203   : > { %v3148_v63 = vrot.slane %v8444_v57, %v6535_v15  ;;  %v3144_v1 = vrot.slane %v8444_v57, %v6516_v8  ;;  %v3156_v23 = vrot.slane %v8444_v57, %v6627_v33  ;;  %v3152_v19 = vrot.slane %v8444_v57, %v6630_v34 }
 0x204   : > { %v4070_v44 = vmul.f32 %v3092_v30, %v8245_v12  ;;  %v4084_v41 = vmul.f32 %v3092_v30, %v8247_v27  ;;  %v4069_v39 = vmul.f32 %v3088_v48, %v8260_v4  ;;  %v4083_v6 = vmul.f32 %v3088_v48, %v8262_v28  ;;  %v9587_v30 = vld [vmem:[#allocation32_spill] sm:$0xff] }
 0x205   : > { %v4072_v37 = vmul.f32 %v3100_v10, %v8291_v2  ;;  %v4086_v24 = vmul.f32 %v3100_v10, %v8293_v52  ;;  %v4071_v45 = vmul.f32 %v3096_v22, %v8283_v53  ;;  %v4085_v18 = vmul.f32 %v3096_v22, %v8285_v55 }
 0x206   : > { %v4462_v25 = vpack.c.bf16 %v4084_v41, %v4070_v44  ;;  %v4461_v26 = vpack.c.bf16 %v4083_v6, %v4069_v39  ;;  %v4098_v50 = vmul.f32 %v3148_v63, %v8245_v12  ;;  %v4112_v58 = vmul.f32 %v3148_v63, %v8247_v27 }
 0x207   : > { %v4464_v56 = vpack.c.bf16 %v4086_v24, %v4072_v37  ;;  %v4463_v5 = vpack.c.bf16 %v4085_v18, %v4071_v45  ;;  %v4097_v40 = vmul.f32 %v3144_v1, %v8260_v4  ;;  %v4111_v31 = vmul.f32 %v3144_v1, %v8262_v28  ;;  %v9588_v1 = vld [vmem:[#allocation33_spill] sm:$0xff] }
 0x208   : > { %4813 = vmatprep.subr.bf16.mxu0 %v4462_v25  ;;  %v4476_v11 = vpack.c.bf16 %v4112_v58, %v4098_v50  ;;  %v4100_v61 = vmul.f32 %v3156_v23, %v8291_v2  ;;  %v4114_v9 = vmul.f32 %v3156_v23, %v8293_v52  ;;  %v4099_v54 = vmul.f32 %v3152_v19, %v8283_v53 }
 0x209   : > { %4814 = vmatpush1.bf16.msra.mxu0 %v4461_v26  ;;  %4856 = vmatprep.subr.bf16.mxu1 %v4464_v56  ;;  %v4475_v13 = vpack.c.bf16 %v4111_v31, %v4097_v40  ;;  %v4113_v49 = vmul.f32 %v3152_v19, %v8285_v55  ;;  %v3204_v20 = vrot.slane %v8446_v0, %v6535_v15  ;;  %v1622_v48 = vsel %vm1461_vm14, %v9587_v30, 0.0 }
 0x20a   : > { %4857 = vmatpush1.bf16.msra.mxu1 %v4463_v5  ;;  %4815 = vmatprep.subr.bf16.mxu0 %v4476_v11  ;;  %v4478_v10 = vpack.c.bf16 %v4114_v9, %v4100_v61  ;;  %v3200_v22 = vrot.slane %v8446_v0, %v6516_v8  ;;  %v3212_v63 = vrot.slane %v8446_v0, %v6627_v33  ;;  %v1623_v23 = vsel %vm1462_vm15, %v9588_v1, 0.0  ;;  %v9590_v1 = vld [vmem:[#allocation30_spill] sm:$0xff] }
 0x20b   : > { %v4477_v19 = vpack.c.bf16 %v4113_v49, %v4099_v54  ;;  %v4126_v44 = vmul.f32 %v3204_v20, %v8245_v12  ;;  %v4140_v38 = vmul.f32 %v3204_v20, %v8247_v27  ;;  %v3208_v41 = vrot.slane %v8446_v0, %v6630_v34 }
 0x20c   : > { %4858 = vmatprep.subr.bf16.mxu1 %v4478_v10  ;;  %v4125_v39 = vmul.f32 %v3200_v22, %v8260_v4  ;;  %v4139_v6 = vmul.f32 %v3200_v22, %v8262_v28  ;;  %v4128_v37 = vmul.f32 %v3212_v63, %v8291_v2  ;;  %v4142_v24 = vmul.f32 %v3212_v63, %v8293_v52  ;;  %v9589_v10 = vld [vmem:[#allocation29_spill] sm:$0xff] }
 0x20d   : > { %4816 = vmatpush1.bf16.msra.mxu0 %v4475_v13  ;;  %v4490_v60 = vpack.c.bf16 %v4140_v38, %v4126_v44  ;;  %v4127_v45 = vmul.f32 %v3208_v41, %v8283_v53  ;;  %v4141_v18 = vmul.f32 %v3208_v41, %v8285_v55  ;;  %v3260_v25 = vrot.slane %v8451_v42, %v6535_v15  ;;  %v9592_v38 = vld [vmem:[#allocation37_spill] sm:$0xff] }
 0x20e   : > { %4859 = vmatpush1.bf16.msra.mxu1 %v4477_v19  ;;  %v4489_v26 = vpack.c.bf16 %v4139_v6, %v4125_v39  ;;  %v4492_v50 = vpack.c.bf16 %v4142_v24, %v4128_v37  ;;  %v3256_v58 = vrot.slane %v8451_v42, %v6516_v8  ;;  %v3268_v56 = vrot.slane %v8451_v42, %v6627_v33  ;;  %v9591_v19 = vld [vmem:[#allocation31_spill] sm:$0xff]  ;;  %v9593_v39 = vld [vmem:[#allocation34_spill] sm:$0xff] }
 0x20f   : > { %4817 = vmatprep.subr.bf16.mxu0 %v4490_v60  ;;  %v4491_v5 = vpack.c.bf16 %v4141_v18, %v4127_v45  ;;  %v4154_v40 = vmul.f32 %v3260_v25, %v8245_v12  ;;  %v4168_v31 = vmul.f32 %v3260_v25, %v8247_v27  ;;  %v3264_v11 = vrot.slane %v8451_v42, %v6630_v34  ;;  %v9594_v37 = vld [vmem:[#allocation35_spill] sm:$0xff]  ;;  %v9595_v60 = vld [vmem:[#allocation38_spill] sm:$0xff] }
 0x210   : > { %4860 = vmatprep.subr.bf16.mxu1 %v4492_v50  ;;  %v4153_v61 = vmul.f32 %v3256_v58, %v8260_v4  ;;  %v4167_v9 = vmul.f32 %v3256_v58, %v8262_v28  ;;  %v4156_v54 = vmul.f32 %v3268_v56, %v8291_v2  ;;  %v4170_v13 = vmul.f32 %v3268_v56, %v8293_v52  ;;  %v9596_v56 = vld [vmem:[#allocation26_spill] sm:$0xff] }
 0x211   : > { %4818 = vmatpush1.bf16.msra.mxu0 %v4489_v26  ;;  %v4504_v49 = vpack.c.bf16 %v4168_v31, %v4154_v40  ;;  %v4155_v20 = vmul.f32 %v3264_v11, %v8283_v53  ;;  %v4169_v30 = vmul.f32 %v3264_v11, %v8285_v55  ;;  %vm1464_vm1 = vcmp.eq.s32.totalorder %v6513_v7, %v9589_v10  ;;  %v9599_v11 = vld [vmem:[#allocation43_spill] sm:$0xff] }
 0x212   : > { %4861 = vmatpush1.bf16.msra.mxu1 %v4491_v5  ;;  %v4503_v22 = vpack.c.bf16 %v4167_v9, %v4153_v61  ;;  %v4506_v63 = vpack.c.bf16 %v4170_v13, %v4156_v54  ;;  %vm1465_vm2 = vcmp.eq.s32.totalorder %v6513_v7, %v9590_v1  ;;  %vm1466_vm3 = vcmp.eq.s32.totalorder %v6513_v7, %v9591_v19  ;;  %v9597_v5 = vld [vmem:[#allocation14_spill] sm:$0xff] }
 0x213   : > { %4819 = vmatprep.subr.bf16.mxu0 %v4504_v49  ;;  %v4505_v44 = vpack.c.bf16 %v4169_v30, %v4155_v20  ;;  %v1624_v41 = vsel %vm1463_vm0, %v9592_v38, 0.0  ;;  %v1625_v6 = vsel %vm1464_vm1, %v9593_v39, 0.0  ;;  %v1626_v24 = vsel %vm1465_vm2, %v9594_v37, 0.0  ;;  %v9604_v38 = vld [vmem:[#allocation39_spill] sm:$0xff]  ;;  %v9606_v37 = vld [vmem:[#allocation41_spill] sm:$0xff] }
 0x214   : > { %4862 = vmatprep.subr.bf16.mxu1 %v4506_v63  ;;  %v1627_v45 = vsel %vm1466_vm3, %v9595_v60, 0.0  ;;  %v1650_v18 = vadd.f32 %v1622_v48, %v8428_v47  ;;  %v1651_v25 = vadd.f32 %v1623_v23, %v8434_v16  ;;  %v1652_v26 = vadd.f32 %v1624_v41, %v8437_v17  ;;  %v9600_v17 = vld [vmem:[#allocation36_spill] sm:$0xff] }
 0x215   : > { %4820 = vmatpush1.bf16.msra.mxu0 %v4503_v22  ;;  %v1653_v50 = vadd.f32 %v1625_v6, %v8440_v29  ;;  %v1654_v58 = vadd.f32 %v1626_v24, %v8449_v35  ;;  %v1655_v36 = vadd.f32 %v1627_v45, %v8454_v59  ;;  %v9598_v40 = vrot.slane %v9596_v56, %v9597_v5  ;;  %v9605_v6 = vld [vmem:[#allocation28_spill] sm:$0xff] }
 0x216   : > { %v8559_v61 = vadd.f32 %v8382_v51, %v9599_v11  ;;  %4863 = vmatpush1.bf16.msra.mxu1 %v4505_v44  ;;  %v2711_v47 = vcombine.low %v1650_v18, %v1651_v25  ;;  %v2712_v16 = vcombine.high %v1650_v18, %v1651_v25  ;;  %v9601_v29 = vrot.slane %v9600_v17, %v9597_v5  ;;  %v8567_v35 = vpop.f32.mrb[0].mxu0 }
 0x217   : > { %v1767_v31 = vrot.slane %v9598_v40, %v6516_v8  ;;  %v2713_v59 = vcombine.low %v1652_v26, %v1653_v50  ;;  %v2715_v23 = vcombine.low %v1654_v58, %v1655_v36  ;;  %v2714_v9 = vcombine.high %v1652_v26, %v1653_v50  ;;  %v8569_v13 = vpop.f32.mrb[0].mxu1  ;;  %v8571_v49 = vpop.f32.mrb[1].mxu0 }
 0x218   : > { %v8565_v48 = vrot.slane %v9601_v29, %v6516_v8  ;;  %v2716_v54 = vcombine.high %v1654_v58, %v1655_v36  ;;  %v2723_v51 = vrot.slane %v2711_v47, %v6532_v14  ;;  %v2730_v20 = vrot.slane %v2712_v16, %v6532_v14  ;;  %v8577_v30 = vpop.f32.mrb[1].mxu1  ;;  %v8579_v10 = vpop.f32.mrb[2].mxu0 }
 0x219   : > { %vm1781_vm4 = vcmp.eq.s32.totalorder %v6499_v3, %v1767_v31  ;;  %vm1795_vm5 = vcmp.eq.s32.totalorder %v6513_v7, %v1767_v31  ;;  %9602 = vst [vmem:[#allocation24_spill] sm:$0xff] %v8577_v30  ;;  %9603 = vst [vmem:[#allocation44_spill] sm:$0xff] %v8579_v10  ;;  %v2737_v22 = vrot.slane %v2713_v59, %v6532_v14  ;;  %v8599_v60 = vpop.f32.mrb[2].mxu1  ;;  %v8608_v31 = vpop.f32.mrb[3].mxu0 }
 0x21a   : > { %v2751_v63 = vrot.slane %v2715_v23, %v6532_v14  ;;  %v2744_v1 = vrot.slane %v2714_v9, %v6532_v14  ;;  %v2758_v19 = vrot.slane %v2716_v54, %v6532_v14  ;;  %v8587_v44 = vadd.f32 %v8411_v21, %v8373_v43  ;;  %9607 = vst [vmem:[#allocation25_spill] sm:$0xff] %v8599_v60  ;;  %v8610_v11 = vpop.f32.mrb[3].mxu1 }
 0x21b   : > { %v8590_v41 = vsel %vm1781_vm4, %v9604_v38, 0.0  ;;  %v8593_v39 = vsel %vm1795_vm5, %v9604_v38, 0.0  ;;  %v8597_v24 = vrot.slane %v9606_v37, %v9605_v6  ;;  %v2759_v45 = vcombine.low %v2723_v51, %v2737_v22  ;;  %9608 = vst [vmem:[#allocation46_spill] sm:$0xff] %v8608_v31  ;;  %9609 = vst [vmem:[#allocation45_spill] sm:$0xff] %v8610_v11 }
 0x21c   : > { %v2799_v18 = vrot.slane %v2751_v63, %v6532_v14  ;;  %v2760_v25 = vcombine.high %v2723_v51, %v2737_v22  ;;  %v2763_v26 = vcombine.high %v2751_v63, %v2751_v63  ;;  %v2761_v50 = vcombine.low %v2730_v20, %v2744_v1 }
 0x21d   : > { %v2806_v43 = vrot.slane %v2758_v19, %v6532_v14  ;;  %v2762_v21 = vcombine.high %v2730_v20, %v2744_v1  ;;  %v2764_v58 = vcombine.high %v2758_v19, %v2758_v19  ;;  %v2771_v36 = vrot.slane %v2759_v45, %v6532_v14 }
 0x21e   : > { %v2785_v56 = vrot.slane %v2760_v25, %v6532_v14  ;;  %v2813_v40 = vrot.slane %v2763_v26, %v6532_v14  ;;  %vm2089_vm6 = vcmp.eq.s32.totalorder %v6499_v3, %v8565_v48  ;;  %v2778_v47 = vrot.slane %v2761_v50, %v6532_v14 }
 0x21f   : > { %v2792_v16 = vrot.slane %v2762_v21, %v6532_v14  ;;  %v2820_v17 = vrot.slane %v2764_v58, %v6532_v14  ;;  %vm2103_vm7 = vcmp.eq.s32.totalorder %v6513_v7, %v8565_v48  ;;  %v8617_v29 = vcombine.low %v2771_v36, %v2799_v18 }
 0x220   : > { %v8619_v59 = vcombine.low %v2785_v56, %v2813_v40  ;;  %v8621_v23 = vcombine.high %v2771_v36, %v2799_v18  ;;  %v8623_v9 = vcombine.high %v2785_v56, %v2813_v40  ;;  %v8625_v54 = vcombine.low %v2778_v47, %v2806_v43 }
 0x221   : > { %v8627_v51 = vcombine.low %v2792_v16, %v2820_v17  ;;  %v8629_v20 = vcombine.high %v2778_v47, %v2806_v43  ;;  %v8631_v22 = vcombine.high %v2792_v16, %v2820_v17  ;;  %v3316_v63 = vrot.slane %v8617_v29, %v6535_v15 }
 0x222   : > { %v3312_v1 = vrot.slane %v8617_v29, %v6516_v8  ;;  %v3324_v19 = vrot.slane %v8617_v29, %v6627_v33  ;;  %v3320_v38 = vrot.slane %v8617_v29, %v6630_v34  ;;  %v3372_v45 = vrot.slane %v8619_v59, %v6535_v15 }
 0x223   : > { %v3368_v18 = vrot.slane %v8619_v59, %v6516_v8  ;;  %v3380_v25 = vrot.slane %v8619_v59, %v6627_v33  ;;  %v3376_v26 = vrot.slane %v8619_v59, %v6630_v34  ;;  %v4182_v50 = vmul.f32 %v3316_v63, %v8245_v12 }
 0x224   : > { %v4196_v43 = vmul.f32 %v3316_v63, %v8247_v27  ;;  %v4181_v21 = vmul.f32 %v3312_v1, %v8260_v4  ;;  %v4195_v58 = vmul.f32 %v3312_v1, %v8262_v28  ;;  %v4184_v36 = vmul.f32 %v3324_v19, %v8291_v2 }
 0x225   : > { %v4198_v56 = vmul.f32 %v3324_v19, %v8293_v52  ;;  %v4183_v40 = vmul.f32 %v3320_v38, %v8283_v53  ;;  %v4197_v47 = vmul.f32 %v3320_v38, %v8285_v55  ;;  %v4210_v14 = vmul.f32 %v3372_v45, %v8245_v12 }
 0x226   : > { %v4518_v16 = vpack.c.bf16 %v4196_v43, %v4182_v50  ;;  %v4517_v17 = vpack.c.bf16 %v4195_v58, %v4181_v21  ;;  %v4224_v11 = vmul.f32 %v3372_v45, %v8247_v27  ;;  %v4209_v60 = vmul.f32 %v3368_v18, %v8260_v4  ;;  %v9610_v21 = vld [vmem:[#allocation40_spill] sm:$0xff] }
 0x227   : > { %v4520_v31 = vpack.c.bf16 %v4198_v56, %v4184_v36  ;;  %v4519_v63 = vpack.c.bf16 %v4197_v47, %v4183_v40  ;;  %v4223_v1 = vmul.f32 %v3368_v18, %v8262_v28  ;;  %v4212_v19 = vmul.f32 %v3380_v25, %v8291_v2 }
 0x228   : > { %4821 = vmatprep.subr.bf16.mxu0 %v4518_v16  ;;  %v4532_v30 = vpack.c.bf16 %v4224_v11, %v4210_v14  ;;  %v4226_v10 = vmul.f32 %v3380_v25, %v8293_v52  ;;  %v4211_v38 = vmul.f32 %v3376_v26, %v8283_v53  ;;  %v4225_v43 = vmul.f32 %v3376_v26, %v8285_v55 }
 0x229   : > { %4822 = vmatpush1.bf16.msra.mxu0 %v4517_v17  ;;  %4864 = vmatprep.subr.bf16.mxu1 %v4520_v31  ;;  %v4531_v50 = vpack.c.bf16 %v4223_v1, %v4209_v60  ;;  %v3428_v45 = vrot.slane %v8621_v23, %v6535_v15  ;;  %v8671_v18 = vsel %vm2089_vm6, %v9610_v21, 0.0  ;;  %v3424_v11 = vrot.slane %v8621_v23, %v6516_v8 }
 0x22a   : > { %4865 = vmatpush1.bf16.msra.mxu1 %v4519_v63  ;;  %4823 = vmatprep.subr.bf16.mxu0 %v4532_v30  ;;  %v4534_v14 = vpack.c.bf16 %v4226_v10, %v4212_v19  ;;  %v3436_v60 = vrot.slane %v8621_v23, %v6627_v33  ;;  %v8681_v31 = vsel %vm2103_vm7, %v9610_v21, 0.0  ;;  %v4533_v25 = vpack.c.bf16 %v4225_v43, %v4211_v38 }
 0x22b   : > { %v4238_v26 = vmul.f32 %v3428_v45, %v8245_v12  ;;  %v4252_v58 = vmul.f32 %v3428_v45, %v8247_v27  ;;  %v3432_v30 = vrot.slane %v8621_v23, %v6630_v34  ;;  %v4237_v10 = vmul.f32 %v3424_v11, %v8260_v4 }
 0x22c   : > { %4866 = vmatprep.subr.bf16.mxu1 %v4534_v14  ;;  %v4251_v36 = vmul.f32 %v3424_v11, %v8262_v28  ;;  %v4240_v56 = vmul.f32 %v3436_v60, %v8291_v2  ;;  %v4254_v40 = vmul.f32 %v3436_v60, %v8293_v52  ;;  %v3484_v17 = vrot.slane %v8623_v9, %v6535_v15 }
 0x22d   : > { %4824 = vmatpush1.bf16.msra.mxu0 %v4531_v50  ;;  %v4546_v48 = vpack.c.bf16 %v4252_v58, %v4238_v26  ;;  %v4239_v47 = vmul.f32 %v3432_v30, %v8283_v53  ;;  %v4253_v16 = vmul.f32 %v3432_v30, %v8285_v55  ;;  %v3480_v19 = vrot.slane %v8623_v9, %v6516_v8 }
 0x22e   : > { %4867 = vmatpush1.bf16.msra.mxu1 %v4533_v25  ;;  %v4545_v63 = vpack.c.bf16 %v4251_v36, %v4237_v10  ;;  %v4548_v1 = vpack.c.bf16 %v4254_v40, %v4240_v56  ;;  %v3492_v38 = vrot.slane %v8623_v9, %v6627_v33  ;;  %v4266_v50 = vmul.f32 %v3484_v17, %v8245_v12 }
 0x22f   : > { %4825 = vmatprep.subr.bf16.mxu0 %v4546_v48  ;;  %v4547_v43 = vpack.c.bf16 %v4253_v16, %v4239_v47  ;;  %v4280_v45 = vmul.f32 %v3484_v17, %v8247_v27  ;;  %v3488_v21 = vrot.slane %v8623_v9, %v6630_v34  ;;  %v4265_v14 = vmul.f32 %v3480_v19, %v8260_v4 }
 0x230   : > { %4868 = vmatprep.subr.bf16.mxu1 %v4548_v1  ;;  %v4279_v11 = vmul.f32 %v3480_v19, %v8262_v28  ;;  %v4268_v60 = vmul.f32 %v3492_v38, %v8291_v2  ;;  %v4282_v25 = vmul.f32 %v3492_v38, %v8293_v52  ;;  %v3540_v10 = vrot.slane %v8625_v54, %v6535_v15 }
 0x231   : > { %4826 = vmatpush1.bf16.msra.mxu0 %v4545_v63  ;;  %v4560_v26 = vpack.c.bf16 %v4280_v45, %v4266_v50  ;;  %v4267_v58 = vmul.f32 %v3488_v21, %v8283_v53  ;;  %v4281_v30 = vmul.f32 %v3488_v21, %v8285_v55  ;;  %v3536_v40 = vrot.slane %v8625_v54, %v6516_v8 }
 0x232   : > { %4869 = vmatpush1.bf16.msra.mxu1 %v4547_v43  ;;  %v4559_v36 = vpack.c.bf16 %v4279_v11, %v4265_v14  ;;  %v4562_v56 = vpack.c.bf16 %v4282_v25, %v4268_v60  ;;  %v3548_v48 = vrot.slane %v8625_v54, %v6627_v33  ;;  %v4294_v16 = vmul.f32 %v3540_v10, %v8245_v12 }
 0x233   : > { %4827 = vmatprep.subr.bf16.mxu0 %v4560_v26  ;;  %v4561_v47 = vpack.c.bf16 %v4281_v30, %v4267_v58  ;;  %v4308_v17 = vmul.f32 %v3540_v10, %v8247_v27  ;;  %v3544_v63 = vrot.slane %v8625_v54, %v6630_v34  ;;  %v4293_v1 = vmul.f32 %v3536_v40, %v8260_v4 }
 0x234   : > { %4870 = vmatprep.subr.bf16.mxu1 %v4562_v56  ;;  %v4307_v19 = vmul.f32 %v3536_v40, %v8262_v28  ;;  %v4296_v38 = vmul.f32 %v3548_v48, %v8291_v2  ;;  %v4310_v43 = vmul.f32 %v3548_v48, %v8293_v52  ;;  %v3596_v14 = vrot.slane %v8627_v51, %v6535_v15 }
 0x235   : > { %4828 = vmatpush1.bf16.msra.mxu0 %v4559_v36  ;;  %v4574_v50 = vpack.c.bf16 %v4308_v17, %v4294_v16  ;;  %v4295_v45 = vmul.f32 %v3544_v63, %v8283_v53  ;;  %v4309_v21 = vmul.f32 %v3544_v63, %v8285_v55  ;;  %v3592_v25 = vrot.slane %v8627_v51, %v6516_v8 }
 0x236   : > { %4871 = vmatpush1.bf16.msra.mxu1 %v4561_v47  ;;  %v4573_v11 = vpack.c.bf16 %v4307_v19, %v4293_v1  ;;  %v4576_v60 = vpack.c.bf16 %v4310_v43, %v4296_v38  ;;  %v3604_v26 = vrot.slane %v8627_v51, %v6627_v33  ;;  %v4322_v30 = vmul.f32 %v3596_v14, %v8245_v12 }
 0x237   : > { %4829 = vmatprep.subr.bf16.mxu0 %v4574_v50  ;;  %v4575_v58 = vpack.c.bf16 %v4309_v21, %v4295_v45  ;;  %v4336_v10 = vmul.f32 %v3596_v14, %v8247_v27  ;;  %v3600_v36 = vrot.slane %v8627_v51, %v6630_v34  ;;  %v4321_v56 = vmul.f32 %v3592_v25, %v8260_v4 }
 0x238   : > { %4872 = vmatprep.subr.bf16.mxu1 %v4576_v60  ;;  %v4335_v40 = vmul.f32 %v3592_v25, %v8262_v28  ;;  %v4324_v48 = vmul.f32 %v3604_v26, %v8291_v2  ;;  %v4338_v47 = vmul.f32 %v3604_v26, %v8293_v52  ;;  %v3652_v1 = vrot.slane %v8629_v20, %v6535_v15 }
 0x239   : > { %4830 = vmatpush1.bf16.msra.mxu0 %v4573_v11  ;;  %v4588_v16 = vpack.c.bf16 %v4336_v10, %v4322_v30  ;;  %v4323_v17 = vmul.f32 %v3600_v36, %v8283_v53  ;;  %v4337_v63 = vmul.f32 %v3600_v36, %v8285_v55  ;;  %v3648_v43 = vrot.slane %v8629_v20, %v6516_v8 }
 0x23a   : > { %4873 = vmatpush1.bf16.msra.mxu1 %v4575_v58  ;;  %v4587_v19 = vpack.c.bf16 %v4335_v40, %v4321_v56  ;;  %v4590_v38 = vpack.c.bf16 %v4338_v47, %v4324_v48  ;;  %v3660_v50 = vrot.slane %v8629_v20, %v6627_v33  ;;  %v4350_v21 = vmul.f32 %v3652_v1, %v8245_v12 }
 0x23b   : > { %4831 = vmatprep.subr.bf16.mxu0 %v4588_v16  ;;  %v4589_v45 = vpack.c.bf16 %v4337_v63, %v4323_v17  ;;  %v4364_v14 = vmul.f32 %v3652_v1, %v8247_v27  ;;  %v3656_v11 = vrot.slane %v8629_v20, %v6630_v34  ;;  %v4349_v60 = vmul.f32 %v3648_v43, %v8260_v4 }
 0x23c   : > { %4874 = vmatprep.subr.bf16.mxu1 %v4590_v38  ;;  %v4363_v25 = vmul.f32 %v3648_v43, %v8262_v28  ;;  %v4352_v26 = vmul.f32 %v3660_v50, %v8291_v2  ;;  %v4366_v58 = vmul.f32 %v3660_v50, %v8293_v52  ;;  %v3708_v56 = vrot.slane %v8631_v22, %v6535_v15 }
 0x23d   : > { %4832 = vmatpush1.bf16.msra.mxu0 %v4587_v19  ;;  %v4602_v30 = vpack.c.bf16 %v4364_v14, %v4350_v21  ;;  %v4351_v10 = vmul.f32 %v3656_v11, %v8283_v53  ;;  %v4365_v36 = vmul.f32 %v3656_v11, %v8285_v55  ;;  %v3704_v47 = vrot.slane %v8631_v22, %v6516_v8 }
 0x23e   : > { %4875 = vmatpush1.bf16.msra.mxu1 %v4589_v45  ;;  %v4601_v40 = vpack.c.bf16 %v4363_v25, %v4349_v60  ;;  %v4604_v48 = vpack.c.bf16 %v4366_v58, %v4352_v26  ;;  %v3716_v16 = vrot.slane %v8631_v22, %v6627_v33  ;;  %v4378_v63 = vmul.f32 %v3708_v56, %v8245_v12 }
 0x23f   : > { %4833 = vmatprep.subr.bf16.mxu0 %v4602_v30  ;;  %v4603_v17 = vpack.c.bf16 %v4365_v36, %v4351_v10  ;;  %v4392_v1 = vmul.f32 %v3708_v56, %v8247_v27  ;;  %v3712_v19 = vrot.slane %v8631_v22, %v6630_v34  ;;  %v4377_v15 = vmul.f32 %v3704_v47, %v8260_v4 }
 0x240   : > { %4876 = vmatprep.subr.bf16.mxu1 %v4604_v48  ;;  %v4391_v38 = vmul.f32 %v3704_v47, %v8262_v28  ;;  %v4380_v43 = vmul.f32 %v3716_v16, %v8291_v2  ;;  %v4394_v50 = vmul.f32 %v3716_v16, %v8293_v52  ;;  %v8775_v27 = vadd.f32 %v8671_v18, %v8590_v41 }
 0x241   : > { %4834 = vmatpush1.bf16.msra.mxu0 %v4601_v40  ;;  %v4616_v33 = vpack.c.bf16 %v4392_v1, %v4378_v63  ;;  %v4379_v45 = vmul.f32 %v3712_v19, %v8283_v53  ;;  %v4393_v12 = vmul.f32 %v3712_v19, %v8285_v55  ;;  %v8779_v4 = vadd.f32 %v8681_v31, %v8593_v39  ;;  %v9611_v55 = vld [vmem:[#allocation42_spill] sm:$0xff] }
 0x242   : > { %4877 = vmatpush1.bf16.msra.mxu1 %v4603_v17  ;;  %v4615_v34 = vpack.c.bf16 %v4391_v38, %v4377_v15  ;;  %v4618_v21 = vpack.c.bf16 %v4394_v50, %v4380_v43  ;;  %v2880_v28 = vrot.slane %v9606_v37, %v9597_v5  ;;  %v3962_v53 = vmul.f32 %v8597_v24, %v8775_v27  ;;  %v8806_v40 = vld [vmem:[%s6485_s28] ss:$8 sps:$4 sm:$0xff]   ;;  %v6085_v15 = vld [vmem:[%s6485_s28 + $0x4] ss:$8 sps:$4 sm:$0xff]   ;;  %s5953_s28 = sshll.u32 %s6248_s15, 5  ;;  %s5733_s15 = scalar_lea.sflag [#allocation4], %s6473_s9 }
 0x243   : > { %4835 = vmatprep.subr.bf16.mxu0 %v4616_v33  ;;  %v4617_v2 = vpack.c.bf16 %v4393_v12, %v4379_v45  ;;  %v2940_v52 = vrot.slane %v9611_v55, %v9605_v6  ;;  %v2936_v41 = vrot.slane %v9611_v55, %v9597_v5  ;;  %v3976_v18 = vmul.f32 %v8597_v24, %v8779_v4  ;;  %s9356_s6 = scalar_lea.hbm %s9408_s3, %s5953_s28 }
 0x244   : > { %4878 = vmatprep.subr.bf16.mxu1 %v4618_v21  ;;  %v3961_v39 = vmul.f32 %v2880_v28, %v8559_v61  ;;  %v3975_v37 = vmul.f32 %v2880_v28, %v8587_v44  ;;  %v2996_v31 = vrot.slane %v8313_v46, %v9605_v6  ;;  %v2992_v36 = vrot.slane %v8313_v46, %v9597_v5 }
 0x245   : > { %4836 = vmatpush1.bf16.msra.mxu0 %v4615_v34  ;;  %v3990_v14 = vmul.f32 %v2940_v52, %v8775_v27  ;;  %v4004_v11 = vmul.f32 %v2940_v52, %v8779_v4  ;;  %v3989_v60 = vmul.f32 %v2936_v41, %v8559_v61  ;;  %v4003_v25 = vmul.f32 %v2936_v41, %v8587_v44 }
 0x246   : > { %4879 = vmatpush1.bf16.msra.mxu1 %v4617_v2  ;;  %v4410_v24 = vpack.c.bf16 %v3976_v18, %v3962_v53  ;;  %v4409_v26 = vpack.c.bf16 %v3975_v37, %v3961_v39  ;;  %v4018_v58 = vmul.f32 %v2996_v31, %v8775_v27  ;;  %v4032_v30 = vmul.f32 %v2996_v31, %v8779_v4 }
 0x247   : > { %v4424_v10 = vpack.c.bf16 %v4004_v11, %v3990_v14  ;;  %v3052_v56 = vrot.slane %v8319_v32, %v9605_v6  ;;  %v3048_v48 = vrot.slane %v8319_v32, %v9597_v5  ;;  %v3108_v47 = vrot.slane %v8442_v62, %v9605_v6 }
 0x248   : > { %4838 = vmatmul.mubr.bf16.vlgmr.msra.gmra.mrb[8].mxu0 %v8806_v40  ;;  %4891 = vmatprep.subr.bf16.mxu0 %v4410_v24  ;;  %v4423_v46 = vpack.c.bf16 %v4003_v25, %v3989_v60  ;;  %v4017_v16 = vmul.f32 %v2992_v36, %v8559_v61  ;;  %v4031_v17 = vmul.f32 %v2992_v36, %v8587_v44  ;;  %v8849_v11 = vstv %s266_s20 }
 0x249   : > { %4892 = vmatpush1.bf16.msra.mxu0 %v4409_v26  ;;  %4881 = vmatmul.mubr.bf16.vlgmr.msra.gmra.mrb[8].mxu1 %v8806_v40  ;;  %v4438_v63 = vpack.c.bf16 %v4032_v30, %v4018_v58  ;;  %v4046_v1 = vmul.f32 %v3052_v56, %v8775_v27  ;;  %v4060_v32 = vmul.f32 %v3052_v56, %v8779_v4  ;;  %v8854_v25 = vstv %s8824_s7 }
 0x24a   : > { %4893 = vmatprep.subr.bf16.mxu0 %v4424_v10  ;;  %v4045_v19 = vmul.f32 %v3048_v48, %v8559_v61  ;;  %4923 = vmatprep.mubr.bf16.mxu0 %v6085_v15  ;;  %v4059_v38 = vmul.f32 %v3048_v48, %v8587_v44  ;;  %v4074_v43 = vmul.f32 %v3108_v47, %v8775_v27  ;;  %v8858_v24 = vstv %s278_s11 }
 0x24b   : > { %v4088_v50 = vmul.f32 %v3108_v47, %v8779_v4  ;;  %v3104_v33 = vrot.slane %v8442_v62, %v9597_v5  ;;  %v4437_v45 = vpack.c.bf16 %v4031_v17, %v4017_v16  ;;  %v3164_v12 = vrot.slane %v8444_v57, %v9605_v6 }
 0x24c   : > { %v4452_v34 = vpack.c.bf16 %v4060_v32, %v4046_v1  ;;  %v3160_v21 = vrot.slane %v8444_v57, %v9597_v5  ;;  %v3220_v28 = vrot.slane %v8446_v0, %v9605_v6  ;;  %v4451_v2 = vpack.c.bf16 %v4059_v38, %v4045_v19 }
 0x24d   : > { %4894 = vmatpush1.bf16.msra.mxu0 %v4423_v46  ;;  %v4466_v53 = vpack.c.bf16 %v4088_v50, %v4074_v43  ;;  %v4073_v62 = vmul.f32 %v3104_v33, %v8559_v61  ;;  %v4087_v55 = vmul.f32 %v3104_v33, %v8587_v44  ;;  %v4102_v52 = vmul.f32 %v3164_v12, %v8775_v27 }
 0x24e   : > { %4895 = vmatprep.subr.bf16.mxu0 %v4438_v63  ;;  %v4116_v41 = vmul.f32 %v3164_v12, %v8779_v4  ;;  %v3216_v18 = vrot.slane %v8446_v0, %v9597_v5  ;;  %v4101_v57 = vmul.f32 %v3160_v21, %v8559_v61  ;;  %v4115_v39 = vmul.f32 %v3160_v21, %v8587_v44 }
 0x24f   : > { %v4130_v37 = vmul.f32 %v3220_v28, %v8775_v27  ;;  %v4144_v31 = vmul.f32 %v3220_v28, %v8779_v4  ;;  %v3276_v14 = vrot.slane %v8451_v42, %v9605_v6  ;;  %v3272_v60 = vrot.slane %v8451_v42, %v9597_v5 }
 0x250   : > { %v8856_v0 = vstv %s272_s8  ;;  %v4465_v26 = vpack.c.bf16 %v4087_v55, %v4073_v62  ;;  %v4129_v58 = vmul.f32 %v3216_v18, %v8559_v61  ;;  %v4143_v30 = vmul.f32 %v3216_v18, %v8587_v44 }
 0x251   : > { %4896 = vmatpush1.bf16.msra.mxu0 %v4437_v45  ;;  %v3332_v10 = vrot.slane %v8617_v29, %v9605_v6  ;;  %v4480_v36 = vpack.c.bf16 %v4116_v41, %v4102_v52  ;;  %v4479_v56 = vpack.c.bf16 %v4115_v39, %v4101_v57  ;;  %v4494_v48 = vpack.c.bf16 %v4144_v31, %v4130_v37 }
 0x252   : > { %4897 = vmatprep.subr.bf16.mxu0 %v4452_v34  ;;  %v3328_v42 = vrot.slane %v8617_v29, %v9597_v5  ;;  %v4158_v47 = vmul.f32 %v3276_v14, %v8775_v27  ;;  %v4172_v46 = vmul.f32 %v3276_v14, %v8779_v4  ;;  %v3388_v16 = vrot.slane %v8619_v59, %v9605_v6 }
 0x253   : > { %v3384_v17 = vrot.slane %v8619_v59, %v9597_v5  ;;  %v4157_v63 = vmul.f32 %v3272_v60, %v8559_v61  ;;  %v4171_v1 = vmul.f32 %v3272_v60, %v8587_v44  ;;  %v3444_v32 = vrot.slane %v8621_v23, %v9605_v6 }
 0x254   : > { %v3440_v29 = vrot.slane %v8621_v23, %v9597_v5  ;;  %v4493_v19 = vpack.c.bf16 %v4143_v30, %v4129_v58  ;;  %v4186_v15 = vmul.f32 %v3332_v10, %v8775_v27  ;;  %v3500_v38 = vrot.slane %v8623_v9, %v9605_v6 }
 0x255   : > { %4898 = vmatpush1.bf16.msra.mxu0 %v4451_v2  ;;  %v3496_v59 = vrot.slane %v8623_v9, %v9597_v5  ;;  %v4200_v43 = vmul.f32 %v3332_v10, %v8779_v4  ;;  %v8885_v50 = vmul.f32 %v3328_v42, %v8559_v61  ;;  %v8888_v33 = vmul.f32 %v3328_v42, %v8587_v44 }
 0x256   : > { %4899 = vmatprep.subr.bf16.mxu0 %v4466_v53  ;;  %v3556_v23 = vrot.slane %v8625_v54, %v9605_v6  ;;  %v8893_v45 = vmul.f32 %v3388_v16, %v8775_v27  ;;  %v8896_v12 = vmul.f32 %v3388_v16, %v8779_v4  ;;  %v8899_v9 = vmul.f32 %v3384_v17, %v8559_v61  ;;  %v6086_v16 = vld [vmem:[%s6477_s30] sm:$0xff] }
 0x257   : > { %v8902_v34 = vmul.f32 %v3384_v17, %v8587_v44  ;;  %v8905_v21 = vmul.f32 %v3444_v32, %v8775_v27  ;;  %v8908_v28 = vmul.f32 %v3444_v32, %v8779_v4  ;;  %v8911_v2 = vmul.f32 %v3440_v29, %v8559_v61 }
 0x258   : > { %v8914_v53 = vmul.f32 %v3440_v29, %v8587_v44  ;;  %v8917_v62 = vmul.f32 %v3500_v38, %v8775_v27  ;;  %v8920_v55 = vmul.f32 %v3500_v38, %v8779_v4  ;;  %v8923_v52 = vmul.f32 %v3496_v59, %v8559_v61  ;;  %v6087_v38 = vld [vmem:[%s6477_s30 + $0x8] sm:$0xff] }
 0x259   : > { %4900 = vmatpush1.bf16.msra.mxu0 %v4465_v26  ;;  %v8926_v41 = vmul.f32 %v3496_v59, %v8587_v44  ;;  %v4508_v18 = vpack.c.bf16 %v4172_v46, %v4158_v47  ;;  %v8929_v57 = vmul.f32 %v3556_v23, %v8775_v27  ;;  %v8932_v39 = vmul.f32 %v3556_v23, %v8779_v4 }
 0x25a   : > { %4901 = vmatprep.subr.bf16.mxu0 %v4480_v36  ;;  %v3552_v37 = vrot.slane %v8625_v54, %v9597_v5  ;;  %v4507_v31 = vpack.c.bf16 %v4171_v1, %v4157_v63  ;;  %v4522_v14 = vpack.c.bf16 %v4200_v43, %v4186_v15  ;;  %v4521_v60 = vpack.c.bf16 %v8888_v33, %v8885_v50 }
 0x25b   : > { %v3612_v26 = vrot.slane %v8627_v51, %v9605_v6  ;;  %v4536_v58 = vpack.c.bf16 %v8896_v12, %v8893_v45  ;;  %v4535_v30 = vpack.c.bf16 %v8902_v34, %v8899_v9  ;;  %v8956_v42 = vrot.slane %v8629_v20, %v9605_v6 }
 0x25c   : > { %v8961_v46 = vmul.f32 %v3552_v37, %v8559_v61  ;;  %v291_v17 = vmul.f32 %v6086_v16, %v8854_v25  ;;  %v299_v63 = vmul.f32 %v6086_v16, %v8849_v11  ;;  %v8967_v1 = vmul.f32 %v3552_v37, %v8587_v44  ;;  %v6088_v37 = vld [vmem:[%s6477_s30 + $0x10] sm:$0xff] }
 0x25d   : > { %4902 = vmatpush1.bf16.msra.mxu0 %v4479_v56  ;;  %v342_v32 = vmul.f32 %v6086_v16, %v8856_v0  ;;  %v385_v29 = vmul.f32 %v6086_v16, %v8858_v24  ;;  %v292_v59 = vmul.f32 %v6087_v38, %v8854_v25  ;;  %v300_v43 = vmul.f32 %v6087_v38, %v8849_v11 }
 0x25e   : > { %4903 = vmatprep.subr.bf16.mxu0 %v4494_v48  ;;  %v3608_v48 = vrot.slane %v8627_v51, %v9597_v5  ;;  %v8970_v51 = vmul.f32 %v3612_v26, %v8775_v27  ;;  %v5882_v15 = vrot.slane %v299_v63, 9  ;;  %v343_v23 = vmul.f32 %v6087_v38, %v8856_v0 }
 0x25f   : > { %v5889_v50 = vrot.slane %v342_v32, 10  ;;  %v5896_v33 = vrot.slane %v385_v29, 11  ;;  %v386_v45 = vmul.f32 %v6087_v38, %v8858_v24  ;;  %v301_v16 = vmul.f32 %v6088_v37, %v8849_v11  ;;  %v6089_v38 = vld [vmem:[%s6477_s30 + $0x18] sm:$0xff] }
 0x260   : > { %v334_v12 = vadd.f32 %v5882_v15, %v291_v17  ;;  %v5890_v63 = vrot.slane %v343_v23, 10  ;;  %v344_v56 = vmul.f32 %v6088_v37, %v8856_v0  ;;  %v302_v23 = vmul.f32 %v6089_v38, %v8849_v11 }
 0x261   : > { %4904 = vmatpush1.bf16.msra.mxu0 %v4493_v19  ;;  %v8975_v19 = vmul.f32 %v3612_v26, %v8779_v4  ;;  %v293_v26 = vmul.f32 %v6088_v37, %v8854_v25  ;;  %v5897_v47 = vrot.slane %v386_v45, 11  ;;  %v5884_v36 = vrot.slane %v301_v16, 9 }
 0x262   : > { %4905 = vmatprep.subr.bf16.mxu0 %v4508_v18  ;;  %v5883_v18 = vrot.slane %v300_v43, 9  ;;  %v377_v32 = vadd.f32 %v5889_v50, %v334_v12  ;;  %v5891_v17 = vrot.slane %v344_v56, 10  ;;  %v345_v45 = vmul.f32 %v6089_v38, %v8856_v0 }
 0x263   : > { %v336_v50 = vadd.f32 %v5884_v36, %v293_v26  ;;  %v388_v12 = vmul.f32 %v6089_v38, %v8858_v24  ;;  %v5885_v56 = vrot.slane %v302_v23, 9  ;;  %v9011_v26 = vmul.f32 %v3608_v48, %v8587_v44 }
 0x264   : > { %v335_v29 = vadd.f32 %v5883_v18, %v292_v59  ;;  %v420_v10 = vadd.f32 %v5896_v33, %v377_v32  ;;  %v8999_v18 = vmul.f32 %v3608_v48, %v8559_v61  ;;  %v5892_v16 = vrot.slane %v345_v45, 10 }
 0x265   : > { %4906 = vmatpush1.bf16.msra.mxu0 %v4507_v31  ;;  %v387_v31 = vmul.f32 %v6088_v37, %v8858_v24  ;;  %v379_v36 = vadd.f32 %v5891_v17, %v336_v50 }
 0x266   : > { %4907 = vmatprep.subr.bf16.mxu0 %v4522_v14  ;;  %v294_v14 = vmul.f32 %v6089_v38, %v8854_v25  ;;  %v378_v37 = vadd.f32 %v5890_v63, %v335_v29  ;;  %v701_v33 = vmul.f32 0.5, %v420_v10  ;;  %v5899_v29 = vrot.slane %v388_v12, 11 }
 0x267   : > { %v8987_v54 = vpop.f32.mrb[4].mxu0  ;;  %v5898_v15 = vrot.slane %v387_v31, 11  ;;  %v9022_v10 = vmul.f32 %v8956_v42, %v8775_v27 }
 0x268   : > { %v8991_v43 = vpop.f32.mrb[5].mxu0  ;;  %v421_v63 = vadd.f32 %v5897_v47, %v378_v37  ;;  %v337_v32 = vadd.f32 %v5885_v56, %v294_v14  ;;  %v708_v9 = vadd.f32 0.5, %v701_v33  ;;  %v9614_v56 = vpack.c.bf16 %v8920_v55, %v8917_v62 }
 0x269   : > { %4908 = vmatpush1.bf16.msra.mxu0 %v4521_v60  ;;  %v8995_v59 = vpop.f32.mrb[6].mxu0  ;;  %v3664_v60 = vrot.slane %v8629_v20, %v9597_v5  ;;  %v3720_v20 = vrot.slane %v8631_v22, %v9597_v5 }
 0x26a   : > { %4909 = vmatprep.subr.bf16.mxu0 %v4536_v58  ;;  %v9003_v31 = vpop.f32.mrb[7].mxu0  ;;  %v3724_v58 = vrot.slane %v8631_v22, %v9605_v6  ;;  %v9612_v6 = vpack.c.bf16 %v8908_v28, %v8905_v21  ;;  %v702_v34 = vmul.f32 0.5, %v421_v63  ;;  %v9028_v22 = vmul.f32 %v8956_v42, %v8779_v4 }
 0x26b   : > { %v9031_v47 = vmul.f32 %v3664_v60, %v8559_v61  ;;  %v9034_v14 = vmul.f32 %v3664_v60, %v8587_v44  ;;  %v380_v21 = vadd.f32 %v5892_v16, %v337_v32  ;;  %v715_v23 = vmul.f32 16.0, %v708_v9 }
 0x26c   : > { %v9015_v38 = vpop.f32.mrb[4].mxu1  ;;  %v9039_v17 = vmul.f32 %v3724_v58, %v8775_v27  ;;  %v9613_v42 = vpack.c.bf16 %v8914_v53, %v8911_v2  ;;  %v9047_v50 = vmul.f32 %v3724_v58, %v8779_v4  ;;  %v9050_v12 = vmul.f32 %v3720_v20, %v8559_v61 }
 0x26d   : > { %4910 = vmatpush1.bf16.msra.mxu0 %v4535_v30  ;;  %v422_v30 = vadd.f32 %v5898_v15, %v379_v36  ;;  %v9024_v48 = vpop.f32.mrb[5].mxu1  ;;  %v709_v15 = vadd.f32 0.5, %v702_v34  ;;  %v9053_v60 = vmul.f32 %v3720_v20, %v8587_v44  ;;  %v423_v27 = vadd.f32 %v5899_v29, %v380_v21 }
 0x26e   : > { %4911 = vmatprep.subr.bf16.mxu0 %v9612_v6  ;;  %v9036_v28 = vpop.f32.mrb[6].mxu1  ;;  %v4577_v16 = vpack.c.bf16 %v8967_v1, %v8961_v46  ;;  %v764_v33 = vfloor.f32 %v715_v23  ;;  %v4592_v4 = vpack.c.bf16 %v8975_v19, %v8970_v51  ;;  %v4591_v61 = vpack.c.bf16 %v9011_v26, %v8999_v18 }
 0x26f   : > { %v703_v45 = vmul.f32 0.5, %v422_v30  ;;  %v9041_v37 = vpop.f32.mrb[7].mxu1  ;;  %v716_v2 = vmul.f32 16.0, %v709_v15  ;;  %v4606_v44 = vpack.c.bf16 %v9028_v22, %v9022_v10  ;;  %v704_v58 = vmul.f32 0.5, %v423_v27 }
 0x270   : > { %v9066_v63 = vsub.f32 %v715_v23, %v764_v33  ;;  %v5957_v62 = vtrunc.f32 %v764_v33  ;;  %v9615_v46 = vpack.c.bf16 %v8926_v41, %v8923_v52  ;;  %v4605_v1 = vpack.c.bf16 %v9034_v14, %v9031_v47 }
 0x271   : > { %4912 = vmatpush1.bf16.msra.mxu0 %v9613_v42  ;;  %v710_v53 = vadd.f32 0.5, %v703_v45  ;;  %v765_v55 = vfloor.f32 %v716_v2  ;;  %v4620_v51 = vpack.c.bf16 %v9047_v50, %v9039_v17  ;;  %v4619_v19 = vpack.c.bf16 %v9053_v60, %v9050_v12 }
 0x272   : > { %4913 = vmatprep.subr.bf16.mxu0 %v9614_v56  ;;  %v711_v18 = vadd.f32 0.5, %v704_v58  ;;  %v9616_v26 = vpack.c.bf16 %v8932_v39, %v8929_v57  ;;  %v5958_v20 = vcvt.f32.s32 %v5957_v62  ;;  %v5074_v32 = vsub.f32 1.0, %v9066_v63 }
 0x273   : > { %v9068_v36 = vmul.f32 16.0, %v710_v53  ;;  %v5392_v52 = vrot.slane %v9066_v63, %v6516_v8  ;;  %v9085_v41 = vsub.f32 %v716_v2, %v765_v55  ;;  %v5959_v29 = vtrunc.f32 %v765_v55 }
 0x274   : > { %v5396_v6 = vrot.slane %v9066_v63, %v9597_v5  ;;  %v9090_v9 = vmul.f32 16.0, %v711_v18  ;;  %vm813_vm8 = vcmp.gt.s32.totalorder %v5958_v20, 0  ;;  %v841_v34 = vadd.s32 1, %v5958_v20 }
 0x275   : > { %4914 = vmatpush1.bf16.msra.mxu0 %v9615_v46  ;;  %v766_v10 = vfloor.f32 %v9068_v36  ;;  %v5091_v57 = vrot.slane %v5074_v32, %v6516_v8  ;;  %v9094_v39 = vrot.slane %v5392_v52, %v6516_v8  ;;  %v814_v30 = vsel %vm813_vm8, %v5958_v20, 0 }
 0x276   : > { %4915 = vmatprep.subr.bf16.mxu0 %v9616_v26  ;;  %v5960_v22 = vcvt.f32.s32 %v5959_v29  ;;  %v5075_v47 = vsub.f32 1.0, %v9085_v41  ;;  %v5400_v14 = vrot.slane %v9085_v41, %v6516_v8  ;;  %vm827_vm9 = vcmp.lt.s32.totalorder %v814_v30, 15 }
 0x277   : > { %vm848_vm10 = vcmp.gt.s32.totalorder %v841_v34, 0  ;;  %v9100_v21 = vrot.slane %v5091_v57, %v6516_v8  ;;  %v5095_v17 = vrot.slane %v5074_v32, %v9597_v5  ;;  %v828_v23 = vsel %vm827_vm9, %v814_v30, 15 }
 0x278   : > { %v849_v15 = vsel %vm848_vm10, %v841_v34, 0  ;;  %vm815_vm11 = vcmp.gt.s32.totalorder %v5960_v22, 0  ;;  %v842_v45 = vadd.s32 1, %v5960_v22  ;;  %v4937_v42 = vrot.slane %v828_v23, %v6516_v8 }
 0x279   : > { %4916 = vmatpush1.bf16.msra.mxu0 %v4577_v16  ;;  %vm862_vm12 = vcmp.lt.s32.totalorder %v849_v15, 15  ;;  %v816_v50 = vsel %vm815_vm11, %v5960_v22, 0  ;;  %v5099_v27 = vrot.slane %v5075_v47, %v6516_v8  ;;  %v9106_v16 = vrot.slane %v5400_v14, %v6516_v8 }
 0x27a   : > { %4917 = vmatprep.subr.bf16.mxu0 %v4592_v4  ;;  %v863_v56 = vsel %vm862_vm12, %v849_v15, 15  ;;  %vm829_vm13 = vcmp.lt.s32.totalorder %v816_v50, 15  ;;  %vm850_vm14 = vcmp.gt.s32.totalorder %v842_v45, 0  ;;  %v4993_v33 = vrot.slane %v4937_v42, %v6516_v8 }
 0x27b   : > { %v5245_v2 = vrot.slane %v863_v56, %v6516_v8  ;;  %v830_v53 = vsel %vm829_vm13, %v816_v50, 15  ;;  %v851_v4 = vsel %vm850_vm14, %v842_v45, 0  ;;  %v5169_v63 = vrot.slane %v5099_v27, %v6516_v8 }
 0x27c   : > { %vm864_vm15 = vcmp.lt.s32.totalorder %v851_v4, 15  ;;  %v4945_v58 = vrot.slane %v830_v53, %v6516_v8  ;;  %vm5046_vm0 = vcmp.eq.s32.totalorder %v6499_v3, %v4993_v33  ;;  %v5249_v32 = vrot.slane %v863_v56, %v9597_v5 }
 0x27d   : > { %4918 = vmatpush1.bf16.msra.mxu0 %v4591_v61  ;;  %v4941_v61 = vrot.slane %v828_v23, %v9597_v5  ;;  %v5301_v62 = vrot.slane %v5245_v2, %v6516_v8  ;;  %v865_v55 = vsel %vm864_vm15, %v851_v4, 15  ;;  %v5214_v46 = vsel %vm5046_vm0, %v9100_v21, 0.0 }
 0x27e   : > { %4919 = vmatprep.subr.bf16.mxu0 %v4606_v44  ;;  %v5165_v44 = vrot.slane %v5095_v17, %v6516_v8  ;;  %v5001_v18 = vrot.slane %v4945_v58, %v6516_v8  ;;  %v5253_v26 = vrot.slane %v865_v55, %v6516_v8  ;;  %v5466_v52 = vrot.slane %v5396_v6, %v6516_v8 }
 0x27f   : > { %v4997_v20 = vrot.slane %v4941_v61, %v6516_v8  ;;  %vm5354_vm1 = vcmp.eq.s32.totalorder %v6499_v3, %v5301_v62  ;;  %v4949_v29 = vrot.slane %v830_v53, %v9597_v5  ;;  %v5103_v14 = vrot.slane %v5075_v47, %v9597_v5 }
 0x280   : > { %v5515_v34 = vsel %vm5354_vm1, %v9094_v39, 0.0  ;;  %vm5048_vm2 = vcmp.eq.s32.totalorder %v6499_v3, %v5001_v18  ;;  %v5257_v17 = vrot.slane %v865_v55, %v9597_v5  ;;  %v5404_v45 = vrot.slane %v9085_v41, %v9597_v5 }
 0x281   : > { %4920 = vmatpush1.bf16.msra.mxu0 %v4605_v1  ;;  %v5309_v1 = vrot.slane %v5253_v26, %v6516_v8  ;;  %vm5047_vm3 = vcmp.eq.s32.totalorder %v6499_v3, %v4997_v20  ;;  %v5543_v57 = vadd.f32 %v5515_v34, %v5214_v46  ;;  %v5216_v30 = vsel %vm5048_vm2, %v5169_v63, 0.0 }
 0x282   : > { %4921 = vmatprep.subr.bf16.mxu0 %v4620_v51  ;;  %v5215_v22 = vsel %vm5047_vm3, %v5165_v44, 0.0  ;;  %v5305_v51 = vrot.slane %v5249_v32, %v6516_v8  ;;  %v5005_v6 = vrot.slane %v4949_v29, %v6516_v8  ;;  %v5173_v60 = vrot.slane %v5103_v14, %v6516_v8 }
 0x283   : > { %vm5356_vm4 = vcmp.eq.s32.totalorder %v6499_v3, %v5309_v1  ;;  %v5571_v23 = vmul.f32 %v5543_v57, %v8567_v35  ;;  %v5313_v47 = vrot.slane %v5257_v17, %v6516_v8  ;;  %v5474_v35 = vrot.slane %v5404_v45, %v6516_v8 }
 0x284   : > { %v5517_v15 = vsel %vm5356_vm4, %v9106_v16, 0.0  ;;  %vm5355_vm5 = vcmp.eq.s32.totalorder %v6499_v3, %v5305_v51  ;;  %vm5049_vm6 = vcmp.eq.s32.totalorder %v6499_v3, %v5005_v6  ;;  %vm5060_vm7 = vcmp.eq.s32.totalorder %v6513_v7, %v4993_v33 }
 0x285   : > { %4922 = vmatpush1.bf16.msra.mxu0 %v4619_v19  ;;  %v5545_v42 = vadd.f32 %v5517_v15, %v5216_v30  ;;  %v5516_v12 = vsel %vm5355_vm5, %v5466_v52, 0.0  ;;  %v5217_v27 = vsel %vm5049_vm6, %v5173_v60, 0.0  ;;  %v5228_v41 = vsel %vm5060_vm7, %v9100_v21, 0.0  ;;  %v9617_v21 = vld [vmem:[#allocation44_spill] sm:$0xff] }
 0x286   : > { %v5544_v19 = vadd.f32 %v5516_v12, %v5215_v22  ;;  %vm5368_vm8 = vcmp.eq.s32.totalorder %v6513_v7, %v5301_v62  ;;  %vm5357_vm9 = vcmp.eq.s32.totalorder %v6499_v3, %v5313_v47  ;;  %vm5062_vm10 = vcmp.eq.s32.totalorder %v6513_v7, %v5001_v18  ;;  %v9619_v18 = vld [vmem:[#allocation25_spill] sm:$0xff] }
 0x287   : > { %v5573_v50 = vmul.f32 %v5545_v42, %v8569_v13  ;;  %v5518_v2 = vsel %vm5357_vm9, %v5474_v35, 0.0  ;;  %v5230_v4 = vsel %vm5062_vm10, %v5169_v63, 0.0  ;;  %vm5370_vm11 = vcmp.eq.s32.totalorder %v6513_v7, %v5309_v1 }
 0x288   : > { %4924 = vmatmul.mubr.bf16.vlgmr.msra.gmra.mrb[12].mxu0 %v8806_v40  ;;  %v5572_v56 = vmul.f32 %v5544_v19, %v8571_v49  ;;  %v5529_v40 = vsel %vm5368_vm8, %v9094_v39, 0.0  ;;  %v5546_v33 = vadd.f32 %v5518_v2, %v5217_v27  ;;  %v5531_v13 = vsel %vm5370_vm11, %v9106_v16, 0.0  ;;  %v9618_v39 = vld [vmem:[#allocation24_spill] sm:$0xff] }
 0x289   : > { %v5557_v53 = vadd.f32 %v5529_v40, %v5228_v41  ;;  %vm5061_vm12 = vcmp.eq.s32.totalorder %v6513_v7, %v4997_v20  ;;  %vm5369_vm13 = vcmp.eq.s32.totalorder %v6513_v7, %v5305_v51  ;;  %v5559_v58 = vadd.f32 %v5531_v13, %v5230_v4  ;;  %v9620_v20 = vld [vmem:[#allocation46_spill] sm:$0xff]  ;;  %v9621_v51 = vld [vmem:[#allocation45_spill] sm:$0xff] }
 0x28a   : > { %v5229_v61 = vsel %vm5061_vm12, %v5165_v44, 0.0  ;;  %v5530_v62 = vsel %vm5369_vm13, %v5466_v52, 0.0  ;;  %v5574_v55 = vmul.f32 %v5546_v33, %v9618_v39  ;;  %vm5063_vm14 = vcmp.eq.s32.totalorder %v6513_v7, %v5005_v6 }
 0x28b   : > { %v5585_v49 = vmul.f32 %v5557_v53, %v9617_v21  ;;  %v5558_v46 = vadd.f32 %v5530_v62, %v5229_v61  ;;  %vm5371_vm15 = vcmp.eq.s32.totalorder %v6513_v7, %v5313_v47  ;;  %v5587_v26 = vmul.f32 %v5559_v58, %v9619_v18 }
 0x28c   : > { %v5231_v16 = vsel %vm5063_vm14, %v5173_v60, 0.0  ;;  %v5532_v32 = vsel %vm5371_vm15, %v5474_v35, 0.0  ;;  %v9167_v44 = vsub.f32 %v9068_v36, %v766_v10  ;;  %v5961_v52 = vtrunc.f32 %v766_v10 }
 0x28d   : > { %v5599_v63 = vadd.f32 %v5585_v49, %v5571_v23  ;;  %v5586_v29 = vmul.f32 %v5558_v46, %v9620_v20  ;;  %v5560_v34 = vadd.f32 %v5532_v32, %v5231_v16  ;;  %v5613_v57 = vadd.f32 %v5587_v26, %v5573_v50 }
 0x28e   : > { %v767_v30 = vfloor.f32 %v9090_v9  ;;  %v5962_v14 = vcvt.f32.s32 %v5961_v52  ;;  %v5076_v17 = vsub.f32 1.0, %v9167_v44  ;;  %v5408_v45 = vrot.slane %v9167_v44, %v6516_v8 }
 0x28f   : > { %v5600_v1 = vrot.slane %v5599_v63, 4  ;;  %v5606_v22 = vadd.f32 %v5586_v29, %v5572_v56  ;;  %v5588_v6 = vmul.f32 %v5560_v34, %v9621_v51  ;;  %v5614_v15 = vrot.slane %v5613_v57, 4 }
 0x290   : > { %v5412_v42 = vrot.slane %v9167_v44, %v9597_v5  ;;  %vm817_vm0 = vcmp.gt.s32.totalorder %v5962_v14, 0  ;;  %v843_v12 = vadd.s32 1, %v5962_v14  ;;  %v5107_v35 = vrot.slane %v5076_v17, %v6516_v8 }
 0x291   : > { %v5601_v23 = vadd.f32 %v5600_v1, %v5599_v63  ;;  %v5607_v36 = vrot.slane %v5606_v22, 4  ;;  %v5620_v10 = vadd.f32 %v5588_v6, %v5574_v55  ;;  %v5615_v19 = vadd.f32 %v5614_v15, %v5613_v57 }
 0x292   : > { %v818_v47 = vsel %vm817_vm0, %v5962_v14, 0  ;;  %vm852_vm2 = vcmp.gt.s32.totalorder %v843_v12, 0  ;;  %v5177_v58 = vrot.slane %v5107_v35, %v6516_v8  ;;  %v5478_v18 = vrot.slane %v5408_v45, %v6516_v8 }
 0x293   : > { %v5602_v60 = vrot.slane %v5601_v23, 2  ;;  %v5608_v50 = vadd.f32 %v5607_v36, %v5606_v22  ;;  %v5621_v27 = vrot.slane %v5620_v10, 4  ;;  %vm831_vm1 = vcmp.lt.s32.totalorder %v818_v47, 15 }
 0x294   : > { %v5616_v56 = vrot.slane %v5615_v19, 2  ;;  %v832_v40 = vsel %vm831_vm1, %v818_v47, 15  ;;  %v853_v2 = vsel %vm852_vm2, %v843_v12, 0  ;;  %v5111_v52 = vrot.slane %v5076_v17, %v9597_v5 }
 0x295   : > { %v5603_v41 = vadd.f32 %v5602_v60, %v5601_v23  ;;  %v5609_v53 = vrot.slane %v5608_v50, 2  ;;  %v5622_v4 = vadd.f32 %v5621_v27, %v5620_v10  ;;  %vm866_vm3 = vcmp.lt.s32.totalorder %v853_v2, 15 }
 0x296   : > { %v4953_v33 = vrot.slane %v832_v40, %v6516_v8  ;;  %v5617_v21 = vadd.f32 %v5616_v56, %v5615_v19  ;;  %v867_v49 = vsel %vm866_vm3, %v853_v2, 15  ;;  %v4957_v26 = vrot.slane %v832_v40, %v9597_v5 }
 0x297   : > { %v5604_v13 = vrot.slane %v5603_v41, 1  ;;  %v5610_v61 = vadd.f32 %v5609_v53, %v5608_v50  ;;  %v5623_v62 = vrot.slane %v5622_v4, 2  ;;  %v5261_v55 = vrot.slane %v867_v49, %v6516_v8 }
 0x298   : > { %v5009_v39 = vrot.slane %v4953_v33, %v6516_v8  ;;  %v5618_v63 = vrot.slane %v5617_v21, 1  ;;  %v5013_v44 = vrot.slane %v4957_v26, %v6516_v8  ;;  %v5265_v22 = vrot.slane %v867_v49, %v9597_v5 }
 0x299   : > { %v5605_v46 = vadd.f32 %v5604_v13, %v5603_v41  ;;  %v5611_v16 = vrot.slane %v5610_v61, 1  ;;  %v5624_v32 = vadd.f32 %v5623_v62, %v5622_v4  ;;  %v5317_v20 = vrot.slane %v5261_v55, %v6516_v8 }
 0x29a   : > { %vm5050_vm4 = vcmp.eq.s32.totalorder %v6499_v3, %v5009_v39  ;;  %v5619_v29 = vadd.f32 %v5618_v63, %v5617_v21  ;;  %vm5051_vm6 = vcmp.eq.s32.totalorder %v6499_v3, %v5013_v44  ;;  %v5181_v14 = vrot.slane %v5111_v52, %v6516_v8 }
 0x29b   : > { %v5218_v34 = vsel %vm5050_vm4, %v5177_v58, 0.0  ;;  %v5612_v1 = vadd.f32 %v5611_v16, %v5610_v61  ;;  %v5625_v57 = vrot.slane %v5624_v32, 1  ;;  %vm5358_vm5 = vcmp.eq.s32.totalorder %v6499_v3, %v5317_v20 }
 0x29c   : > { %v9191_v51 = vadd.f32 %v5619_v29, %v5605_v46  ;;  %v5519_v6 = vsel %vm5358_vm5, %v5478_v18, 0.0  ;;  %v5321_v45 = vrot.slane %v5265_v22, %v6516_v8  ;;  %v5482_v36 = vrot.slane %v5412_v42, %v6516_v8 }
 0x29d   : > { %v5626_v23 = vadd.f32 %v5625_v57, %v5624_v32  ;;  %v5547_v15 = vadd.f32 %v5519_v6, %v5218_v34  ;;  %vm5064_vm7 = vcmp.eq.s32.totalorder %v6513_v7, %v5009_v39  ;;  %vm5372_vm8 = vcmp.eq.s32.totalorder %v6513_v7, %v5317_v20 }
 0x29e   : > { %v788_v17 = vsub.f32 %v9090_v9, %v767_v30  ;;  %v5219_v12 = vsel %vm5051_vm6, %v5181_v14, 0.0  ;;  %vm5359_vm9 = vcmp.eq.s32.totalorder %v6499_v3, %v5321_v45  ;;  %v5232_v60 = vsel %vm5064_vm7, %v5177_v58, 0.0 }
 0x29f   : > { %v9202_v10 = vadd.f32 %v5626_v23, %v5612_v1  ;;  %v5520_v19 = vsel %vm5359_vm9, %v5482_v36, 0.0  ;;  %v5533_v47 = vsel %vm5372_vm8, %v5478_v18, 0.0  ;;  %v5963_v35 = vtrunc.f32 %v767_v30 }
 0x2a0   : > { %v5575_v42 = vmul.f32 %v5547_v15, %v8987_v54  ;;  %v5561_v50 = vadd.f32 %v5533_v47, %v5232_v60  ;;  %v5077_v27 = vsub.f32 1.0, %v788_v17  ;;  %vm5065_vm10 = vcmp.eq.s32.totalorder %v6513_v7, %v5013_v44 }
 0x2a1   : > { %v5548_v41 = vadd.f32 %v5520_v19, %v5219_v12  ;;  %v5964_v56 = vcvt.f32.s32 %v5963_v35  ;;  %v5233_v40 = vsel %vm5065_vm10, %v5181_v14, 0.0  ;;  %vm5373_vm11 = vcmp.eq.s32.totalorder %v6513_v7, %v5321_v45 }
 0x2a2   : > { %v5589_v2 = vmul.f32 %v5561_v50, %v8995_v59  ;;  %v5534_v53 = vsel %vm5373_vm11, %v5482_v36, 0.0  ;;  %v5416_v33 = vrot.slane %v788_v17, %v6516_v8  ;;  %v5115_v54 = vrot.slane %v5077_v27, %v6516_v8 }
 0x2a3   : > { %vm819_vm12 = vcmp.gt.s32.totalorder %v5964_v56, 0  ;;  %v844_v4 = vadd.s32 1, %v5964_v56  ;;  %v5562_v9 = vadd.f32 %v5534_v53, %v5233_v40  ;;  %v5119_v21 = vrot.slane %v5077_v27, %v9597_v5 }
 0x2a4   : > { %v5627_v30 = vadd.f32 %v5589_v2, %v5575_v42  ;;  %v820_v13 = vsel %vm819_vm12, %v5964_v56, 0  ;;  %v5576_v49 = vmul.f32 %v5548_v41, %v8991_v43  ;;  %v5420_v39 = vrot.slane %v788_v17, %v9597_v5 }
 0x2a5   : > { %vm833_vm13 = vcmp.lt.s32.totalorder %v820_v13, 15  ;;  %vm854_vm14 = vcmp.gt.s32.totalorder %v844_v4, 0  ;;  %v5590_v58 = vmul.f32 %v5562_v9, %v9003_v31  ;;  %v5185_v16 = vrot.slane %v5115_v54, %v6516_v8 }
 0x2a6   : > { %v5628_v61 = vrot.slane %v5627_v30, 4  ;;  %v834_v59 = vsel %vm833_vm13, %v820_v13, 15  ;;  %v855_v62 = vsel %vm854_vm14, %v844_v4, 0  ;;  %v5189_v43 = vrot.slane %v5119_v21, %v6516_v8 }
 0x2a7   : > { %vm868_vm15 = vcmp.lt.s32.totalorder %v855_v62, 15  ;;  %v4961_v55 = vrot.slane %v834_v59, %v6516_v8  ;;  %v5634_v46 = vadd.f32 %v5590_v58, %v5576_v49  ;;  %v4965_v63 = vrot.slane %v834_v59, %v9597_v5 }
 0x2a8   : > { %v5629_v18 = vadd.f32 %v5628_v61, %v5627_v30  ;;  %v869_v26 = vsel %vm868_vm15, %v855_v62, 15  ;;  %v5486_v44 = vrot.slane %v5416_v33, %v6516_v8  ;;  %v5490_v1 = vrot.slane %v5420_v39, %v6516_v8 }
 0x2a9   : > { %v5017_v32 = vrot.slane %v4961_v55, %v6516_v8  ;;  %v5269_v31 = vrot.slane %v869_v26, %v6516_v8  ;;  %v5635_v20 = vrot.slane %v5634_v46, 4  ;;  %v5021_v29 = vrot.slane %v4965_v63, %v6516_v8 }
 0x2aa   : > { %v5630_v34 = vrot.slane %v5629_v18, 2  ;;  %v5273_v52 = vrot.slane %v869_v26, %v9597_v5 }
 0x2ab   : > { %vm5052_vm0 = vcmp.eq.s32.totalorder %v6499_v3, %v5017_v32  ;;  %v5325_v57 = vrot.slane %v5269_v31, %v6516_v8  ;;  %v5636_v22 = vadd.f32 %v5635_v20, %v5634_v46  ;;  %vm5053_vm1 = vcmp.eq.s32.totalorder %v6499_v3, %v5021_v29 }
 0x2ac   : > { %v5631_v6 = vadd.f32 %v5630_v34, %v5629_v18  ;;  %v5220_v14 = vsel %vm5052_vm0, %v5185_v16, 0.0  ;;  %v5221_v23 = vsel %vm5053_vm1, %v5189_v43, 0.0  ;;  %v5329_v15 = vrot.slane %v5273_v52, %v6516_v8  ;;  %v6091_v34 = vld [vmem:[%s6477_s30 + $0x28] sm:$0xff] }
 0x2ad   : > { %vm5360_vm2 = vcmp.eq.s32.totalorder %v6499_v3, %v5325_v57  ;;  %v5637_v45 = vrot.slane %v5636_v22, 2  ;;  %vm5066_vm3 = vcmp.eq.s32.totalorder %v6513_v7, %v5017_v32  ;;  %vm5374_vm4 = vcmp.eq.s32.totalorder %v6513_v7, %v5325_v57 }
 0x2ae   : > { %v5632_v36 = vrot.slane %v5631_v6, 1  ;;  %v5521_v17 = vsel %vm5360_vm2, %v5486_v44, 0.0  ;;  %vm5361_vm5 = vcmp.eq.s32.totalorder %v6499_v3, %v5329_v15  ;;  %v5234_v12 = vsel %vm5066_vm3, %v5185_v16, 0.0 }
 0x2af   : > { %v5549_v60 = vadd.f32 %v5521_v17, %v5220_v14  ;;  %v5638_v19 = vadd.f32 %v5637_v45, %v5636_v22  ;;  %v5522_v47 = vsel %vm5361_vm5, %v5490_v1, 0.0  ;;  %v5535_v35 = vsel %vm5374_vm4, %v5486_v44, 0.0 }
 0x2b0   : > { %v5633_v42 = vadd.f32 %v5632_v36, %v5631_v6  ;;  %v5550_v50 = vadd.f32 %v5522_v47, %v5221_v23  ;;  %v5563_v27 = vadd.f32 %v5535_v35, %v5234_v12  ;;  %vm5067_vm6 = vcmp.eq.s32.totalorder %v6513_v7, %v5021_v29 }
 0x2b1   : > { %v5577_v41 = vmul.f32 %v5549_v60, %v9015_v38  ;;  %v5639_v56 = vrot.slane %v5638_v19, 1  ;;  %v5235_v40 = vsel %vm5067_vm6, %v5189_v43, 0.0  ;;  %vm5375_vm7 = vcmp.eq.s32.totalorder %v6513_v7, %v5329_v15 }
 0x2b2   : > { %v5699_v2 = vadd.f32 %v9191_v51, %v5633_v42  ;;  %v5591_v53 = vmul.f32 %v5563_v27, %v9036_v28  ;;  %v5536_v4 = vsel %vm5375_vm7, %v5490_v1, 0.0  ;;  %v5578_v9 = vmul.f32 %v5550_v50, %v9024_v48 }
 0x2b3   : > { %v5640_v33 = vadd.f32 %v5639_v56, %v5638_v19  ;;  %v5564_v30 = vadd.f32 %v5536_v4, %v5235_v40  ;;  %v304_v44 = vmul.f32 %v6091_v34, %v8849_v11  ;;  %v296_v57 = vmul.f32 %v6091_v34, %v8854_v25 }
 0x2b4   : > { %v5641_v13 = vadd.f32 %v5591_v53, %v5577_v41  ;;  %v347_v6 = vmul.f32 %v6091_v34, %v8856_v0  ;;  %v390_v45 = vmul.f32 %v6091_v34, %v8858_v24 }
 0x2b5   : > { %v5700_v54 = vadd.f32 %v9202_v10, %v5640_v33  ;;  %v5592_v21 = vmul.f32 %v5564_v30, %v9041_v37  ;;  %v6090_v10 = vld [vmem:[%s6477_s30 + $0x20] sm:$0xff]  ;;  %v5887_v22 = vrot.slane %v304_v44, 9 }
 0x2b6   : > { %v5642_v38 = vrot.slane %v5641_v13, 4  ;;  %v303_v26 = vmul.f32 %v6090_v10, %v8849_v11  ;;  %v295_v16 = vmul.f32 %v6090_v10, %v8854_v25  ;;  %v346_v32 = vmul.f32 %v6090_v10, %v8856_v0 }
 0x2b7   : > { %v5648_v49 = vadd.f32 %v5592_v21, %v5578_v9  ;;  %v389_v31 = vmul.f32 %v6090_v10, %v8858_v24  ;;  %v339_v23 = vadd.f32 %v5887_v22, %v296_v57  ;;  %v5894_v15 = vrot.slane %v347_v6, 10 }
 0x2b8   : > { %v5643_v58 = vadd.f32 %v5642_v38, %v5641_v13  ;;  %v5886_v43 = vrot.slane %v303_v26, 9  ;;  %v5893_v29 = vrot.slane %v346_v32, 10  ;;  %v5901_v12 = vrot.slane %v390_v45, 11 }
 0x2b9   : > { %v5649_v61 = vrot.slane %v5648_v49, 4  ;;  %v5900_v52 = vrot.slane %v389_v31, 11  ;;  %v382_v17 = vadd.f32 %v5894_v15, %v339_v23 }
 0x2ba   : > { %v5644_v59 = vrot.slane %v5643_v58, 2  ;;  %v338_v20 = vadd.f32 %v5886_v43, %v295_v16 }
 0x2bb   : > { %v5650_v62 = vadd.f32 %v5649_v61, %v5648_v49  ;;  %v425_v19 = vadd.f32 %v5901_v12, %v382_v17 }
 0x2bc   : > { %v5645_v51 = vadd.f32 %v5644_v59, %v5643_v58  ;;  %v381_v1 = vadd.f32 %v5893_v29, %v338_v20 }
 0x2bd   : > { %v5651_v39 = vrot.slane %v5650_v62, 2  ;;  %v706_v35 = vmul.f32 0.5, %v425_v19 }
 0x2be   : > { %v5646_v28 = vrot.slane %v5645_v51, 1  ;;  %v424_v14 = vadd.f32 %v5900_v52, %v381_v1 }
 0x2bf   : > { %v5652_v55 = vadd.f32 %v5651_v39, %v5650_v62  ;;  %v713_v50 = vadd.f32 0.5, %v706_v35  ;;  %v6092_v35 = vld [vmem:[%s6477_s30 + $0x30] sm:$0xff]  ;;  %s5880_s30 = sshll.u32 %s6473_s9, 1 }
 0x2c0   : > { %v5647_v46 = vadd.f32 %v5646_v28, %v5645_v51  ;;  %v705_v36 = vmul.f32 0.5, %v424_v14  ;;  %s256_s5 = scalar_lea.vmem [#allocation9], %s5880_s30 }
 0x2c1   : > { %v5653_v48 = vrot.slane %v5652_v55, 1  ;;  %v720_v41 = vmul.f32 16.0, %v713_v50  ;;  %s5749_s18 = sshll.u32 %s256_s5, 4  ;;  %s9358_s18 = int_to_ptr.vmem [resolvable:$true] %s5749_s18 }
 0x2c2   : > { %v9243_v63 = vadd.f32 %v5699_v2, %v5647_v46  ;;  %v712_v60 = vadd.f32 0.5, %v705_v36  ;;  %s6166_s27 = scalar_lea.vmem %s9358_s18, 32  ;;  %p6173_p9 = scmp.lt.s32.totalorder %s9358_s18, %s6171_s10 }
 0x2c3   : > { %v5654_v18 = vadd.f32 %v5653_v48, %v5652_v55  ;;  %v769_v40 = vfloor.f32 %v720_v41  ;;  %p6167_p11 = scmp.ne.s32.totalorder %s9358_s18, %s6166_s27  ;;  %p6174_p0 = scmp.lt.s32.totalorder %s6172_s29, %s6166_s27 }
 0x2c4   : > { %v719_v47 = vmul.f32 16.0, %v712_v60 }
 0x2c5   : > { %v9247_v37 = vadd.f32 %v5700_v54, %v5654_v18  ;;  %v5967_v53 = vtrunc.f32 %v769_v40  ;;  %v790_v18 = vsub.f32 %v720_v41, %v769_v40  ;;  %p6168_p3 = pnand %p6167_p11, %p9624_p8  ;;  %p6175_p12 = por %p6174_p0, %p6173_p9 }
 0x2c6   : > { %v768_v42 = vfloor.f32 %v719_v47 }
 0x2c7   : > { %v5968_v4 = vcvt.f32.s32 %v5967_v53  ;;  %v5079_v34 = vsub.f32 1.0, %v790_v18  ;;  %v5432_v45 = vrot.slane %v790_v18, %v6516_v8  ;;  %v5436_v60 = vrot.slane %v790_v18, %v9597_v5  ;;  %p6169_p4 = pneg %p6168_p3 }
 0x2c8   : > { %v5965_v27 = vtrunc.f32 %v768_v42  ;;  %v789_v13 = vsub.f32 %v719_v47, %v768_v42  ;;  %v305_v42 = vmul.f32 %v6092_v35, %v8849_v11 }
 0x2c9   : > { %v846_v30 = vadd.s32 1, %v5968_v4  ;;  %vm823_vm12 = vcmp.gt.s32.totalorder %v5968_v4, 0  ;;  %v5131_v15 = vrot.slane %v5079_v34, %v6516_v8  ;;  %v5135_v12 = vrot.slane %v5079_v34, %v9597_v5  ;;  %p6176_p2 = pnand %p6175_p12, %p6169_p4 }
 0x2ca   : > { %v5966_v56 = vcvt.f32.s32 %v5965_v27  ;;  %v5078_v38 = vsub.f32 1.0, %v789_v13  ;;  %v824_v61 = vsel %vm823_vm12, %v5968_v4, 0  ;;  %v5424_v51 = vrot.slane %v789_v13, %v6516_v8 }
 0x2cb   : > { %vm858_vm13 = vcmp.gt.s32.totalorder %v846_v30, 0  ;;  %vm837_vm14 = vcmp.lt.s32.totalorder %v824_v61, 15  ;;  %v5428_v20 = vrot.slane %v789_v13, %v9597_v5  ;;  %v5502_v40 = vrot.slane %v5432_v45, %v6516_v8 }
 0x2cc   : > { %v845_v2 = vadd.s32 1, %v5966_v56  ;;  %vm821_vm8 = vcmp.gt.s32.totalorder %v5966_v56, 0  ;;  %v859_v59 = vsel %vm858_vm13, %v846_v30, 0  ;;  %v5123_v39 = vrot.slane %v5078_v38, %v6516_v8 }
 0x2cd   : > { %v822_v33 = vsel %vm821_vm8, %v5966_v56, 0  ;;  %v5127_v28 = vrot.slane %v5078_v38, %v9597_v5  ;;  %vm872_vm15 = vcmp.lt.s32.totalorder %v859_v59, 15  ;;  %v838_v26 = vsel %vm837_vm14, %v824_v61, 15 }
 0x2ce   : > { %vm856_vm9 = vcmp.gt.s32.totalorder %v845_v2, 0  ;;  %vm835_vm10 = vcmp.lt.s32.totalorder %v822_v33, 15  ;;  %v873_v16 = vsel %vm872_vm15, %v859_v59, 15  ;;  %v5193_v43 = vrot.slane %v5123_v39, %v6516_v8 }
 0x2cf   : > { %v857_v9 = vsel %vm856_vm9, %v845_v2, 0  ;;  %v836_v54 = vsel %vm835_vm10, %v822_v33, 15  ;;  %v5494_v32 = vrot.slane %v5424_v51, %v6516_v8  ;;  %v5197_v31 = vrot.slane %v5127_v28, %v6516_v8 }
 0x2d0   : > { %vm870_vm11 = vcmp.lt.s32.totalorder %v857_v9, 15  ;;  %v4969_v49 = vrot.slane %v836_v54, %v6516_v8  ;;  %v4973_v58 = vrot.slane %v836_v54, %v9597_v5  ;;  %v4977_v44 = vrot.slane %v838_v26, %v6516_v8 }
 0x2d1   : > { %v871_v21 = vsel %vm870_vm11, %v857_v9, 15  ;;  %v5285_v52 = vrot.slane %v873_v16, %v6516_v8  ;;  %v4981_v1 = vrot.slane %v838_v26, %v9597_v5  ;;  %v5289_v57 = vrot.slane %v873_v16, %v9597_v5 }
 0x2d2   : > { %v5277_v62 = vrot.slane %v871_v21, %v6516_v8  ;;  %v5025_v55 = vrot.slane %v4969_v49, %v6516_v8  ;;  %v5029_v46 = vrot.slane %v4973_v58, %v6516_v8  ;;  %v5281_v48 = vrot.slane %v871_v21, %v9597_v5 }
 0x2d3   : > { %v5498_v14 = vrot.slane %v5428_v20, %v6516_v8  ;;  %v5033_v36 = vrot.slane %v4977_v44, %v6516_v8  ;;  %v5341_v17 = vrot.slane %v5285_v52, %v6516_v8  ;;  %v5037_v19 = vrot.slane %v4981_v1, %v6516_v8 }
 0x2d4   : > { %v5333_v10 = vrot.slane %v5277_v62, %v6516_v8  ;;  %vm5054_vm0 = vcmp.eq.s32.totalorder %v6499_v3, %v5025_v55  ;;  %vm5055_vm1 = vcmp.eq.s32.totalorder %v6499_v3, %v5029_v46  ;;  %v5337_v29 = vrot.slane %v5281_v48, %v6516_v8 }
 0x2d5   : > { %v5222_v22 = vsel %vm5054_vm0, %v5193_v43, 0.0  ;;  %v5223_v6 = vsel %vm5055_vm1, %v5197_v31, 0.0  ;;  %vm5068_vm3 = vcmp.eq.s32.totalorder %v6513_v7, %v5025_v55  ;;  %v5345_v47 = vrot.slane %v5289_v57, %v6516_v8 }
 0x2d6   : > { %vm5362_vm2 = vcmp.eq.s32.totalorder %v6499_v3, %v5333_v10  ;;  %vm5363_vm4 = vcmp.eq.s32.totalorder %v6499_v3, %v5337_v29  ;;  %vm5376_vm5 = vcmp.eq.s32.totalorder %v6513_v7, %v5333_v10  ;;  %v5236_v41 = vsel %vm5068_vm3, %v5193_v43, 0.0 }
 0x2d7   : > { %v5523_v23 = vsel %vm5362_vm2, %v5494_v32, 0.0  ;;  %v5524_v27 = vsel %vm5363_vm4, %v5498_v14, 0.0  ;;  %vm5069_vm6 = vcmp.eq.s32.totalorder %v6513_v7, %v5029_v46  ;;  %v5201_v56 = vrot.slane %v5131_v15, %v6516_v8 }
 0x2d8   : > { %v5551_v50 = vadd.f32 %v5523_v23, %v5222_v22  ;;  %vm5377_vm7 = vcmp.eq.s32.totalorder %v6513_v7, %v5337_v29  ;;  %v297_v2 = vmul.f32 %v6092_v35, %v8854_v25  ;;  %vm5056_vm8 = vcmp.eq.s32.totalorder %v6499_v3, %v5033_v36 }
 0x2d9   : > { %vm5364_vm9 = vcmp.eq.s32.totalorder %v6499_v3, %v5341_v17  ;;  %v5205_v11 = vrot.slane %v5135_v12, %v6516_v8  ;;  %v5506_v53 = vrot.slane %v5436_v60, %v6516_v8  ;;  %vm5057_vm10 = vcmp.eq.s32.totalorder %v6499_v3, %v5037_v19 }
 0x2da   : > { %vm5365_vm11 = vcmp.eq.s32.totalorder %v6499_v3, %v5345_v47  ;;  %v5888_v4 = vrot.slane %v305_v42, 9  ;;  %v348_v33 = vmul.f32 %v6092_v35, %v8856_v0  ;;  %v5537_v9 = vsel %vm5376_vm5, %v5494_v32, 0.0 }
 0x2db   : > { %v5237_v30 = vsel %vm5069_vm6, %v5197_v31, 0.0  ;;  %vm5070_vm12 = vcmp.eq.s32.totalorder %v6513_v7, %v5033_v36  ;;  %vm5378_vm13 = vcmp.eq.s32.totalorder %v6513_v7, %v5341_v17  ;;  %v5224_v25 = vsel %vm5056_vm8, %v5201_v56, 0.0 }
 0x2dc   : > { %v5525_v13 = vsel %vm5364_vm9, %v5502_v40, 0.0  ;;  %vm5071_vm14 = vcmp.eq.s32.totalorder %v6513_v7, %v5037_v19  ;;  %vm5379_vm15 = vcmp.eq.s32.totalorder %v6513_v7, %v5345_v47  ;;  %v5538_v54 = vsel %vm5377_vm7, %v5498_v14, 0.0 }
 0x2dd   : > { %v5225_v21 = vsel %vm5057_vm10, %v5205_v11, 0.0  ;;  %v5526_v38 = vsel %vm5365_vm11, %v5506_v53, 0.0  ;;  %v391_v0 = vmul.f32 %v6092_v35, %v8858_v24  ;;  %v5238_v49 = vsel %vm5070_vm12, %v5201_v56, 0.0 }
 0x2de   : > { %v5539_v58 = vsel %vm5378_vm13, %v5502_v40, 0.0  ;;  %v340_v61 = vadd.f32 %v5888_v4, %v297_v2  ;;  %v5895_v59 = vrot.slane %v348_v33, 10  ;;  %v5553_v62 = vadd.f32 %v5525_v13, %v5224_v25 }
 0x2df   : > { %v5239_v51 = vsel %vm5071_vm14, %v5205_v11, 0.0  ;;  %v5540_v39 = vsel %vm5379_vm15, %v5506_v53, 0.0  ;;  %v5565_v28 = vadd.f32 %v5537_v9, %v5236_v41  ;;  %v5554_v55 = vadd.f32 %v5526_v38, %v5225_v21 }
 0x2e0   : > { %v5552_v48 = vadd.f32 %v5524_v27, %v5223_v6  ;;  %v5566_v18 = vadd.f32 %v5538_v54, %v5237_v30  ;;  %v5567_v10 = vadd.f32 %v5539_v58, %v5238_v49  ;;  %v5568_v32 = vadd.f32 %v5540_v39, %v5239_v51 }
 0x2e1   : > { %v383_v31 = vadd.f32 %v5895_v59, %v340_v61  ;;  %v5902_v20 = vrot.slane %v391_v0, 11 }
 0x2e3   : > { %v426_v36 = vadd.f32 %v5902_v20, %v383_v31 }
 0x2e5   : > { %v707_v27 = vmul.f32 0.5, %v426_v36 }
 0x2e7   : > { %v714_v9 = vadd.f32 0.5, %v707_v27 }
 0x2e9   : > { %v721_v58 = vmul.f32 16.0, %v714_v9 }
 0x31b   : > { %v4839_v46 = vpop.f32.mrb[8].mxu0 }
 0x31c   : > { %v5579_v26 = vmul.f32 %v5551_v50, %v4839_v46  ;;  %v4841_v16 = vpop.f32.mrb[9].mxu0  ;;  %v4882_v43 = vpop.f32.mrb[8].mxu1 }
 0x31d   : > { %v4843_v24 = vpop.f32.mrb[10].mxu0  ;;  %v5581_v29 = vmul.f32 %v5553_v62, %v4882_v43  ;;  %v4884_v34 = vpop.f32.mrb[9].mxu1  ;;  %v5580_v22 = vmul.f32 %v5552_v48, %v4841_v16 }
 0x31e   : > { %v5593_v44 = vmul.f32 %v5565_v28, %v4843_v24  ;;  %v4845_v52 = vpop.f32.mrb[11].mxu0  ;;  %v5582_v1 = vmul.f32 %v5554_v55, %v4884_v34  ;;  %v4886_v57 = vpop.f32.mrb[10].mxu1  ;;  %v770_v55 = vfloor.f32 %v721_v58 }
 0x31f   : > { %v5594_v14 = vmul.f32 %v5566_v18, %v4845_v52  ;;  %v5595_v23 = vmul.f32 %v5567_v10, %v4886_v57  ;;  %v4888_v15 = vpop.f32.mrb[11].mxu1 }
 0x320   : > { %v5655_v6 = vadd.f32 %v5593_v44, %v5579_v26  ;;  %v5596_v45 = vmul.f32 %v5568_v32, %v4888_v15  ;;  %v5969_v48 = vtrunc.f32 %v770_v55  ;;  %v791_v43 = vsub.f32 %v721_v58, %v770_v55 }
 0x321   : > { %v5662_v17 = vadd.f32 %v5594_v14, %v5580_v22  ;;  %v5669_v12 = vadd.f32 %v5595_v23, %v5581_v29 }
 0x322   : > { %v5656_v60 = vrot.slane %v5655_v6, 4  ;;  %v5676_v19 = vadd.f32 %v5596_v45, %v5582_v1  ;;  %v5970_v18 = vcvt.f32.s32 %v5969_v48  ;;  %v5080_v31 = vsub.f32 1.0, %v791_v43  ;;  %v9622_v48 = vld [vmem:[#allocation17_spill] sm:$0xff] }
 0x323   : > { %v5663_v47 = vrot.slane %v5662_v17, 4  ;;  %v5670_v35 = vrot.slane %v5669_v12, 4  ;;  %v5440_v44 = vrot.slane %v791_v43, %v6516_v8  ;;  %v5444_v1 = vrot.slane %v791_v43, %v9597_v5 }
 0x324   : > { %v5657_v42 = vadd.f32 %v5656_v60, %v5655_v6  ;;  %v5677_v50 = vrot.slane %v5676_v19, 4  ;;  %v847_v10 = vadd.s32 1, %v5970_v18  ;;  %vm825_vm0 = vcmp.gt.s32.totalorder %v5970_v18, 0 }
 0x325   : > { %v5664_v41 = vadd.f32 %v5663_v47, %v5662_v17  ;;  %v5671_v56 = vadd.f32 %v5670_v35, %v5669_v12  ;;  %v826_v26 = vsel %vm825_vm0, %v5970_v18, 0  ;;  %v5139_v34 = vrot.slane %v5080_v31, %v6516_v8 }
 0x326   : > { %v5658_v40 = vrot.slane %v5657_v42, 2  ;;  %v5678_v2 = vadd.f32 %v5677_v50, %v5676_v19  ;;  %vm860_vm1 = vcmp.gt.s32.totalorder %v847_v10, 0  ;;  %vm839_vm2 = vcmp.lt.s32.totalorder %v826_v26, 15 }
 0x327   : > { %v5665_v11 = vrot.slane %v5664_v41, 2  ;;  %v5672_v53 = vrot.slane %v5671_v56, 2  ;;  %v861_v16 = vsel %vm860_vm1, %v847_v10, 0  ;;  %v840_v32 = vsel %vm839_vm2, %v826_v26, 15 }
 0x328   : > { %v5659_v4 = vadd.f32 %v5658_v40, %v5657_v42  ;;  %v5679_v33 = vrot.slane %v5678_v2, 2  ;;  %vm874_vm3 = vcmp.lt.s32.totalorder %v861_v16, 15  ;;  %v4989_v24 = vrot.slane %v840_v32, %v9597_v5 }
 0x329   : > { %v5666_v30 = vadd.f32 %v5665_v11, %v5664_v41  ;;  %v5673_v25 = vadd.f32 %v5672_v53, %v5671_v56  ;;  %v5143_v52 = vrot.slane %v5080_v31, %v9597_v5  ;;  %v5209_v15 = vrot.slane %v5139_v34, %v6516_v8 }
 0x32a   : > { %v5660_v13 = vrot.slane %v5659_v4, 1  ;;  %v5680_v54 = vadd.f32 %v5679_v33, %v5678_v2  ;;  %v5045_v14 = vrot.slane %v4989_v24, %v6516_v8  ;;  %v5510_v6 = vrot.slane %v5440_v44, %v6516_v8 }
 0x32b   : > { %v5667_v21 = vrot.slane %v5666_v30, 1  ;;  %v5674_v38 = vrot.slane %v5673_v25, 1  ;;  %v5213_v45 = vrot.slane %v5143_v52, %v6516_v8  ;;  %v5514_v36 = vrot.slane %v5444_v1, %v6516_v8 }
 0x32c   : > { %v5661_v0 = vadd.f32 %v5660_v13, %v5659_v4  ;;  %v5681_v49 = vrot.slane %v5680_v54, 1  ;;  %vm5059_vm8 = vcmp.eq.s32.totalorder %v6499_v3, %v5045_v14  ;;  %vm5073_vm10 = vcmp.eq.s32.totalorder %v6513_v7, %v5045_v14 }
 0x32d   : > { %v5668_v61 = vadd.f32 %v5667_v21, %v5666_v30  ;;  %v5675_v59 = vadd.f32 %v5674_v38, %v5673_v25  ;;  %v5227_v60 = vsel %vm5059_vm8, %v5213_v45, 0.0  ;;  %v5241_v47 = vsel %vm5073_vm10, %v5213_v45, 0.0 }
 0x32e   : > { %v5703_v62 = vadd.f32 %v9243_v63, %v5661_v0  ;;  %v5682_v51 = vadd.f32 %v5681_v49, %v5680_v54  ;;  %v875_v63 = vsel %vm874_vm3, %v861_v16, 15  ;;  %v9623_v10 = vlaneseq }
 0x32f   : > { %v5704_v39 = vadd.f32 %v9247_v37, %v5668_v61  ;;  %v4985_v37 = vrot.slane %v840_v32, %v6516_v8  ;;  %v5293_v20 = vrot.slane %v875_v63, %v6516_v8  ;;  %v5297_v29 = vrot.slane %v875_v63, %v9597_v5 }
 0x330   : > { %v9318_v28 = vadd.f32 %v5703_v62, %v5675_v59  ;;  %vm5729_vm12 = vcmp.lt.s32.totalorder %v9623_v10, 256 }
 0x331   : > { %v9320_v46 = vadd.f32 %v5704_v39, %v5682_v51  ;;  %v5041_v57 = vrot.slane %v4985_v37, %v6516_v8  ;;  %v5349_v22 = vrot.slane %v5293_v20, %v6516_v8  ;;  %v5353_v23 = vrot.slane %v5297_v29, %v6516_v8 }
 0x333   : > { %vm5058_vm4 = vcmp.eq.s32.totalorder %v6499_v3, %v5041_v57  ;;  %vm5366_vm5 = vcmp.eq.s32.totalorder %v6499_v3, %v5349_v22  ;;  %vm5072_vm6 = vcmp.eq.s32.totalorder %v6513_v7, %v5041_v57  ;;  %vm5380_vm7 = vcmp.eq.s32.totalorder %v6513_v7, %v5349_v22 }
 0x334   : > { %vm5367_vm9 = vcmp.eq.s32.totalorder %v6499_v3, %v5353_v23  ;;  %vm5381_vm11 = vcmp.eq.s32.totalorder %v6513_v7, %v5353_v23  ;;  %v5226_v5 = vsel %vm5058_vm4, %v5209_v15, 0.0  ;;  %v5527_v17 = vsel %vm5366_vm5, %v5510_v6, 0.0 }
 0x335   : > { %v5240_v12 = vsel %vm5072_vm6, %v5209_v15, 0.0  ;;  %v5541_v8 = vsel %vm5380_vm7, %v5510_v6, 0.0  ;;  %v5528_v19 = vsel %vm5367_vm9, %v5514_v36, 0.0  ;;  %v5542_v35 = vsel %vm5381_vm11, %v5514_v36, 0.0 }
 0x336   : > { %v5555_v42 = vadd.f32 %v5527_v17, %v5226_v5  ;;  %v5569_v50 = vadd.f32 %v5541_v8, %v5240_v12  ;;  %v5556_v41 = vadd.f32 %v5528_v19, %v5227_v60  ;;  %v5570_v56 = vadd.f32 %v5542_v35, %v5241_v47 }
 0x35b   : > { %v4925_v27 = vpop.f32.mrb[12].mxu0 }
 0x35c   : > { %v4927_v40 = vpop.f32.mrb[13].mxu0  ;;  %v5583_v3 = vmul.f32 %v5555_v42, %v4925_v27 }
 0x35d   : > { %v4929_v2 = vpop.f32.mrb[14].mxu0  ;;  %v5584_v7 = vmul.f32 %v5556_v41, %v4927_v40 }
 0x35e   : > { %v5597_v11 = vmul.f32 %v5569_v50, %v4929_v2  ;;  %v4931_v53 = vpop.f32.mrb[15].mxu0 }
 0x35f   : > { %v5598_v4 = vmul.f32 %v5570_v56, %v4931_v53 }
 0x360   : > { %v5683_v33 = vadd.f32 %v5597_v11, %v5583_v3 }
 0x361   : > { %v5690_v9 = vadd.f32 %v5598_v4, %v5584_v7 }
 0x362   : > { %v5684_v30 = vrot.slane %v5683_v33, 4 }
 0x363   : > { %v5691_v25 = vrot.slane %v5690_v9, 4 }
 0x364   : > { %v5685_v13 = vadd.f32 %v5684_v30, %v5683_v33 }
 0x365   : > { %v5692_v54 = vadd.f32 %v5691_v25, %v5690_v9 }
 0x366   : > { %v5686_v21 = vrot.slane %v5685_v13, 2 }
 0x367   : > { %v5693_v38 = vrot.slane %v5692_v54, 2 }
 0x368   : > { %v5687_v0 = vadd.f32 %v5686_v21, %v5685_v13 }
 0x369   : > { %v5694_v49 = vadd.f32 %v5693_v38, %v5692_v54 }
 0x36a   : > { %v5688_v58 = vrot.slane %v5687_v0, 1 }
 0x36b   : > { %v5695_v61 = vrot.slane %v5694_v49, 1 }
 0x36c   : > { %v5689_v59 = vadd.f32 %v5688_v58, %v5687_v0 }
 0x36d   : > { %v5696_v62 = vadd.f32 %v5695_v61, %v5694_v49 }
 0x36e   : > { %v5707_v51 = vadd.f32 %v9318_v28, %v5689_v59 }
 0x36f   : > { %v5708_v39 = vadd.f32 %v9320_v46, %v5696_v62 }
 0x371   : > { %v5711_v55 = vcombine.low %v5707_v51, %v5708_v39 }
 0x373   : > { %v5718_v18 = vrot.slane %v5711_v55, %v9622_v48 }
 0x375   : > { %v5725_v26 = vrot.slane %v5718_v18, %v9622_v48 }
 0x377   : > { %5731 = vst.msk [vmem:[%s256_s5] sm:$0x3] %vm5729_vm12, %v5725_v26 }
 0x378   : > { %6179 = shalt.err (!%p6176_p2)
}
 0x379   : > { %s6180_s9 = scalar_lea.hbm %s9356_s6, 32  ;;  %s6184_s20 = scalar_lea.hbm %s9408_s3, 64 }
 0x37a   : > { %p6181_p7 = scmp.ne.s32.totalorder %s9356_s6, %s6180_s9  ;;  %p6185_p5 = scmp.lt.u32.totalorder %s9356_s6, %s9408_s3 }
 0x37b   : > { %p6186_p1 = scmp.lt.u32.totalorder %s6184_s20, %s6180_s9  ;;  %p6188_p11 = scmp.lt.u32.totalorder %s6180_s9, %s9356_s6 }
 0x37c   : > { %p6182_p6 = pnand %p6181_p7, %p9624_p8 }
 0x37d   : > { %p6187_p10 = por %p6186_p1, %p6185_p5 }
 0x37e   : > { %p6183_p13 = pneg %p6182_p6 }
 0x37f   : > { %p6189_p3 = por %p6188_p11, %p6187_p10 }
 0x381   : > { %p6190_p4 = pnand %p6189_p3, %p6183_p13 }
 0x383   : > { %6193 = shalt.err (!%p6190_p4)
}
 0x384   : > { %6007 = dma.vmem_to_hbm [thread:$0]  (%p9624_p8), %s9358_s18, 32, %s9356_s6, %s5733_s15  }
 0x385 PF: > { %s5761_s30 = sand.u32 1, %s6236_s12   ;;  %p9625_p9 = scmp.ne.s32.totalorder %s9490_s24, 0 }
 0x386   : > { %p9626_p0 = scmp.ge.s32.totalorder %s6256_s17, 2  ;;  %s5762_s28 = scalar_lea.sflag [#allocation4], %s5761_s30 }
 0x388   : > { %p6021_p12 = pnand %p9626_p0, %p9625_p9 }
 0x38a   : > { %6231 = dma.done.wait (!%p6021_p12), %s5762_s28, 32  }
 0x38b   : > { %6233 = vsyncadd (!%p6021_p12), %s5762_s28, 4294967264  ;;  %s23_s17 = sadd.s32 1, %s6256_s17   ;;  %s9627_s12 = smov %s6240_s13 }
 0x38c   : > { %p20_p2 = scmp.ge.s32.totalorder %s23_s17, 4   ;;  %s9628_s13 = smov %s6244_s14 }
 0x38d   : > { %s9629_s14 = smov %s6396_s4  ;;  %s9630_s15 = smov %s6252_s16 }
 0x38e   : > { %s9631_s16 = smov %s9633_s26  ;;  %22 = sbr.rel (!%p20_p2) target bundleno = 9 (0x9), region = 95 }
 0x395   :  { %5767 = vsyncpa [#allocation3], 1 }
 0x396   :  { %5769 = vsyncpa [#allocation3 + $0x1], 1 }
 0x397   :  { %5770 = vsyncpa [#allocation8], 1 }
 0x398   :  { %5772 = vsyncpa [#allocation8 + $0x1], 1 }
 0x399   :  { %5773 = vsyncpa [#allocation4], 1 }
 0x39a   :  { %5775 = vsyncpa [#allocation4 + $0x1], 1 }
 0x39b   :  { %5776 = vsyncpa [#allocation5], 1 }
 0x39c   :  { %5778 = vsyncpa [#allocation5 + $0x1], 1 }

</bundles_post_ra>
